<compile_context>
chip_gen: v5e
topology: v5e:2x2
jax: 0.10.0
libtpu: 0.0.40
codegen_flags: <defaults>
</compile_context>

<pallas_src>
import math

import jax
import jax.numpy as jnp
from jax.experimental import pallas as pl
from jax.experimental.pallas import tpu as pltpu

LANE = 128  # TPU vreg lane width


# ---------------------------------------------------------------------------
# Kernel
# ---------------------------------------------------------------------------
def birvae_kernel(x_ref, w1_ref, b1_ref, wmu_ref, bmu_ref,
                  wd_ref, bd_ref, wr_ref, br_ref, eps_ref,
                  out_ref, z_ref):
    # x and all weights arrive as bf16 (MXU-native); accumulate in f32.
    x = x_ref[...]

    # Encoder: relu(x @ W1 + b1) -> mu
    h = jnp.dot(x, w1_ref[...], preferred_element_type=jnp.float32) + b1_ref[...]
    h = jnp.maximum(h, 0.0)
    mu = jnp.dot(h.astype(jnp.bfloat16), wmu_ref[...],
                 preferred_element_type=jnp.float32) + bmu_ref[...]

    # Reparameterize: z = mu + eps (f32 elementwise; padded lanes are 0 + 0).
    z = mu + eps_ref[...]
    z_ref[...] = z.astype(z_ref.dtype)

    # Decoder: sigmoid(relu(z @ Wd + bd) @ Wr + br)
    h2 = jnp.dot(z.astype(jnp.bfloat16), wd_ref[...],
                 preferred_element_type=jnp.float32) + bd_ref[...]
    h2 = jnp.maximum(h2, 0.0)
    logits = jnp.dot(h2.astype(jnp.bfloat16), wr_ref[...],
                     preferred_element_type=jnp.float32) + br_ref[...]
    out_ref[...] = jax.nn.sigmoid(logits).astype(out_ref.dtype)


# ---------------------------------------------------------------------------
# Padding helpers
# ---------------------------------------------------------------------------
def _pad_up(n, m):
    return ((n + m - 1) // m) * m


def _pad_cast(a, rows, cols, dtype):
    """Cast to dtype; zero-pad up to (rows, cols) only if actually needed."""
    a = a.astype(dtype)
    pr, pc = rows - a.shape[0], cols - a.shape[1]
    if pr == 0 and pc == 0:
        return a                      # fast path: no copy, just the cast
    return jnp.pad(a, ((0, pr), (0, pc)))


def _tensorcores_per_chip():
    """Rough per-chip TensorCore count (2 on v7x, 1 on v5e/v6e); safe fallback."""
    try:
        kind = jax.devices()[0].device_kind.lower()
    except Exception:
        return 1
    return 2 if "v7" in kind else 1


# ---------------------------------------------------------------------------
# One-time parameter prep (hoisted out of the per-call forward path)
# ---------------------------------------------------------------------------
def prepare_birvae_params(params):
    """Pad weights/biases to lane-aligned shapes once and cast weights to bf16.

    Returns a dict of device arrays ready to be fed to birvae_forward().
    """
    image_size, hidden_dim = params["w1"].shape
    z_dim = params["wmu"].shape[1]

    Ip = max(_pad_up(image_size, LANE), LANE)
    Hp = max(_pad_up(hidden_dim, LANE), LANE)
    Zp = max(_pad_up(z_dim, LANE), LANE)

    return dict(
        w1=_pad_cast(params["w1"],  Ip, Hp, jnp.bfloat16),
        b1=_pad_cast(params["b1"],  1,  Hp, jnp.float32),
        wmu=_pad_cast(params["wmu"], Hp, Zp, jnp.bfloat16),
        bmu=_pad_cast(params["bmu"], 1,  Zp, jnp.float32),
        wd=_pad_cast(params["wd"],  Zp, Hp, jnp.bfloat16),
        bd=_pad_cast(params["bd"],  1,  Hp, jnp.float32),
        wr=_pad_cast(params["wr"],  Hp, Ip, jnp.bfloat16),
        br=_pad_cast(params["br"],  1,  Ip, jnp.float32),
    )


# ---------------------------------------------------------------------------
# Forward
# ---------------------------------------------------------------------------
def birvae_forward(x, eps, prep, *, bm=None):
    """Fused BIRVAE forward.

    x:   [B, image_size] f32, eps: [B, z_dim] f32
    prep: output of prepare_birvae_params() (pre-padded bf16 weights, f32 biases)
    Returns (out_img [B, image_size], z [B, z_dim]) in f32.
    """
    B, image_size = x.shape
    z_dim = eps.shape[1]
    Ip, Hp = prep["w1"].shape
    Zp = prep["wmu"].shape[1]

    # --- choose the batch tile size ----------------------------------------
    cores = _tensorcores_per_chip()
    if bm is None:
        # One >=128-row tile per TensorCore (grid collapses to (1,) on
        # single-TC v5e/v6e, even 2-way grid on v7x).
        bm = _pad_up(pl.cdiv(_pad_up(B, LANE), cores), LANE)

    # Cap bm so double-buffered x/eps/out/z tiles + single-buffered weights fit
    # comfortably under the scoped-VMEM default (32 MiB on v6e/v7x).
    weight_bytes = (2 * (Ip * Hp + Hp * Zp + Zp * Hp + Hp * Ip)
                    + 4 * (2 * Hp + Zp + Ip))
    per_row_bytes = 2 * (2 * Ip + 4 * Zp + 4 * Ip + 4 * Zp)  # double-buffered
    vmem_budget = 24 * 1024 * 1024
    max_bm = max(LANE, ((vmem_budget - weight_bytes) // max(per_row_bytes, 1))
                 // LANE * LANE)
    bm = min(bm, max_bm)

    Bp = max(_pad_up(B, bm), bm)
    grid = (Bp // bm,)

    # --- per-call input prep (fast path when already aligned) ---------------
    xw = _pad_cast(x,   Bp, Ip, jnp.bfloat16)
    ew = _pad_cast(eps, Bp, Zp, jnp.float32)

    def wspec(r, c):
        # Grid-invariant operand: constant index_map, single-buffered.
        return pl.BlockSpec((r, c), lambda i: (0, 0),
                            pipeline_mode=pl.Buffered(1))

    grid_spec = pltpu.PrefetchScalarGridSpec(
        num_scalar_prefetch=0,
        grid=grid,
        in_specs=[
            pl.BlockSpec((bm, Ip), lambda i: (i, 0)),   # x tile
            wspec(Ip, Hp),                              # W1
            wspec(1, Hp),                               # b1
            wspec(Hp, Zp),                              # Wmu
            wspec(1, Zp),                               # bmu
            wspec(Zp, Hp),                              # Wd
            wspec(1, Hp),                               # bd
            wspec(Hp, Ip),                              # Wr
            wspec(1, Ip),                               # br
            pl.BlockSpec((bm, Zp), lambda i: (i, 0)),   # eps tile
        ],
        out_specs=[
            pl.BlockSpec((bm, Ip), lambda i: (i, 0)),   # out_img tile (lane-dense)
            pl.BlockSpec((bm, Zp), lambda i: (i, 0)),   # z tile (lane-dense)
        ],
    )

    flops = 2 * Bp * (Ip * Hp + Hp * Zp + Zp * Hp + Hp * Ip)
    bytes_accessed = (Bp * Ip * 2 + Bp * Zp * 4          # x (bf16), eps (f32)
                      + weight_bytes                     # weights + biases
                      + Bp * Ip * 4 + Bp * Zp * 4)       # out, z (f32)

    out_img, z = pl.pallas_call(
        birvae_kernel,
        out_shape=(
            jax.ShapeDtypeStruct((Bp, Ip), jnp.float32),
            jax.ShapeDtypeStruct((Bp, Zp), jnp.float32),
        ),
        grid_spec=grid_spec,
        compiler_params=pltpu.CompilerParams(
            dimension_semantics=("parallel",)),
        cost_estimate=pl.CostEstimate(
            flops=int(flops),
            transcendentals=int(Bp * Ip),                # sigmoid
            bytes_accessed=int(bytes_accessed)),
    )(xw, prep["w1"], prep["b1"], prep["wmu"], prep["bmu"],
      prep["wd"], prep["bd"], prep["wr"], prep["br"], ew)

    # Strip batch / lane padding.
    return out_img[:B, :image_size], z[:B, :z_dim]


# ---------------------------------------------------------------------------
# Init / reference
# ---------------------------------------------------------------------------
def init_linear(key, fan_in, fan_out):
    """PyTorch nn.Linear default init: U(-1/sqrt(fan_in), 1/sqrt(fan_in)).
    Weight returned as [in, out] (transposed vs. PyTorch storage)."""
    kw, kb = jax.random.split(key)
    bound = 1.0 / math.sqrt(fan_in)
    w = jax.random.uniform(kw, (fan_in, fan_out), jnp.float32, -bound, bound)
    b = jax.random.uniform(kb, (1, fan_out), jnp.float32, -bound, bound)
    return w, b


def init_birvae_params(key, image_size, hidden_dim, z_dim):
    k1, k2, k3, k4 = jax.random.split(key, 4)
    w1, b1 = init_linear(k1, image_size, hidden_dim)     # encoder.linear
    wmu, bmu = init_linear(k2, hidden_dim, z_dim)        # encoder.mu
    wd, bd = init_linear(k3, z_dim, hidden_dim)          # decoder.linear
    wr, br = init_linear(k4, hidden_dim, image_size)     # decoder.recon
    return dict(w1=w1, b1=b1, wmu=wmu, bmu=bmu, wd=wd, bd=bd, wr=wr, br=br)


def reference_forward(x, params, eps):
    """Pure-JAX f32 reference (no bf16 casting)."""
    h = jax.nn.relu(x @ params["w1"] + params["b1"])
    mu = h @ params["wmu"] + params["bmu"]
    z = mu + eps
    h2 = jax.nn.relu(z @ params["wd"] + params["bd"])
    out = jax.nn.sigmoid(h2 @ params["wr"] + params["br"])
    return out, z


# ---------------------------------------------------------------------------
# Demo / correctness check
# ---------------------------------------------------------------------------
if __name__ == "__main__":
    # Small, module-consistent shapes: flat images of size 16*16 = 256.
    B = 256
    image_size = 256
    hidden_dim = 128
    z_dim = 32
    I = 13.3
    set_var = 1.0 / 4.0 ** (I / z_dim)   # std of eps, as in the PyTorch reference

    key = jax.random.PRNGKey(0)
    kx, kp, ke = jax.random.split(key, 3)

    x = jax.random.uniform(kx, (B, image_size), jnp.float32)   # image-like inputs in [0,1)
    params = init_birvae_params(kp, image_size, hidden_dim, z_dim)
    eps = set_var * jax.random.normal(ke, (B, z_dim), jnp.float32)

    # One-time parameter prep (hoisted out of the per-call forward path).
    prep = jax.tree_util.tree_map(jax.block_until_ready, prepare_birvae_params(params))

    forward = jax.jit(birvae_forward, static_argnames=("bm",))
    out_img, z = forward(x, eps, prep)
    jax.block_until_ready((out_img, z))

    # Correctness check against the f32 reference (kernel uses bf16 MXU
    # operands with f32 accumulation, so tolerances are loosened accordingly).
    ref_out, ref_z = reference_forward(x, params, eps)
    assert out_img.shape == (B, image_size) and z.shape == (B, z_dim)
    assert jnp.allclose(out_img, ref_out, atol=5e-2, rtol=5e-2), \
        float(jnp.max(jnp.abs(out_img - ref_out)))
    assert jnp.allclose(z, ref_z, atol=5e-2, rtol=5e-2), \
        float(jnp.max(jnp.abs(z - ref_z)))

    print("KERNEL_OK")
</pallas_src>

<mosaic_0001>
module attributes {stable_mosaic.version = 11 : i64} {
  func.func @birvae_kernel(%arg0: i32, %arg1: memref<256x256xbf16, #tpu.memory_space<vmem>>, %arg2: memref<256x128xbf16, #tpu.memory_space<vmem>>, %arg3: memref<1x128xf32, #tpu.memory_space<vmem>>, %arg4: memref<128x128xbf16, #tpu.memory_space<vmem>>, %arg5: memref<1x128xf32, #tpu.memory_space<vmem>>, %arg6: memref<128x128xbf16, #tpu.memory_space<vmem>>, %arg7: memref<1x128xf32, #tpu.memory_space<vmem>>, %arg8: memref<128x256xbf16, #tpu.memory_space<vmem>>, %arg9: memref<1x256xf32, #tpu.memory_space<vmem>>, %arg10: memref<256x128xf32, #tpu.memory_space<vmem>>, %arg11: memref<256x256xf32, #tpu.memory_space<vmem>>, %arg12: memref<256x128xf32, #tpu.memory_space<vmem>>) attributes {dimension_semantics = [#tpu.dimension_semantics<parallel>], iteration_bounds = array<i64: 1>, scalar_prefetch = 0 : i64, scratch_operands = 0 : i64, tpu.core_type = #tpu.core_type<tc>, window_params = [{transform_indices = @transform_0, window_bounds = array<i64: 256, 256>}, {pipeline_mode = #tpu.pipeline_mode<synchronous>, transform_indices = @transform_1, window_bounds = array<i64: 256, 128>}, {pipeline_mode = #tpu.pipeline_mode<synchronous>, transform_indices = @transform_2, window_bounds = array<i64: 1, 128>}, {pipeline_mode = #tpu.pipeline_mode<synchronous>, transform_indices = @transform_3, window_bounds = array<i64: 128, 128>}, {pipeline_mode = #tpu.pipeline_mode<synchronous>, transform_indices = @transform_4, window_bounds = array<i64: 1, 128>}, {pipeline_mode = #tpu.pipeline_mode<synchronous>, transform_indices = @transform_5, window_bounds = array<i64: 128, 128>}, {pipeline_mode = #tpu.pipeline_mode<synchronous>, transform_indices = @transform_6, window_bounds = array<i64: 1, 128>}, {pipeline_mode = #tpu.pipeline_mode<synchronous>, transform_indices = @transform_7, window_bounds = array<i64: 128, 256>}, {pipeline_mode = #tpu.pipeline_mode<synchronous>, transform_indices = @transform_8, window_bounds = array<i64: 1, 256>}, {transform_indices = @transform_9, window_bounds = array<i64: 256, 128>}, {transform_indices = @transform_10, window_bounds = array<i64: 256, 256>}, {transform_indices = @transform_11, window_bounds = array<i64: 256, 128>}]} {
    %c0 = arith.constant 0 : index
    %c0_0 = arith.constant 0 : index
    %0 = vector.load %arg1[%c0, %c0_0] : memref<256x256xbf16, #tpu.memory_space<vmem>>, vector<256x256xbf16>
    %c0_1 = arith.constant 0 : index
    %c0_2 = arith.constant 0 : index
    %1 = vector.load %arg2[%c0_1, %c0_2] : memref<256x128xbf16, #tpu.memory_space<vmem>>, vector<256x128xbf16>
    %cst = arith.constant dense<0.000000e+00> : vector<256x128xf32>
    %2 = tpu.matmul %0, %1, %cst {dimension_numbers = #tpu.dot_dimension_numbers<[1], [0], [0], [1], [0, 0, 1, 1], [], []>} : vector<256x256xbf16>, vector<256x128xbf16>, vector<256x128xf32> -> vector<256x128xf32>
    %c0_3 = arith.constant 0 : index
    %c0_4 = arith.constant 0 : index
    %3 = vector.load %arg3[%c0_3, %c0_4] : memref<1x128xf32, #tpu.memory_space<vmem>>, vector<1x128xf32>
    %4 = vector.broadcast %3 : vector<1x128xf32> to vector<256x128xf32>
    %5 = arith.addf %2, %4 : vector<256x128xf32>
    %cst_5 = arith.constant 0.000000e+00 : f32
    %6 = vector.broadcast %cst_5 : f32 to vector<256x128xf32>
    %7 = arith.maximumf %5, %6 : vector<256x128xf32>
    %8 = arith.truncf %7 : vector<256x128xf32> to vector<256x128xbf16>
    %c0_6 = arith.constant 0 : index
    %c0_7 = arith.constant 0 : index
    %9 = vector.load %arg4[%c0_6, %c0_7] : memref<128x128xbf16, #tpu.memory_space<vmem>>, vector<128x128xbf16>
    %cst_8 = arith.constant dense<0.000000e+00> : vector<256x128xf32>
    %10 = tpu.matmul %8, %9, %cst_8 {dimension_numbers = #tpu.dot_dimension_numbers<[1], [0], [0], [1], [0, 0, 1, 1], [], []>} : vector<256x128xbf16>, vector<128x128xbf16>, vector<256x128xf32> -> vector<256x128xf32>
    %c0_9 = arith.constant 0 : index
    %c0_10 = arith.constant 0 : index
    %11 = vector.load %arg5[%c0_9, %c0_10] : memref<1x128xf32, #tpu.memory_space<vmem>>, vector<1x128xf32>
    %12 = vector.broadcast %11 : vector<1x128xf32> to vector<256x128xf32>
    %13 = arith.addf %10, %12 : vector<256x128xf32>
    %c0_11 = arith.constant 0 : index
    %c0_12 = arith.constant 0 : index
    %14 = vector.load %arg10[%c0_11, %c0_12] : memref<256x128xf32, #tpu.memory_space<vmem>>, vector<256x128xf32>
    %15 = arith.addf %13, %14 : vector<256x128xf32>
    %c0_13 = arith.constant 0 : index
    %c0_14 = arith.constant 0 : index
    %16 = vector.load %arg12[%c0_13, %c0_14] : memref<256x128xf32, #tpu.memory_space<vmem>>, vector<256x128xf32>
    tpu.vector_store %arg12[%c0_13, %c0_14], %15 {strides = array<i32>} : memref<256x128xf32, #tpu.memory_space<vmem>>, vector<256x128xf32>,
    %17 = arith.truncf %15 : vector<256x128xf32> to vector<256x128xbf16>
    %c0_15 = arith.constant 0 : index
    %c0_16 = arith.constant 0 : index
    %18 = vector.load %arg6[%c0_15, %c0_16] : memref<128x128xbf16, #tpu.memory_space<vmem>>, vector<128x128xbf16>
    %cst_17 = arith.constant dense<0.000000e+00> : vector<256x128xf32>
    %19 = tpu.matmul %17, %18, %cst_17 {dimension_numbers = #tpu.dot_dimension_numbers<[1], [0], [0], [1], [0, 0, 1, 1], [], []>} : vector<256x128xbf16>, vector<128x128xbf16>, vector<256x128xf32> -> vector<256x128xf32>
    %c0_18 = arith.constant 0 : index
    %c0_19 = arith.constant 0 : index
    %20 = vector.load %arg7[%c0_18, %c0_19] : memref<1x128xf32, #tpu.memory_space<vmem>>, vector<1x128xf32>
    %21 = vector.broadcast %20 : vector<1x128xf32> to vector<256x128xf32>
    %22 = arith.addf %19, %21 : vector<256x128xf32>
    %cst_20 = arith.constant 0.000000e+00 : f32
    %23 = vector.broadcast %cst_20 : f32 to vector<256x128xf32>
    %24 = arith.maximumf %22, %23 : vector<256x128xf32>
    %25 = arith.truncf %24 : vector<256x128xf32> to vector<256x128xbf16>
    %c0_21 = arith.constant 0 : index
    %c0_22 = arith.constant 0 : index
    %26 = vector.load %arg8[%c0_21, %c0_22] : memref<128x256xbf16, #tpu.memory_space<vmem>>, vector<128x256xbf16>
    %cst_23 = arith.constant dense<0.000000e+00> : vector<256x256xf32>
    %27 = tpu.matmul %25, %26, %cst_23 {dimension_numbers = #tpu.dot_dimension_numbers<[1], [0], [0], [1], [0, 0, 1, 1], [], []>} : vector<256x128xbf16>, vector<128x256xbf16>, vector<256x256xf32> -> vector<256x256xf32>
    %c0_24 = arith.constant 0 : index
    %c0_25 = arith.constant 0 : index
    %28 = vector.load %arg9[%c0_24, %c0_25] : memref<1x256xf32, #tpu.memory_space<vmem>>, vector<1x256xf32>
    %29 = vector.broadcast %28 : vector<1x256xf32> to vector<256x256xf32>
    %30 = arith.addf %27, %29 : vector<256x256xf32>
    %31 = arith.negf %30 : vector<256x256xf32>
    %32 = math.exp %31 : vector<256x256xf32>
    %cst_26 = arith.constant 1.000000e+00 : f32
    %33 = vector.broadcast %cst_26 : f32 to vector<256x256xf32>
    %34 = arith.addf %33, %32 : vector<256x256xf32>
    %35 = arith.divf %33, %34 : vector<256x256xf32>
    %c0_27 = arith.constant 0 : index
    %c0_28 = arith.constant 0 : index
    %36 = vector.load %arg11[%c0_27, %c0_28] : memref<256x256xf32, #tpu.memory_space<vmem>>, vector<256x256xf32>
    tpu.vector_store %arg11[%c0_27, %c0_28], %35 {strides = array<i32>} : memref<256x256xf32, #tpu.memory_space<vmem>>, vector<256x256xf32>,
    return
  }
  func.func @transform_0(%arg0: i32) -> (i32, i32) {
    %c0_i32 = arith.constant 0 : i32
    %c0_i32_0 = arith.constant 0 : i32
    return %arg0, %c0_i32 : i32, i32
  }
  func.func @transform_1(%arg0: i32) -> (i32, i32) {
    %c0_i32 = arith.constant 0 : i32
    %c0_i32_0 = arith.constant 0 : i32
    %c0_i32_1 = arith.constant 0 : i32
    return %c0_i32, %c0_i32_0 : i32, i32
  }
  func.func @transform_2(%arg0: i32) -> (i32, i32) {
    %c0_i32 = arith.constant 0 : i32
    %c0_i32_0 = arith.constant 0 : i32
    %c0_i32_1 = arith.constant 0 : i32
    return %c0_i32, %c0_i32_0 : i32, i32
  }
  func.func @transform_3(%arg0: i32) -> (i32, i32) {
    %c0_i32 = arith.constant 0 : i32
    %c0_i32_0 = arith.constant 0 : i32
    %c0_i32_1 = arith.constant 0 : i32
    return %c0_i32, %c0_i32_0 : i32, i32
  }
  func.func @transform_4(%arg0: i32) -> (i32, i32) {
    %c0_i32 = arith.constant 0 : i32
    %c0_i32_0 = arith.constant 0 : i32
    %c0_i32_1 = arith.constant 0 : i32
    return %c0_i32, %c0_i32_0 : i32, i32
  }
  func.func @transform_5(%arg0: i32) -> (i32, i32) {
    %c0_i32 = arith.constant 0 : i32
    %c0_i32_0 = arith.constant 0 : i32
    %c0_i32_1 = arith.constant 0 : i32
    return %c0_i32, %c0_i32_0 : i32, i32
  }
  func.func @transform_6(%arg0: i32) -> (i32, i32) {
    %c0_i32 = arith.constant 0 : i32
    %c0_i32_0 = arith.constant 0 : i32
    %c0_i32_1 = arith.constant 0 : i32
    return %c0_i32, %c0_i32_0 : i32, i32
  }
  func.func @transform_7(%arg0: i32) -> (i32, i32) {
    %c0_i32 = arith.constant 0 : i32
    %c0_i32_0 = arith.constant 0 : i32
    %c0_i32_1 = arith.constant 0 : i32
    return %c0_i32, %c0_i32_0 : i32, i32
  }
  func.func @transform_8(%arg0: i32) -> (i32, i32) {
    %c0_i32 = arith.constant 0 : i32
    %c0_i32_0 = arith.constant 0 : i32
    %c0_i32_1 = arith.constant 0 : i32
    return %c0_i32, %c0_i32_0 : i32, i32
  }
  func.func @transform_9(%arg0: i32) -> (i32, i32) {
    %c0_i32 = arith.constant 0 : i32
    %c0_i32_0 = arith.constant 0 : i32
    return %arg0, %c0_i32 : i32, i32
  }
  func.func @transform_10(%arg0: i32) -> (i32, i32) {
    %c0_i32 = arith.constant 0 : i32
    %c0_i32_0 = arith.constant 0 : i32
    return %arg0, %c0_i32 : i32, i32
  }
  func.func @transform_11(%arg0: i32) -> (i32, i32) {
    %c0_i32 = arith.constant 0 : i32
    %c0_i32_0 = arith.constant 0 : i32
    return %arg0, %c0_i32 : i32, i32
  }
}

</mosaic_0001>

<bundles_post_ra>
// kernel: birvae_forward.1
= control target key start
LH: loop header
LB: loop body
LE: loop exit
PB: predicated region body
PF: predicated region fallthrough
CT: control target
= control target key end

     0   :  { %s5228_s0 = inlined_call_operand.vmem [shape: bf16[256,256], index: 0, kind: input, shape index: {}]   ;;  %s5229_s1 = inlined_call_operand.vmem [shape: bf16[256,128], index: 1, kind: input, shape index: {}]   ;;  %s5230_s2 = inlined_call_operand.vmem [shape: f32[1,128], index: 2, kind: input, shape index: {}]   ;;  %s5231_s3 = inlined_call_operand.vmem [shape: bf16[128,128], index: 3, kind: input, shape index: {}]   ;;  %s5232_s4 = inlined_call_operand.vmem [shape: f32[1,128], index: 4, kind: input, shape index: {}]   ;;  %s5233_s5 = inlined_call_operand.vmem [shape: bf16[128,128], index: 5, kind: input, shape index: {}]   ;;  %s5234_s6 = inlined_call_operand.vmem [shape: f32[1,128], index: 6, kind: input, shape index: {}]   ;;  %s5235_s7 = inlined_call_operand.vmem [shape: bf16[128,256], index: 7, kind: input, shape index: {}]   ;;  %s5236_s8 = inlined_call_operand.vmem [shape: f32[1,256], index: 8, kind: input, shape index: {}]   ;;  %s5237_s9 = inlined_call_operand.vmem [shape: f32[256,128], index: 9, kind: input, shape index: {}]   ;;  %s5238_s10 = inlined_call_operand.hbm [shape: f32[256,256], index: 10, kind: output, shape index: {0}]   ;;  %s5239_s11 = inlined_call_operand.vmem [shape: f32[256,128], index: 11, kind: output, shape index: {1}]  }
   0x1   :  { %v3067_v0 = vld [vmem:[%s5229_s1 + $0x38] sm:$0xff]  ;;  %v3066_v2 = vld [vmem:[%s5229_s1 + $0x30] sm:$0xff]  ;;  %v3065_v4 = vld [vmem:[%s5229_s1 + $0x28] sm:$0xff] }
   0x2   :  { %v3075_v1 = vld [vmem:[%s5229_s1 + $0x78] sm:$0xff]  ;;  %362 = vmatpush.bf16.msra.mxu0 %v3067_v0  ;;  %v3074_v3 = vld [vmem:[%s5229_s1 + $0x70] sm:$0xff]  ;;  %3108 = vmatpush.bf16.msra.mxu2 %v3067_v0  ;;  %v3073_v5 = vld [vmem:[%s5229_s1 + $0x68] sm:$0xff] }
   0x3   :  { %451 = vmatpush.bf16.msra.mxu1 %v3075_v1  ;;  %3116 = vmatpush.bf16.msra.mxu3 %v3075_v1  ;;  %v3064_v6 = vld [vmem:[%s5229_s1 + $0x20] sm:$0xff] }
   0x4   :  { %v3072_v7 = vld [vmem:[%s5229_s1 + $0x60] sm:$0xff] }
   0x6   :  { %363 = vmatpush.bf16.msra.mxu0 %v3066_v2  ;;  %3109 = vmatpush.bf16.msra.mxu2 %v3066_v2 }
   0x7   :  { %452 = vmatpush.bf16.msra.mxu1 %v3074_v3  ;;  %3117 = vmatpush.bf16.msra.mxu3 %v3074_v3 }
   0xa   :  { %364 = vmatpush.bf16.msra.mxu0 %v3065_v4 }
   0xb   :  { %453 = vmatpush.bf16.msra.mxu1 %v3073_v5 }
   0xc   :  { %17 = vsyncpa [#allocation3], 0  ;;  %3110 = vmatpush.bf16.msra.mxu2 %v3065_v4  ;;  %3118 = vmatpush.bf16.msra.mxu3 %v3073_v5  ;;  %v3063_v8 = vld [vmem:[%s5229_s1 + $0x18] sm:$0xff]  ;;  %v3062_v10 = vld [vmem:[%s5229_s1 + $0x10] sm:$0xff]  ;;  %s2628_s26 = sshll.u32 %s5238_s10, 4  ;;  %s3414_s10 = smov 256   ;;  %s2629_s26 = int_to_ptr.hbm [resolvable:$true] %s2628_s26 }
   0xd   :  { %v3071_v9 = vld [vmem:[%s5229_s1 + $0x58] sm:$0xff]  ;;  %v3070_v11 = vld [vmem:[%s5229_s1 + $0x50] sm:$0xff]  ;;  %v3061_v12 = vld [vmem:[%s5229_s1 + $0x8] sm:$0xff]  ;;  %s3415_s27 = smov 16  }
   0xe   :  { %365 = vmatpush.bf16.msra.mxu0 %v3064_v6  ;;  %v3069_v13 = vld [vmem:[%s5229_s1 + $0x48] sm:$0xff]  ;;  %v3060_v14 = vld [vmem:[%s5229_s1] sm:$0xff]  ;;  %v3083_v24 = vld [vmem:[%s5231_s3 + $0x38] sm:$0xff] }
   0xf   :  { %454 = vmatpush.bf16.msra.mxu1 %v3072_v7  ;;  %v3068_v15 = vld [vmem:[%s5229_s1 + $0x40] sm:$0xff]  ;;  %v3029_v17 = vld [vmem:[%s5228_s0 + $0x4] sm:$0xf0]  ;;  %v2648_v19 = vld [vmem:[%s5228_s0 + $0x8] sm:$0xf0] }
  0x10   :  { %3111 = vmatpush.bf16.msra.mxu2 %v3064_v6  ;;  %3119 = vmatpush.bf16.msra.mxu3 %v3072_v7  ;;  %v2646_v16 = vld [vmem:[%s5228_s0] sm:$0xf]  ;;  %v3028_v18 = vld [vmem:[%s5228_s0 + $0x4] sm:$0xf]  ;;  %v3045_v21 = vld [vmem:[%s5228_s0 + $0x84] sm:$0xf0] }
  0x11   :  { %v2710_v20 = vld [vmem:[%s5228_s0 + $0x80] sm:$0xf]  ;;  %v3044_v22 = vld [vmem:[%s5228_s0 + $0x84] sm:$0xf]  ;;  %v2712_v23 = vld [vmem:[%s5228_s0 + $0x88] sm:$0xf0]  ;;  %v2647_v25 = vor.u32 %v3029_v17, %v2646_v16  ;;  %v2651_v26 = vor.u32 %v3028_v18, %v2648_v19 }
  0x12   :  { %366 = vmatpush.bf16.msra.mxu0 %v3063_v8  ;;  %v2711_v27 = vor.u32 %v3045_v21, %v2710_v20  ;;  %v2715_v28 = vor.u32 %v3044_v22, %v2712_v23  ;;  %v3082_v29 = vld [vmem:[%s5231_s3 + $0x30] sm:$0xff]  ;;  %v3081_v30 = vld [vmem:[%s5231_s3 + $0x28] sm:$0xff]  ;;  %v3031_v32 = vld [vmem:[%s5228_s0 + $0x14] sm:$0xf0] }
  0x13   :  { %455 = vmatpush.bf16.msra.mxu1 %v3071_v9  ;;  %v2654_v31 = vld [vmem:[%s5228_s0 + $0x10] sm:$0xf]  ;;  %v3030_v33 = vld [vmem:[%s5228_s0 + $0x14] sm:$0xf]  ;;  %v2656_v34 = vld [vmem:[%s5228_s0 + $0x18] sm:$0xf0] }
  0x14   :  { %3112 = vmatpush.bf16.msra.mxu2 %v3063_v8  ;;  %3120 = vmatpush.bf16.msra.mxu3 %v3071_v9  ;;  %v2718_v35 = vld [vmem:[%s5228_s0 + $0x90] sm:$0xf]  ;;  %v3047_v36 = vld [vmem:[%s5228_s0 + $0x94] sm:$0xf0]  ;;  %v3046_v37 = vld [vmem:[%s5228_s0 + $0x94] sm:$0xf]  ;;  %v2655_v39 = vor.u32 %v3031_v32, %v2654_v31  ;;  %v2659_v40 = vor.u32 %v3030_v33, %v2656_v34 }
  0x15   :  { %v2720_v38 = vld [vmem:[%s5228_s0 + $0x98] sm:$0xf0]  ;;  %v2719_v41 = vor.u32 %v3047_v36, %v2718_v35  ;;  %v3080_v43 = vld [vmem:[%s5231_s3 + $0x20] sm:$0xff]  ;;  %v3033_v45 = vld [vmem:[%s5228_s0 + $0x24] sm:$0xf0] }
  0x16   :  { %367 = vmatpush.bf16.msra.mxu0 %v3062_v10  ;;  %v2723_v42 = vor.u32 %v3046_v37, %v2720_v38  ;;  %v2662_v44 = vld [vmem:[%s5228_s0 + $0x20] sm:$0xf]  ;;  %v3032_v46 = vld [vmem:[%s5228_s0 + $0x24] sm:$0xf]  ;;  %v2664_v47 = vld [vmem:[%s5228_s0 + $0x28] sm:$0xf0] }
  0x17   :  { %456 = vmatpush.bf16.msra.mxu1 %v3070_v11  ;;  %v2726_v48 = vld [vmem:[%s5228_s0 + $0xa0] sm:$0xf]  ;;  %v3049_v49 = vld [vmem:[%s5228_s0 + $0xa4] sm:$0xf0]  ;;  %v3048_v50 = vld [vmem:[%s5228_s0 + $0xa4] sm:$0xf]  ;;  %v2663_v52 = vor.u32 %v3033_v45, %v2662_v44  ;;  %v2667_v53 = vor.u32 %v3032_v46, %v2664_v47 }
  0x18   :  { %3113 = vmatpush.bf16.msra.mxu2 %v3062_v10  ;;  %3121 = vmatpush.bf16.msra.mxu3 %v3070_v11  ;;  %v2728_v51 = vld [vmem:[%s5228_s0 + $0xa8] sm:$0xf0]  ;;  %v2727_v54 = vor.u32 %v3049_v49, %v2726_v48  ;;  %v3079_v56 = vld [vmem:[%s5231_s3 + $0x18] sm:$0xff]  ;;  %v2670_v57 = vld [vmem:[%s5228_s0 + $0x30] sm:$0xf] }
  0x19   :  { %v2731_v55 = vor.u32 %v3048_v50, %v2728_v51  ;;  %v3035_v58 = vld [vmem:[%s5228_s0 + $0x34] sm:$0xf0]  ;;  %v3034_v59 = vld [vmem:[%s5228_s0 + $0x34] sm:$0xf]  ;;  %v2672_v60 = vld [vmem:[%s5228_s0 + $0x38] sm:$0xf0] }
  0x1a   :  { %368 = vmatpush.bf16.msra.mxu0 %v3061_v12  ;;  %v2734_v61 = vld [vmem:[%s5228_s0 + $0xb0] sm:$0xf]  ;;  %v3051_v62 = vld [vmem:[%s5228_s0 + $0xb4] sm:$0xf0]  ;;  %v3050_v63 = vld [vmem:[%s5228_s0 + $0xb4] sm:$0xf]  ;;  %v2671_v1 = vor.u32 %v3035_v58, %v2670_v57  ;;  %v2675_v2 = vor.u32 %v3034_v59, %v2672_v60 }
  0x1b   :  { %457 = vmatpush.bf16.msra.mxu1 %v3069_v13  ;;  %v2736_v0 = vld [vmem:[%s5228_s0 + $0xb8] sm:$0xf0]  ;;  %v2735_v3 = vor.u32 %v3051_v62, %v2734_v61  ;;  %v3078_v5 = vld [vmem:[%s5231_s3 + $0x10] sm:$0xff]  ;;  %v2678_v6 = vld [vmem:[%s5228_s0 + $0x40] sm:$0xf] }
  0x1c   :  { %3114 = vmatpush.bf16.msra.mxu2 %v3061_v12  ;;  %3122 = vmatpush.bf16.msra.mxu3 %v3069_v13  ;;  %v2739_v4 = vor.u32 %v3050_v63, %v2736_v0  ;;  %v3037_v7 = vld [vmem:[%s5228_s0 + $0x44] sm:$0xf0]  ;;  %v3036_v8 = vld [vmem:[%s5228_s0 + $0x44] sm:$0xf]  ;;  %v2680_v9 = vld [vmem:[%s5228_s0 + $0x48] sm:$0xf0] }
  0x1d   :  { %v2742_v10 = vld [vmem:[%s5228_s0 + $0xc0] sm:$0xf]  ;;  %v3053_v11 = vld [vmem:[%s5228_s0 + $0xc4] sm:$0xf0]  ;;  %v3052_v12 = vld [vmem:[%s5228_s0 + $0xc4] sm:$0xf] }
  0x1e   :  { %369 = vmatpush.bf16.msra.mxu0 %v3060_v14  ;;  %v2744_v13 = vld [vmem:[%s5228_s0 + $0xc8] sm:$0xf0]  ;;  %v2743_v16 = vor.u32 %v3053_v11, %v2742_v10  ;;  %v2686_v19 = vld [vmem:[%s5228_s0 + $0x50] sm:$0xf]  ;;  %v3039_v20 = vld [vmem:[%s5228_s0 + $0x54] sm:$0xf0] }
  0x1f   :  { %458 = vmatpush.bf16.msra.mxu1 %v3068_v15  ;;  %v2747_v17 = vor.u32 %v3052_v12, %v2744_v13  ;;  %v3077_v18 = vld [vmem:[%s5231_s3 + $0x8] sm:$0xff]  ;;  %v3038_v21 = vld [vmem:[%s5228_s0 + $0x54] sm:$0xf]  ;;  %v2688_v22 = vld [vmem:[%s5228_s0 + $0x58] sm:$0xf0] }
  0x20   :  { %3115 = vmatpush.bf16.msra.mxu2 %v3060_v14  ;;  %3123 = vmatpush.bf16.msra.mxu3 %v3068_v15  ;;  %v2679_v14 = vor.u32 %v3037_v7, %v2678_v6  ;;  %v2683_v15 = vor.u32 %v3036_v8, %v2680_v9  ;;  %v2750_v23 = vld [vmem:[%s5228_s0 + $0xd0] sm:$0xf]  ;;  %v2694_v31 = vld [vmem:[%s5228_s0 + $0x60] sm:$0xf]  ;;  %v3041_v32 = vld [vmem:[%s5228_s0 + $0x64] sm:$0xf0] }
  0x21   :  { %370 = vmatmul.bf16.vlgmr.msra.gmra.mxu0 %v2647_v25  ;;  %v3054_v25 = vld [vmem:[%s5228_s0 + $0xd4] sm:$0xf]  ;;  %v3040_v33 = vld [vmem:[%s5228_s0 + $0x64] sm:$0xf]  ;;  %v2696_v34 = vld [vmem:[%s5228_s0 + $0x68] sm:$0xf0] }
  0x22   :  { %459 = vmatmul.bf16.vlgmr.msra.gmra.mxu1 %v2651_v26  ;;  %v2752_v26 = vld [vmem:[%s5228_s0 + $0xd8] sm:$0xf0]  ;;  %v2758_v35 = vld [vmem:[%s5228_s0 + $0xe0] sm:$0xf]  ;;  %v3057_v36 = vld [vmem:[%s5228_s0 + $0xe4] sm:$0xf0] }
  0x23   :  { %410 = vmatmul.bf16.vlgmr.msra.gmra.mxu2 %v2711_v27  ;;  %499 = vmatmul.bf16.vlgmr.msra.gmra.mxu3 %v2715_v28  ;;  %v2687_v27 = vor.u32 %v3039_v20, %v2686_v19  ;;  %v2691_v28 = vor.u32 %v3038_v21, %v2688_v22  ;;  %v3056_v37 = vld [vmem:[%s5228_s0 + $0xe4] sm:$0xf]  ;;  %v2760_v38 = vld [vmem:[%s5228_s0 + $0xe8] sm:$0xf0]  ;;  %v2702_v44 = vld [vmem:[%s5228_s0 + $0x70] sm:$0xf] }
  0x24   :  { %656 = vmatpush.bf16.msrb.mxu2 %v3083_v24  ;;  %v3055_v24 = vld [vmem:[%s5228_s0 + $0xd4] sm:$0xf0]  ;;  %v3042_v46 = vld [vmem:[%s5228_s0 + $0x74] sm:$0xf]  ;;  %v2704_v47 = vld [vmem:[%s5228_s0 + $0x78] sm:$0xf0] }
  0x25   :  { %v3043_v45 = vld [vmem:[%s5228_s0 + $0x74] sm:$0xf0]  ;;  %v2766_v48 = vld [vmem:[%s5228_s0 + $0xf0] sm:$0xf]  ;;  %v3058_v50 = vld [vmem:[%s5228_s0 + $0xf4] sm:$0xf] }
  0x26   :  { %v3059_v49 = vld [vmem:[%s5228_s0 + $0xf4] sm:$0xf0]  ;;  %v2768_v51 = vld [vmem:[%s5228_s0 + $0xf8] sm:$0xf0]  ;;  %v3743_v58 = vld [vmem:[%s5230_s2] ss:$0 sm:$0xff] }
  0x27   :  { %v3091_v60 = vld [vmem:[%s5233_s5 + $0x38] sm:$0xff]  ;;  %v3090_v10 = vld [vmem:[%s5233_s5 + $0x30] sm:$0xff] }
  0x28   :  { %657 = vmatpush.bf16.msrb.mxu2 %v3082_v29  ;;  %v2751_v29 = vor.u32 %v3055_v24, %v2750_v23  ;;  %925 = vmatpush.bf16.msrb.mxu3 %v3091_v60  ;;  %v3089_v24 = vld [vmem:[%s5233_s5 + $0x28] sm:$0xff] }
  0x2c   :  { %658 = vmatpush.bf16.msrb.mxu2 %v3081_v30  ;;  %v2755_v30 = vor.u32 %v3054_v25, %v2752_v26  ;;  %926 = vmatpush.bf16.msrb.mxu3 %v3090_v10 }
  0x30   :  { %659 = vmatpush.bf16.msrb.mxu2 %v3080_v43  ;;  %v3076_v43 = vld [vmem:[%s5231_s3] sm:$0xff]  ;;  %927 = vmatpush.bf16.msrb.mxu3 %v3089_v24 }
  0x31   :  { %375 = vmatmul.bf16.gmra.mxu0 %v2655_v39  ;;  %v2695_v39 = vor.u32 %v3041_v32, %v2694_v31 }
  0x32   :  { %464 = vmatmul.bf16.gmra.mxu1 %v2659_v40  ;;  %v2699_v40 = vor.u32 %v3040_v33, %v2696_v34 }
  0x33   :  { %415 = vmatmul.bf16.gmra.mxu2 %v2719_v41  ;;  %504 = vmatmul.bf16.gmra.mxu3 %v2723_v42  ;;  %v2759_v41 = vor.u32 %v3057_v36, %v2758_v35  ;;  %v2763_v42 = vor.u32 %v3056_v37, %v2760_v38  ;;  %v3088_v38 = vld [vmem:[%s5233_s5 + $0x20] sm:$0xff] }
  0x34   :  { %660 = vmatpush.bf16.msrb.mxu2 %v3079_v56  ;;  %928 = vmatpush.bf16.msrb.mxu3 %v3088_v38 }
  0x38   :  { %661 = vmatpush.bf16.msrb.mxu2 %v3078_v5 }
  0x3c   :  { %662 = vmatpush.bf16.msrb.mxu2 %v3077_v18 }
  0x40   :  { %663 = vmatpush.bf16.msrb.mxu2 %v3076_v43 }
  0x41   :  { %380 = vmatmul.bf16.gmra.mxu0 %v2663_v52  ;;  %v2703_v52 = vor.u32 %v3043_v45, %v2702_v44 }
  0x42   :  { %469 = vmatmul.bf16.gmra.mxu1 %v2667_v53  ;;  %v2707_v53 = vor.u32 %v3042_v46, %v2704_v47 }
  0x43   :  { %420 = vmatmul.bf16.gmra.mxu2 %v2727_v54  ;;  %509 = vmatmul.bf16.gmra.mxu3 %v2731_v55  ;;  %v2767_v54 = vor.u32 %v3059_v49, %v2766_v48  ;;  %v2771_v55 = vor.u32 %v3058_v50, %v2768_v51 }
  0x51   :  { %385 = vmatmul.bf16.gmra.mxu0 %v2671_v1 }
  0x52   :  { %474 = vmatmul.bf16.gmra.mxu1 %v2675_v2 }
  0x53   :  { %425 = vmatmul.bf16.gmra.mxu2 %v2735_v3  ;;  %514 = vmatmul.bf16.gmra.mxu3 %v2739_v4 }
  0x61   :  { %390 = vmatmul.bf16.gmra.mxu0 %v2679_v14 }
  0x62   :  { %479 = vmatmul.bf16.gmra.mxu1 %v2683_v15 }
  0x63   :  { %430 = vmatmul.bf16.gmra.mxu2 %v2743_v16  ;;  %519 = vmatmul.bf16.gmra.mxu3 %v2747_v17 }
  0x71   :  { %395 = vmatmul.bf16.gmra.mxu0 %v2687_v27 }
  0x72   :  { %484 = vmatmul.bf16.gmra.mxu1 %v2691_v28 }
  0x73   :  { %435 = vmatmul.bf16.gmra.mxu2 %v2751_v29  ;;  %524 = vmatmul.bf16.gmra.mxu3 %v2755_v30 }
  0x81   :  { %400 = vmatmul.bf16.gmra.mxu0 %v2695_v39 }
  0x82   :  { %489 = vmatmul.bf16.gmra.mxu1 %v2699_v40 }
  0x83   :  { %440 = vmatmul.bf16.gmra.mxu2 %v2759_v41  ;;  %529 = vmatmul.bf16.gmra.mxu3 %v2763_v42 }
  0x91   :  { %405 = vmatmul.bf16.gmra.mxu0 %v2703_v52  ;;  %v3087_v52 = vld [vmem:[%s5233_s5 + $0x18] sm:$0xff] }
  0x92   :  { %494 = vmatmul.bf16.gmra.mxu1 %v2707_v53  ;;  %929 = vmatpush.bf16.msrb.mxu3 %v3087_v52 }
  0x93   :  { %445 = vmatmul.bf16.gmra.mxu2 %v2767_v54  ;;  %534 = vmatmul.bf16.gmra.mxu3 %v2771_v55 }
  0x9e   :  { %v371_v56 = vpop.f32.mrf.mxu0 }
  0x9f   :  { %v460_v57 = vpop.f32.mrf.mxu1  ;;  %v372_v59 = vadd.f32 %v3743_v58, %v371_v56 }
  0xa1   :  { %v461_v0 = vadd.f32 %v460_v57, %v372_v59 }
  0xa3   :  { %v540_v3 = vmax.f32 %v461_v0, 0.0 }
  0xa6   :  { %v3749_v61 = vpop.f32.mrf.mxu2  ;;  %v373_v62 = vpop.f32.mrf.mxu0 }
  0xa7   :  { %v462_v63 = vpop.f32.mrf.mxu1  ;;  %v374_v1 = vadd.f32 %v3743_v58, %v373_v62 }
  0xa9   :  { %v463_v2 = vadd.f32 %v462_v63, %v374_v1 }
  0xab   :  { %v541_v4 = vmax.f32 %v463_v2, 0.0 }
  0xad   :  { %v572_v5 = vpack.c.bf16 %v541_v4, %v540_v3  ;;  %v3086_v4 = vld [vmem:[%s5233_s5 + $0x10] sm:$0xff] }
  0xae   :  { %v3752_v6 = vpop.f32.mrf.mxu2  ;;  %v376_v7 = vpop.f32.mrf.mxu0  ;;  %930 = vmatpush.bf16.msrb.mxu3 %v3086_v4 }
  0xaf   :  { %v465_v8 = vpop.f32.mrf.mxu1  ;;  %664 = vmatmul.bf16.vlgmr.msrb.gmra.mxu2 %v572_v5  ;;  %v377_v9 = vadd.f32 %v3743_v58, %v376_v7 }
  0xb1   :  { %v466_v14 = vadd.f32 %v465_v8, %v377_v9 }
  0xb3   :  { %v542_v17 = vmax.f32 %v466_v14, 0.0 }
  0xb6   :  { %v3758_v11 = vpop.f32.mrf.mxu2  ;;  %v378_v12 = vpop.f32.mrf.mxu0 }
  0xb7   :  { %v467_v13 = vpop.f32.mrf.mxu1  ;;  %v379_v15 = vadd.f32 %v3743_v58, %v378_v12 }
  0xb9   :  { %v468_v16 = vadd.f32 %v467_v13, %v379_v15  ;;  %v500_v13 = vpop.f32.mrf.mxu3 }
  0xbb   :  { %v543_v18 = vmax.f32 %v468_v16, 0.0 }
  0xbd   :  { %v573_v19 = vpack.c.bf16 %v543_v18, %v542_v17 }
  0xbe   :  { %v3761_v20 = vpop.f32.mrf.mxu2  ;;  %v381_v21 = vpop.f32.mrf.mxu0 }
  0xbf   :  { %v470_v22 = vpop.f32.mrf.mxu1  ;;  %669 = vmatmul.bf16.gmra.mxu2 %v573_v19  ;;  %v382_v23 = vadd.f32 %v3743_v58, %v381_v21  ;;  %v3085_v19 = vld [vmem:[%s5233_s5 + $0x8] sm:$0xff] }
  0xc0   :  { %931 = vmatpush.bf16.msrb.mxu3 %v3085_v19 }
  0xc1   :  { %v471_v28 = vadd.f32 %v470_v22, %v382_v23  ;;  %v502_v23 = vpop.f32.mrf.mxu3 }
  0xc3   :  { %v544_v31 = vmax.f32 %v471_v28, 0.0 }
  0xc6   :  { %v3767_v25 = vpop.f32.mrf.mxu2  ;;  %v383_v26 = vpop.f32.mrf.mxu0 }
  0xc7   :  { %v472_v27 = vpop.f32.mrf.mxu1  ;;  %v384_v29 = vadd.f32 %v3743_v58, %v383_v26 }
  0xc9   :  { %v473_v30 = vadd.f32 %v472_v27, %v384_v29  ;;  %v505_v38 = vpop.f32.mrf.mxu3 }
  0xcb   :  { %v545_v32 = vmax.f32 %v473_v30, 0.0 }
  0xcd   :  { %v574_v33 = vpack.c.bf16 %v545_v32, %v544_v31 }
  0xce   :  { %v3770_v34 = vpop.f32.mrf.mxu2  ;;  %v386_v35 = vpop.f32.mrf.mxu0 }
  0xcf   :  { %v475_v36 = vpop.f32.mrf.mxu1  ;;  %674 = vmatmul.bf16.gmra.mxu2 %v574_v33  ;;  %v387_v37 = vadd.f32 %v3743_v58, %v386_v35 }
  0xd1   :  { %v476_v42 = vadd.f32 %v475_v36, %v387_v37  ;;  %v3084_v37 = vld [vmem:[%s5233_s5] sm:$0xff] }
  0xd2   :  { %932 = vmatpush.bf16.msrb.mxu3 %v3084_v37 }
  0xd3   :  { %v546_v45 = vmax.f32 %v476_v42, 0.0 }
  0xd6   :  { %v3776_v39 = vpop.f32.mrf.mxu2  ;;  %v388_v40 = vpop.f32.mrf.mxu0 }
  0xd7   :  { %v477_v41 = vpop.f32.mrf.mxu1  ;;  %v389_v43 = vadd.f32 %v3743_v58, %v388_v40 }
  0xd9   :  { %v478_v44 = vadd.f32 %v477_v41, %v389_v43 }
  0xdb   :  { %v547_v46 = vmax.f32 %v478_v44, 0.0 }
  0xdd   :  { %v575_v47 = vpack.c.bf16 %v547_v46, %v546_v45 }
  0xde   :  { %v3779_v48 = vpop.f32.mrf.mxu2  ;;  %v391_v49 = vpop.f32.mrf.mxu0 }
  0xdf   :  { %v480_v50 = vpop.f32.mrf.mxu1  ;;  %679 = vmatmul.bf16.gmra.mxu2 %v575_v47  ;;  %v392_v51 = vadd.f32 %v3743_v58, %v391_v49  ;;  %v507_v47 = vpop.f32.mrf.mxu3 }
  0xe1   :  { %v481_v56 = vadd.f32 %v480_v50, %v392_v51 }
  0xe3   :  { %v548_v60 = vmax.f32 %v481_v56, 0.0 }
  0xe6   :  { %v3785_v53 = vpop.f32.mrf.mxu2  ;;  %v393_v54 = vpop.f32.mrf.mxu0 }
  0xe7   :  { %v482_v55 = vpop.f32.mrf.mxu1  ;;  %v394_v57 = vadd.f32 %v3743_v58, %v393_v54  ;;  %v412_v54 = vadd.f32 %v3743_v58, %v3749_v61  ;;  %v510_v56 = vpop.f32.mrf.mxu3  ;;  %v417_v61 = vadd.f32 %v3743_v58, %v3758_v11  ;;  %v2958_v11 = vld [vmem:[%s5235_s7 + $0x70] sm:$0xf] }
  0xe9   :  { %v483_v59 = vadd.f32 %v482_v55, %v394_v57  ;;  %v414_v55 = vadd.f32 %v3743_v58, %v3752_v6  ;;  %v501_v57 = vadd.f32 %v500_v13, %v412_v54  ;;  %v419_v6 = vadd.f32 %v3743_v58, %v3761_v20  ;;  %v3107_v20 = vld [vmem:[%s5235_s7 + $0x74] sm:$0xf0]  ;;  %v3106_v13 = vld [vmem:[%s5235_s7 + $0x74] sm:$0xf] }
  0xeb   :  { %v549_v62 = vmax.f32 %v483_v59, 0.0  ;;  %v503_v59 = vadd.f32 %v502_v23, %v414_v55  ;;  %v746_v23 = vld [vmem:[%s5237_s9 + $0x8] sm:$0xff] }
  0xed   :  { %v576_v63 = vpack.c.bf16 %v549_v62, %v548_v60  ;;  %v556_v60 = vmax.f32 %v501_v57, 0.0  ;;  %v557_v62 = vmax.f32 %v503_v59, 0.0  ;;  %v427_v59 = vadd.f32 %v3743_v58, %v3776_v39  ;;  %v2942_v39 = vld [vmem:[%s5235_s7 + $0x50] sm:$0xf] }
  0xee   :  { %v3788_v0 = vpop.f32.mrf.mxu2  ;;  %v396_v1 = vpop.f32.mrf.mxu0 }
  0xef   :  { %v485_v2 = vpop.f32.mrf.mxu1  ;;  %684 = vmatmul.bf16.gmra.mxu2 %v576_v63  ;;  %v397_v3 = vadd.f32 %v3743_v58, %v396_v1  ;;  %v580_v1 = vpack.c.bf16 %v557_v62, %v556_v60  ;;  %v429_v60 = vadd.f32 %v3743_v58, %v3779_v48  ;;  %v3103_v48 = vld [vmem:[%s5235_s7 + $0x54] sm:$0xf0] }
  0xf1   :  { %v486_v8 = vadd.f32 %v485_v2, %v397_v3  ;;  %v512_v2 = vpop.f32.mrf.mxu3  ;;  %v3824_v3 = vld [vmem:[%s5232_s4] ss:$0 sm:$0xff] }
  0xf3   :  { %v550_v14 = vmax.f32 %v486_v8, 0.0  ;;  %v506_v8 = vadd.f32 %v505_v38, %v417_v61 }
  0xf6   :  { %v398_v5 = vpop.f32.mrf.mxu0  ;;  %v3795_v10 = vpop.f32.mrf.mxu2 }
  0xf7   :  { %v487_v7 = vpop.f32.mrf.mxu1  ;;  %v399_v9 = vadd.f32 %v3743_v58, %v398_v5  ;;  %v745_v5 = vld [vmem:[%s5237_s9] sm:$0xff] }
  0xf9   :  { %v488_v12 = vadd.f32 %v487_v7, %v399_v9  ;;  %v508_v9 = vadd.f32 %v507_v47, %v419_v6 }
  0xfb   :  { %v551_v15 = vmax.f32 %v488_v12, 0.0 }
  0xfd   :  { %v577_v16 = vpack.c.bf16 %v551_v15, %v550_v14  ;;  %v515_v14 = vpop.f32.mrf.mxu3  ;;  %v2959_v15 = vor.u32 %v3107_v20, %v2958_v11 }
  0xfe   :  { %v401_v17 = vpop.f32.mrf.mxu0  ;;  %v3800_v21 = vpop.f32.mrf.mxu2  ;;  %v516_v61 = vadd.f32 %v515_v14, %v427_v59  ;;  %v750_v14 = vld [vmem:[%s5237_s9 + $0x28] sm:$0xff] }
  0xff   :  { %v490_v18 = vpop.f32.mrf.mxu1  ;;  %689 = vmatmul.bf16.gmra.mxu2 %v577_v16  ;;  %v402_v22 = vadd.f32 %v3743_v58, %v401_v17  ;;  %v2960_v16 = vld [vmem:[%s5235_s7 + $0x78] sm:$0xf0]  ;;  %v558_v17 = vmax.f32 %v506_v8, 0.0  ;;  %1164 = vmatpush.bf16.msrb.mxu0 %v2959_v15  ;;  %v3102_v8 = vld [vmem:[%s5235_s7 + $0x54] sm:$0xf] }
 0x100   :  { %v2963_v19 = vor.u32 %v3106_v13, %v2960_v16 }
 0x101   :  { %v491_v27 = vadd.f32 %v490_v18, %v402_v22  ;;  %v559_v18 = vmax.f32 %v508_v9, 0.0  ;;  %v2944_v9 = vld [vmem:[%s5235_s7 + $0x58] sm:$0xf0] }
 0x102   :  { %1253 = vmatpush.bf16.msrb.mxu1 %v2963_v19  ;;  %v2947_v20 = vor.u32 %v3102_v8, %v2944_v9 }
 0x103   :  { %v552_v30 = vmax.f32 %v491_v27, 0.0  ;;  %v581_v27 = vpack.c.bf16 %v559_v18, %v558_v17 }
 0x106   :  { %v403_v24 = vpop.f32.mrf.mxu0  ;;  %v3804_v32 = vpop.f32.mrf.mxu2 }
 0x107   :  { %v492_v26 = vpop.f32.mrf.mxu1  ;;  %v404_v28 = vadd.f32 %v3743_v58, %v403_v24  ;;  %v442_v9 = vadd.f32 %v3743_v58, %v3804_v32  ;;  %v2918_v32 = vld [vmem:[%s5235_s7 + $0x20] sm:$0xf] }
 0x109   :  { %v493_v29 = vadd.f32 %v492_v26, %v404_v28 }
 0x10b   :  { %v553_v31 = vmax.f32 %v493_v29, 0.0  ;;  %v422_v29 = vadd.f32 %v3743_v58, %v3767_v25  ;;  %v2950_v25 = vld [vmem:[%s5235_s7 + $0x60] sm:$0xf] }
 0x10d   :  { %v578_v33 = vpack.c.bf16 %v553_v31, %v552_v30  ;;  %v424_v30 = vadd.f32 %v3743_v58, %v3770_v34  ;;  %v517_v31 = vpop.f32.mrf.mxu3  ;;  %v511_v37 = vadd.f32 %v510_v56, %v422_v29  ;;  %v3105_v34 = vld [vmem:[%s5235_s7 + $0x64] sm:$0xf0] }
 0x10e   :  { %v406_v35 = vpop.f32.mrf.mxu0  ;;  %v3810_v41 = vpop.f32.mrf.mxu2  ;;  %v518_v6 = vadd.f32 %v517_v31, %v429_v60  ;;  %v3098_v60 = vld [vmem:[%s5235_s7 + $0x34] sm:$0xf] }
 0x10f   :  { %v495_v36 = vpop.f32.mrf.mxu1  ;;  %694 = vmatmul.bf16.gmra.mxu2 %v578_v33  ;;  %v407_v40 = vadd.f32 %v3743_v58, %v406_v35  ;;  %v747_v35 = vld [vmem:[%s5237_s9 + $0x10] sm:$0xff]  ;;  %v513_v38 = vadd.f32 %v512_v2, %v424_v30 }
 0x110   :  { %v563_v11 = vmax.f32 %v518_v6, 0.0 }
 0x111   :  { %v496_v43 = vadd.f32 %v495_v36, %v407_v40 }
 0x113   :  { %v554_v49 = vmax.f32 %v496_v43, 0.0  ;;  %v3104_v43 = vld [vmem:[%s5235_s7 + $0x64] sm:$0xf] }
 0x115   :  { %v520_v54 = vpop.f32.mrf.mxu3 }
 0x116   :  { %v408_v42 = vpop.f32.mrf.mxu0  ;;  %v3813_v52 = vpop.f32.mrf.mxu2 }
 0x117   :  { %v409_v44 = vadd.f32 %v3743_v58, %v408_v42  ;;  %v497_v45 = vpop.f32.mrf.mxu1  ;;  %v2951_v42 = vor.u32 %v3105_v34, %v2950_v25  ;;  %v752_v34 = vld [vmem:[%s5237_s9 + $0x38] sm:$0xff] }
 0x119   :  { %v498_v46 = vadd.f32 %v497_v45, %v409_v44  ;;  %v2952_v44 = vld [vmem:[%s5235_s7 + $0x68] sm:$0xf0]  ;;  %v560_v45 = vmax.f32 %v511_v37, 0.0  ;;  %1165 = vmatpush.bf16.msrb.mxu0 %v2951_v42 }
 0x11a   :  { %v2955_v47 = vor.u32 %v3104_v43, %v2952_v44 }
 0x11b   :  { %v555_v50 = vmax.f32 %v498_v46, 0.0  ;;  %v561_v46 = vmax.f32 %v513_v38, 0.0 }
 0x11c   :  { %1254 = vmatpush.bf16.msrb.mxu1 %v2955_v47  ;;  %v439_v47 = vadd.f32 %v3743_v58, %v3800_v21  ;;  %v3099_v21 = vld [vmem:[%s5235_s7 + $0x34] sm:$0xf0] }
 0x11d   :  { %v579_v51 = vpack.c.bf16 %v555_v50, %v554_v49  ;;  %v748_v50 = vld [vmem:[%s5237_s9 + $0x18] sm:$0xff]  ;;  %v582_v55 = vpack.c.bf16 %v561_v46, %v560_v45  ;;  %v437_v46 = vadd.f32 %v3743_v58, %v3795_v10  ;;  %v2926_v10 = vld [vmem:[%s5235_s7 + $0x30] sm:$0xf] }
 0x11e   :  { %v3819_v63 = vpop.f32.mrf.mxu2  ;;  %v2927_v59 = vor.u32 %v3099_v21, %v2926_v10 }
 0x11f   :  { %699 = vmatmul.bf16.gmra.mxu2 %v579_v51 }
 0x120   :  { %1255 = vmatpush.bf16.msrb.mxu1 %v2947_v20  ;;  %v755_v20 = vld [vmem:[%s5237_s9 + $0x50] sm:$0xff] }
 0x12f   :  { %704 = vmatmul.bf16.gmra.mxu2 %v580_v1  ;;  %v749_v1 = vld [vmem:[%s5237_s9 + $0x20] sm:$0xff] }
 0x132   :  { %v665_v4 = vpop.f32.mrf.mxu2 }
 0x133   :  { %v666_v7 = vadd.f32 %v3824_v3, %v665_v4 }
 0x135   :  { %v777_v12 = vadd.f32 %v745_v5, %v666_v7  ;;  %v522_v5 = vpop.f32.mrf.mxu3  ;;  %v2943_v7 = vor.u32 %v3103_v48, %v2942_v39 }
 0x137   :  { %809 = vst [vmem:[%s5239_s11] sm:$0xff] %v777_v12  ;;  %1166 = vmatpush.bf16.msrb.mxu0 %v2943_v7 }
 0x13a   :  { %v667_v22 = vpop.f32.mrf.mxu2 }
 0x13b   :  { %v668_v24 = vadd.f32 %v3824_v3, %v667_v22  ;;  %v432_v22 = vadd.f32 %v3743_v58, %v3785_v53  ;;  %v2934_v53 = vld [vmem:[%s5235_s7 + $0x40] sm:$0xf] }
 0x13d   :  { %v778_v26 = vadd.f32 %v746_v23, %v668_v24  ;;  %v525_v19 = vpop.f32.mrf.mxu3  ;;  %v434_v23 = vadd.f32 %v3743_v58, %v3788_v0  ;;  %v3101_v0 = vld [vmem:[%s5235_s7 + $0x44] sm:$0xf0] }
 0x13e   :  { %v2935_v31 = vor.u32 %v3101_v0, %v2934_v53 }
 0x13f   :  { %810 = vst [vmem:[%s5239_s11 + $0x8] sm:$0xff] %v778_v26  ;;  %709 = vmatmul.bf16.gmra.mxu2 %v581_v27  ;;  %v841_v28 = vpack.c.bf16 %v778_v26, %v777_v12  ;;  %v562_v12 = vmax.f32 %v516_v61, 0.0  ;;  %v751_v26 = vld [vmem:[%s5237_s9 + $0x30] sm:$0xff]  ;;  %v523_v29 = vadd.f32 %v522_v5, %v434_v23 }
 0x140   :  { %1167 = vmatpush.bf16.msrb.mxu0 %v2935_v31  ;;  %v447_v31 = vadd.f32 %v3743_v58, %v3813_v52  ;;  %v3095_v52 = vld [vmem:[%s5235_s7 + $0x14] sm:$0xf0] }
 0x141   :  { %933 = vmatmul.bf16.vlgmr.msrb.gmra.mxu3 %v841_v28  ;;  %v583_v16 = vpack.c.bf16 %v563_v11, %v562_v12  ;;  %v521_v28 = vadd.f32 %v520_v54, %v432_v22  ;;  %v565_v37 = vmax.f32 %v523_v29, 0.0  ;;  %v444_v12 = vadd.f32 %v3743_v58, %v3810_v41  ;;  %v3097_v41 = vld [vmem:[%s5235_s7 + $0x24] sm:$0xf0]  ;;  %v2920_v22 = vld [vmem:[%s5235_s7 + $0x28] sm:$0xf0] }
 0x142   :  { %v670_v33 = vpop.f32.mrf.mxu2 }
 0x143   :  { %v671_v36 = vadd.f32 %v3824_v3, %v670_v33  ;;  %v3100_v33 = vld [vmem:[%s5235_s7 + $0x44] sm:$0xf] }
 0x144   :  { %1168 = vmatpush.bf16.msrb.mxu0 %v2927_v59  ;;  %v2902_v59 = vld [vmem:[%s5235_s7] sm:$0xf] }
 0x145   :  { %v779_v40 = vadd.f32 %v747_v35, %v671_v36  ;;  %v2936_v35 = vld [vmem:[%s5235_s7 + $0x48] sm:$0xf0]  ;;  %v564_v36 = vmax.f32 %v521_v28, 0.0  ;;  %v756_v28 = vld [vmem:[%s5237_s9 + $0x58] sm:$0xff] }
 0x146   :  { %v2939_v38 = vor.u32 %v3100_v33, %v2936_v35  ;;  %v449_v33 = vadd.f32 %v3743_v58, %v3819_v63  ;;  %v2910_v58 = vld [vmem:[%s5235_s7 + $0x10] sm:$0xf] }
 0x147   :  { %811 = vst [vmem:[%s5239_s11 + $0x10] sm:$0xff] %v779_v40  ;;  %v584_v43 = vpack.c.bf16 %v565_v37, %v564_v36  ;;  %v757_v37 = vld [vmem:[%s5237_s9 + $0x60] sm:$0xff]  ;;  %v2911_v63 = vor.u32 %v3095_v52, %v2910_v58 }
 0x148   :  { %1256 = vmatpush.bf16.msrb.mxu1 %v2939_v38 }
 0x14a   :  { %v672_v49 = vpop.f32.mrf.mxu2 }
 0x14b   :  { %v673_v51 = vadd.f32 %v3824_v3, %v672_v49 }
 0x14d   :  { %v780_v56 = vadd.f32 %v748_v50, %v673_v51  ;;  %v753_v50 = vld [vmem:[%s5237_s9 + $0x40] sm:$0xff] }
 0x14f   :  { %714 = vmatmul.bf16.gmra.mxu2 %v582_v55  ;;  %812 = vst [vmem:[%s5239_s11 + $0x18] sm:$0xff] %v780_v56  ;;  %v842_v57 = vpack.c.bf16 %v780_v56, %v779_v40  ;;  %v527_v40 = vpop.f32.mrf.mxu3  ;;  %v526_v55 = vadd.f32 %v525_v19, %v437_v46  ;;  %v3096_v19 = vld [vmem:[%s5235_s7 + $0x24] sm:$0xf] }
 0x150   :  { %v528_v56 = vadd.f32 %v527_v40, %v439_v47 }
 0x151   :  { %938 = vmatmul.bf16.gmra.mxu3 %v842_v57 }
 0x152   :  { %v675_v62 = vpop.f32.mrf.mxu2 }
 0x153   :  { %v676_v2 = vadd.f32 %v3824_v3, %v675_v62  ;;  %v2928_v62 = vld [vmem:[%s5235_s7 + $0x38] sm:$0xf0] }
 0x154   :  { %v2931_v61 = vor.u32 %v3098_v60, %v2928_v62  ;;  %v3093_v60 = vld [vmem:[%s5235_s7 + $0x4] sm:$0xf0] }
 0x155   :  { %v781_v4 = vadd.f32 %v749_v1, %v676_v2  ;;  %v566_v1 = vmax.f32 %v526_v55, 0.0  ;;  %v567_v2 = vmax.f32 %v528_v56, 0.0  ;;  %v2903_v62 = vor.u32 %v3093_v60, %v2902_v59 }
 0x156   :  { %1257 = vmatpush.bf16.msrb.mxu1 %v2931_v61 }
 0x157   :  { %813 = vst [vmem:[%s5239_s11 + $0x20] sm:$0xff] %v781_v4  ;;  %v530_v54 = vpop.f32.mrf.mxu3  ;;  %v585_v48 = vpack.c.bf16 %v567_v2, %v566_v1  ;;  %v3092_v1 = vld [vmem:[%s5235_s7 + $0x4] sm:$0xf]  ;;  %v2904_v2 = vld [vmem:[%s5235_s7 + $0x8] sm:$0xf0] }
 0x158   :  { %v2907_v61 = vor.u32 %v3092_v1, %v2904_v2 }
 0x15a   :  { %v677_v13 = vpop.f32.mrf.mxu2 }
 0x15b   :  { %v678_v15 = vadd.f32 %v3824_v3, %v677_v13 }
 0x15d   :  { %v782_v17 = vadd.f32 %v750_v14, %v678_v15  ;;  %v531_v14 = vadd.f32 %v530_v54, %v442_v9 }
 0x15f   :  { %719 = vmatmul.bf16.gmra.mxu2 %v583_v16  ;;  %814 = vst [vmem:[%s5239_s11 + $0x28] sm:$0xff] %v782_v17  ;;  %v843_v18 = vpack.c.bf16 %v782_v17, %v781_v4  ;;  %v754_v4 = vld [vmem:[%s5237_s9 + $0x48] sm:$0xff]  ;;  %v532_v7 = vpop.f32.mrf.mxu3  ;;  %v568_v23 = vmax.f32 %v531_v14, 0.0 }
 0x160   :  { %v533_v15 = vadd.f32 %v532_v7, %v444_v12 }
 0x161   :  { %943 = vmatmul.bf16.gmra.mxu3 %v843_v18  ;;  %v2919_v18 = vor.u32 %v3097_v41, %v2918_v32  ;;  %v763_v32 = vld [vmem:[%s5237_s9 + $0x90] sm:$0xff] }
 0x162   :  { %v680_v24 = vpop.f32.mrf.mxu2 }
 0x163   :  { %v681_v27 = vadd.f32 %v3824_v3, %v680_v24  ;;  %v569_v24 = vmax.f32 %v533_v15, 0.0  ;;  %1169 = vmatpush.bf16.msrb.mxu0 %v2919_v18 }
 0x165   :  { %v783_v30 = vadd.f32 %v751_v26, %v681_v27  ;;  %v2923_v26 = vor.u32 %v3096_v19, %v2920_v22  ;;  %v586_v53 = vpack.c.bf16 %v569_v24, %v568_v23  ;;  %v4086_v19 = vld [vmem:[%s5234_s6] ss:$0 sm:$0xff]  ;;  %v764_v23 = vld [vmem:[%s5237_s9 + $0x98] sm:$0xff] }
 0x167   :  { %815 = vst [vmem:[%s5239_s11 + $0x30] sm:$0xff] %v783_v30  ;;  %v535_v17 = vpop.f32.mrf.mxu3  ;;  %1258 = vmatpush.bf16.msrb.mxu1 %v2923_v26  ;;  %1170 = vmatpush.bf16.msrb.mxu0 %v2911_v63 }
 0x168   :  { %v536_v40 = vadd.f32 %v535_v17, %v447_v31 }
 0x16a   :  { %v682_v25 = vpop.f32.mrf.mxu2 }
 0x16b   :  { %v683_v42 = vadd.f32 %v3824_v3, %v682_v25  ;;  %1171 = vmatpush.bf16.msrb.mxu0 %v2903_v62 }
 0x16d   :  { %v784_v44 = vadd.f32 %v752_v34, %v683_v42  ;;  %v3094_v42 = vld [vmem:[%s5235_s7 + $0x14] sm:$0xf] }
 0x16f   :  { %724 = vmatmul.bf16.gmra.mxu2 %v584_v43  ;;  %816 = vst [vmem:[%s5239_s11 + $0x38] sm:$0xff] %v784_v44  ;;  %v844_v45 = vpack.c.bf16 %v784_v44, %v783_v30  ;;  %v537_v35 = vpop.f32.mrf.mxu3  ;;  %v2912_v43 = vld [vmem:[%s5235_s7 + $0x18] sm:$0xf0]  ;;  %v570_v44 = vmax.f32 %v536_v40, 0.0 }
 0x170   :  { %v538_v25 = vadd.f32 %v537_v35, %v449_v33  ;;  %v2915_v46 = vor.u32 %v3094_v42, %v2912_v43  ;;  %v765_v35 = vld [vmem:[%s5237_s9 + $0xa0] sm:$0xff] }
 0x171   :  { %948 = vmatmul.bf16.gmra.mxu3 %v844_v45 }
 0x172   :  { %v685_v49 = vpop.f32.mrf.mxu2  ;;  %v571_v45 = vmax.f32 %v538_v25, 0.0  ;;  %1259 = vmatpush.bf16.msrb.mxu1 %v2915_v46  ;;  %v766_v25 = vld [vmem:[%s5237_s9 + $0xa8] sm:$0xff] }
 0x173   :  { %v686_v51 = vadd.f32 %v3824_v3, %v685_v49  ;;  %v758_v49 = vld [vmem:[%s5237_s9 + $0x68] sm:$0xff] }
 0x174   :  { %v587_v54 = vpack.c.bf16 %v571_v45, %v570_v44 }
 0x175   :  { %v785_v57 = vadd.f32 %v753_v50, %v686_v51 }
 0x176   :  { %1260 = vmatpush.bf16.msrb.mxu1 %v2907_v61 }
 0x177   :  { %817 = vst [vmem:[%s5239_s11 + $0x40] sm:$0xff] %v785_v57 }
 0x17a   :  { %v687_v6 = vpop.f32.mrf.mxu2 }
 0x17b   :  { %v688_v5 = vadd.f32 %v3824_v3, %v687_v6 }
 0x17d   :  { %v786_v39 = vadd.f32 %v754_v4, %v688_v5  ;;  %v760_v4 = vld [vmem:[%s5237_s9 + $0x78] sm:$0xff] }
 0x17f   :  { %818 = vst [vmem:[%s5239_s11 + $0x48] sm:$0xff] %v786_v39  ;;  %729 = vmatmul.bf16.gmra.mxu2 %v585_v48  ;;  %v845_v8 = vpack.c.bf16 %v786_v39, %v785_v57  ;;  %v759_v57 = vld [vmem:[%s5237_s9 + $0x70] sm:$0xff] }
 0x181   :  { %953 = vmatmul.bf16.gmra.mxu3 %v845_v8  ;;  %v761_v8 = vld [vmem:[%s5237_s9 + $0x80] sm:$0xff] }
 0x182   :  { %v690_v11 = vpop.f32.mrf.mxu2 }
 0x183   :  { %v691_v13 = vadd.f32 %v3824_v3, %v690_v11 }
 0x185   :  { %v787_v16 = vadd.f32 %v755_v20, %v691_v13  ;;  %v762_v20 = vld [vmem:[%s5237_s9 + $0x88] sm:$0xff] }
 0x187   :  { %819 = vst [vmem:[%s5239_s11 + $0x50] sm:$0xff] %v787_v16 }
 0x18a   :  { %v692_v27 = vpop.f32.mrf.mxu2 }
 0x18b   :  { %v693_v29 = vadd.f32 %v3824_v3, %v692_v27 }
 0x18d   :  { %v788_v30 = vadd.f32 %v756_v28, %v693_v29 }
 0x18f   :  { %820 = vst [vmem:[%s5239_s11 + $0x58] sm:$0xff] %v788_v30  ;;  %734 = vmatmul.bf16.gmra.mxu2 %v586_v53  ;;  %v846_v0 = vpack.c.bf16 %v788_v30, %v787_v16 }
 0x191   :  { %958 = vmatmul.bf16.gmra.mxu3 %v846_v0 }
 0x192   :  { %v695_v36 = vpop.f32.mrf.mxu2 }
 0x193   :  { %v696_v38 = vadd.f32 %v3824_v3, %v695_v36 }
 0x195   :  { %v789_v34 = vadd.f32 %v757_v37, %v696_v38 }
 0x197   :  { %821 = vst [vmem:[%s5239_s11 + $0x60] sm:$0xff] %v789_v34 }
 0x19a   :  { %v697_v47 = vpop.f32.mrf.mxu2 }
 0x19b   :  { %v698_v50 = vadd.f32 %v3824_v3, %v697_v47 }
 0x19d   :  { %v790_v51 = vadd.f32 %v758_v49, %v698_v50  ;;  %v767_v49 = vld [vmem:[%s5237_s9 + $0xb0] sm:$0xff] }
 0x19f   :  { %822 = vst [vmem:[%s5239_s11 + $0x68] sm:$0xff] %v790_v51  ;;  %739 = vmatmul.bf16.gmra.mxu2 %v587_v54  ;;  %v847_v55 = vpack.c.bf16 %v790_v51, %v789_v34 }
 0x1a1   :  { %963 = vmatmul.bf16.gmra.mxu3 %v847_v55 }
 0x1a2   :  { %v700_v56 = vpop.f32.mrf.mxu2 }
 0x1a3   :  { %v701_v10 = vadd.f32 %v3824_v3, %v700_v56  ;;  %v768_v56 = vld [vmem:[%s5237_s9 + $0xb8] sm:$0xff] }
 0x1a5   :  { %v791_v21 = vadd.f32 %v759_v57, %v701_v10 }
 0x1a7   :  { %823 = vst [vmem:[%s5239_s11 + $0x70] sm:$0xff] %v791_v21 }
 0x1aa   :  { %v702_v6 = vpop.f32.mrf.mxu2 }
 0x1ab   :  { %v703_v5 = vadd.f32 %v3824_v3, %v702_v6 }
 0x1ad   :  { %v792_v39 = vadd.f32 %v760_v4, %v703_v5  ;;  %v769_v4 = vld [vmem:[%s5237_s9 + $0xc0] sm:$0xff] }
 0x1af   :  { %824 = vst [vmem:[%s5239_s11 + $0x78] sm:$0xff] %v792_v39  ;;  %v848_v48 = vpack.c.bf16 %v792_v39, %v791_v21 }
 0x1b1   :  { %968 = vmatmul.bf16.gmra.mxu3 %v848_v48 }
 0x1b2   :  { %v705_v7 = vpop.f32.mrf.mxu2 }
 0x1b3   :  { %v706_v9 = vadd.f32 %v3824_v3, %v705_v7 }
 0x1b5   :  { %v793_v12 = vadd.f32 %v761_v8, %v706_v9  ;;  %v770_v8 = vld [vmem:[%s5237_s9 + $0xc8] sm:$0xff] }
 0x1b7   :  { %825 = vst [vmem:[%s5239_s11 + $0x80] sm:$0xff] %v793_v12 }
 0x1ba   :  { %v707_v11 = vpop.f32.mrf.mxu2 }
 0x1bb   :  { %v708_v13 = vadd.f32 %v3824_v3, %v707_v11 }
 0x1bd   :  { %v794_v14 = vadd.f32 %v762_v20, %v708_v13 }
 0x1bf   :  { %826 = vst [vmem:[%s5239_s11 + $0x88] sm:$0xff] %v794_v14  ;;  %v849_v15 = vpack.c.bf16 %v794_v14, %v793_v12 }
 0x1c1   :  { %973 = vmatmul.bf16.gmra.mxu3 %v849_v15 }
 0x1c2   :  { %v710_v16 = vpop.f32.mrf.mxu2 }
 0x1c3   :  { %v711_v41 = vadd.f32 %v3824_v3, %v710_v16 }
 0x1c4   :  { %v934_v17 = vpop.f32.mrf.mxu3 }
 0x1c5   :  { %v795_v18 = vadd.f32 %v763_v32, %v711_v41  ;;  %v935_v24 = vadd.f32 %v4086_v19, %v934_v17  ;;  %v771_v17 = vld [vmem:[%s5237_s9 + $0xd0] sm:$0xff] }
 0x1c7   :  { %827 = vst [vmem:[%s5239_s11 + $0x90] sm:$0xff] %v795_v18  ;;  %v1014_v30 = vmax.f32 %v935_v24, 0.0 }
 0x1ca   :  { %v712_v22 = vpop.f32.mrf.mxu2 }
 0x1cb   :  { %v713_v26 = vadd.f32 %v3824_v3, %v712_v22 }
 0x1cc   :  { %v936_v27 = vpop.f32.mrf.mxu3 }
 0x1cd   :  { %v796_v28 = vadd.f32 %v764_v23, %v713_v26  ;;  %v937_v29 = vadd.f32 %v4086_v19, %v936_v27  ;;  %v772_v26 = vld [vmem:[%s5237_s9 + $0xd8] sm:$0xff] }
 0x1cf   :  { %828 = vst [vmem:[%s5239_s11 + $0x98] sm:$0xff] %v796_v28  ;;  %v1015_v53 = vmax.f32 %v937_v29, 0.0  ;;  %v850_v0 = vpack.c.bf16 %v796_v28, %v795_v18 }
 0x1d1   :  { %978 = vmatmul.bf16.gmra.mxu3 %v850_v0  ;;  %v1046_v31 = vpack.c.bf16 %v1015_v53, %v1014_v30 }
 0x1d2   :  { %v715_v33 = vpop.f32.mrf.mxu2 }
 0x1d3   :  { %v716_v36 = vadd.f32 %v3824_v3, %v715_v33  ;;  %1172 = vmatmul.bf16.vlgmr.msrb.gmra.mxu0 %v1046_v31  ;;  %1261 = vmatmul.bf16.vlgmr.msrb.gmra.mxu1 %v1046_v31 }
 0x1d4   :  { %v939_v37 = vpop.f32.mrf.mxu3 }
 0x1d5   :  { %v797_v38 = vadd.f32 %v765_v35, %v716_v36  ;;  %v940_v34 = vadd.f32 %v4086_v19, %v939_v37  ;;  %v773_v37 = vld [vmem:[%s5237_s9 + $0xe0] sm:$0xff] }
 0x1d7   :  { %829 = vst [vmem:[%s5239_s11 + $0xa0] sm:$0xff] %v797_v38  ;;  %v1016_v43 = vmax.f32 %v940_v34, 0.0 }
 0x1da   :  { %v717_v40 = vpop.f32.mrf.mxu2 }
 0x1db   :  { %v718_v58 = vadd.f32 %v3824_v3, %v717_v40 }
 0x1dc   :  { %v941_v52 = vpop.f32.mrf.mxu3 }
 0x1dd   :  { %v798_v63 = vadd.f32 %v766_v25, %v718_v58  ;;  %v942_v42 = vadd.f32 %v4086_v19, %v941_v52  ;;  %v774_v58 = vld [vmem:[%s5237_s9 + $0xe8] sm:$0xff] }
 0x1df   :  { %830 = vst [vmem:[%s5239_s11 + $0xa8] sm:$0xff] %v798_v63  ;;  %v1017_v44 = vmax.f32 %v942_v42, 0.0  ;;  %v851_v45 = vpack.c.bf16 %v798_v63, %v797_v38 }
 0x1e1   :  { %983 = vmatmul.bf16.gmra.mxu3 %v851_v45  ;;  %v1047_v46 = vpack.c.bf16 %v1017_v44, %v1016_v43 }
 0x1e2   :  { %v720_v47 = vpop.f32.mrf.mxu2 }
 0x1e3   :  { %v721_v50 = vadd.f32 %v3824_v3, %v720_v47  ;;  %1177 = vmatmul.bf16.gmra.mxu0 %v1047_v46  ;;  %1266 = vmatmul.bf16.gmra.mxu1 %v1047_v46 }
 0x1e4   :  { %v944_v51 = vpop.f32.mrf.mxu3 }
 0x1e5   :  { %v799_v54 = vadd.f32 %v767_v49, %v721_v50  ;;  %v945_v57 = vadd.f32 %v4086_v19, %v944_v51  ;;  %v775_v51 = vld [vmem:[%s5237_s9 + $0xf0] sm:$0xff] }
 0x1e7   :  { %831 = vst [vmem:[%s5239_s11 + $0xb0] sm:$0xff] %v799_v54  ;;  %v1018_v62 = vmax.f32 %v945_v57, 0.0 }
 0x1ea   :  { %v722_v55 = vpop.f32.mrf.mxu2 }
 0x1eb   :  { %v723_v10 = vadd.f32 %v3824_v3, %v722_v55 }
 0x1ec   :  { %v946_v21 = vpop.f32.mrf.mxu3 }
 0x1ed   :  { %v800_v59 = vadd.f32 %v768_v56, %v723_v10  ;;  %v947_v60 = vadd.f32 %v4086_v19, %v946_v21  ;;  %v776_v10 = vld [vmem:[%s5237_s9 + $0xf8] sm:$0xff] }
 0x1ef   :  { %832 = vst [vmem:[%s5239_s11 + $0xb8] sm:$0xff] %v800_v59  ;;  %v1019_v1 = vmax.f32 %v947_v60, 0.0  ;;  %v852_v2 = vpack.c.bf16 %v800_v59, %v799_v54 }
 0x1f1   :  { %988 = vmatmul.bf16.gmra.mxu3 %v852_v2  ;;  %v1048_v61 = vpack.c.bf16 %v1019_v1, %v1018_v62 }
 0x1f2   :  { %v725_v6 = vpop.f32.mrf.mxu2 }
 0x1f3   :  { %v726_v5 = vadd.f32 %v3824_v3, %v725_v6  ;;  %1182 = vmatmul.bf16.gmra.mxu0 %v1048_v61  ;;  %1271 = vmatmul.bf16.gmra.mxu1 %v1048_v61 }
 0x1f4   :  { %v949_v39 = vpop.f32.mrf.mxu3 }
 0x1f5   :  { %v801_v48 = vadd.f32 %v769_v4, %v726_v5  ;;  %v950_v9 = vadd.f32 %v4086_v19, %v949_v39 }
 0x1f7   :  { %833 = vst [vmem:[%s5239_s11 + $0xc0] sm:$0xff] %v801_v48  ;;  %v1020_v14 = vmax.f32 %v950_v9, 0.0 }
 0x1fa   :  { %v727_v7 = vpop.f32.mrf.mxu2 }
 0x1fb   :  { %v728_v12 = vadd.f32 %v3824_v3, %v727_v7 }
 0x1fc   :  { %v951_v11 = vpop.f32.mrf.mxu3 }
 0x1fd   :  { %v802_v20 = vadd.f32 %v770_v8, %v728_v12  ;;  %v952_v13 = vadd.f32 %v4086_v19, %v951_v11  ;;  %v1078_v11 = vld [vmem:[%s5236_s8] sm:$0x3] }
 0x1ff   :  { %834 = vst [vmem:[%s5239_s11 + $0xc8] sm:$0xff] %v802_v20  ;;  %v1021_v15 = vmax.f32 %v952_v13, 0.0  ;;  %v853_v16 = vpack.c.bf16 %v802_v20, %v801_v48 }
 0x201   :  { %993 = vmatmul.bf16.gmra.mxu3 %v853_v16  ;;  %v1049_v32 = vpack.c.bf16 %v1021_v15, %v1020_v14  ;;  %v4200_v15 = vperm.slane %v1078_v11, 0  ;;  %v4202_v16 = vperm.slane %v1078_v11, 1 }
 0x202   :  { %v730_v41 = vpop.f32.mrf.mxu2 }
 0x203   :  { %v731_v18 = vadd.f32 %v3824_v3, %v730_v41  ;;  %1187 = vmatmul.bf16.gmra.mxu0 %v1049_v32  ;;  %1276 = vmatmul.bf16.gmra.mxu1 %v1049_v32 }
 0x204   :  { %v954_v22 = vpop.f32.mrf.mxu3 }
 0x205   :  { %v803_v23 = vadd.f32 %v771_v17, %v731_v18  ;;  %v955_v27 = vadd.f32 %v4086_v19, %v954_v22 }
 0x207   :  { %835 = vst [vmem:[%s5239_s11 + $0xd0] sm:$0xff] %v803_v23  ;;  %v1022_v0 = vmax.f32 %v955_v27, 0.0 }
 0x20a   :  { %v732_v24 = vpop.f32.mrf.mxu2 }
 0x20b   :  { %v733_v28 = vadd.f32 %v3824_v3, %v732_v24 }
 0x20c   :  { %v956_v29 = vpop.f32.mrf.mxu3 }
 0x20d   :  { %v804_v30 = vadd.f32 %v772_v26, %v733_v28  ;;  %v957_v53 = vadd.f32 %v4086_v19, %v956_v29 }
 0x20f   :  { %836 = vst [vmem:[%s5239_s11 + $0xd8] sm:$0xff] %v804_v30  ;;  %v1023_v31 = vmax.f32 %v957_v53, 0.0  ;;  %v854_v33 = vpack.c.bf16 %v804_v30, %v803_v23 }
 0x211   :  { %v1050_v35 = vpack.c.bf16 %v1023_v31, %v1022_v0  ;;  %998 = vmatmul.bf16.gmra.mxu3 %v854_v33 }
 0x212   :  { %v735_v36 = vpop.f32.mrf.mxu2 }
 0x213   :  { %v736_v38 = vadd.f32 %v3824_v3, %v735_v36  ;;  %1192 = vmatmul.bf16.gmra.mxu0 %v1050_v35  ;;  %1281 = vmatmul.bf16.gmra.mxu1 %v1050_v35 }
 0x214   :  { %v959_v40 = vpop.f32.mrf.mxu3 }
 0x215   :  { %v805_v25 = vadd.f32 %v773_v37, %v736_v38  ;;  %v960_v52 = vadd.f32 %v4086_v19, %v959_v40 }
 0x217   :  { %837 = vst [vmem:[%s5239_s11 + $0xe0] sm:$0xff] %v805_v25  ;;  %v1024_v45 = vmax.f32 %v960_v52, 0.0 }
 0x21a   :  { %v737_v34 = vpop.f32.mrf.mxu2 }
 0x21b   :  { %v738_v63 = vadd.f32 %v3824_v3, %v737_v34 }
 0x21c   :  { %v961_v42 = vpop.f32.mrf.mxu3 }
 0x21d   :  { %v806_v43 = vadd.f32 %v774_v58, %v738_v63  ;;  %v962_v44 = vadd.f32 %v4086_v19, %v961_v42 }
 0x21f   :  { %838 = vst [vmem:[%s5239_s11 + $0xe8] sm:$0xff] %v806_v43  ;;  %v1025_v46 = vmax.f32 %v962_v44, 0.0  ;;  %v855_v47 = vpack.c.bf16 %v806_v43, %v805_v25 }
 0x221   :  { %v1051_v49 = vpack.c.bf16 %v1025_v46, %v1024_v45  ;;  %1003 = vmatmul.bf16.gmra.mxu3 %v855_v47 }
 0x222   :  { %v740_v50 = vpop.f32.mrf.mxu2 }
 0x223   :  { %v741_v54 = vadd.f32 %v3824_v3, %v740_v50  ;;  %1197 = vmatmul.bf16.gmra.mxu0 %v1051_v49  ;;  %1286 = vmatmul.bf16.gmra.mxu1 %v1051_v49 }
 0x224   :  { %v964_v55 = vpop.f32.mrf.mxu3 }
 0x225   :  { %v807_v56 = vadd.f32 %v775_v51, %v741_v54  ;;  %v965_v21 = vadd.f32 %v4086_v19, %v964_v55 }
 0x227   :  { %839 = vst [vmem:[%s5239_s11 + $0xf0] sm:$0xff] %v807_v56  ;;  %v1026_v2 = vmax.f32 %v965_v21, 0.0 }
 0x22a   :  { %v742_v57 = vpop.f32.mrf.mxu2 }
 0x22b   :  { %v743_v59 = vadd.f32 %v3824_v3, %v742_v57 }
 0x22c   :  { %v966_v60 = vpop.f32.mrf.mxu3 }
 0x22d   :  { %v808_v62 = vadd.f32 %v776_v10, %v743_v59  ;;  %v967_v1 = vadd.f32 %v4086_v19, %v966_v60 }
 0x22f   :  { %840 = vst [vmem:[%s5239_s11 + $0xf8] sm:$0xff] %v808_v62  ;;  %v1027_v61 = vmax.f32 %v967_v1, 0.0  ;;  %v856_v6 = vpack.c.bf16 %v808_v62, %v807_v56 }
 0x231   :  { %v1052_v4 = vpack.c.bf16 %v1027_v61, %v1026_v2  ;;  %1008 = vmatmul.bf16.gmra.mxu3 %v856_v6 }
 0x233   :  { %1202 = vmatmul.bf16.gmra.mxu0 %v1052_v4  ;;  %1291 = vmatmul.bf16.gmra.mxu1 %v1052_v4 }
 0x234   :  { %v969_v5 = vpop.f32.mrf.mxu3 }
 0x235   :  { %v970_v39 = vadd.f32 %v4086_v19, %v969_v5 }
 0x237   :  { %v1028_v7 = vmax.f32 %v970_v39, 0.0 }
 0x23c   :  { %v971_v48 = vpop.f32.mrf.mxu3 }
 0x23d   :  { %v972_v3 = vadd.f32 %v4086_v19, %v971_v48 }
 0x23f   :  { %v1029_v8 = vmax.f32 %v972_v3, 0.0 }
 0x241   :  { %v1053_v9 = vpack.c.bf16 %v1029_v8, %v1028_v7 }
 0x243   :  { %1207 = vmatmul.bf16.gmra.mxu0 %v1053_v9  ;;  %1296 = vmatmul.bf16.gmra.mxu1 %v1053_v9 }
 0x244   :  { %v974_v12 = vpop.f32.mrf.mxu3 }
 0x245   :  { %v975_v20 = vadd.f32 %v4086_v19, %v974_v12 }
 0x247   :  { %v1030_v32 = vmax.f32 %v975_v20, 0.0 }
 0x24c   :  { %v976_v13 = vpop.f32.mrf.mxu3 }
 0x24d   :  { %v977_v14 = vadd.f32 %v4086_v19, %v976_v13 }
 0x24f   :  { %v1031_v41 = vmax.f32 %v977_v14, 0.0 }
 0x250   :  { %v1173_v17 = vpop.f32.mrf.mxu0  ;;  %v1262_v18 = vpop.f32.mrf.mxu1 }
 0x251   :  { %v1054_v22 = vpack.c.bf16 %v1031_v41, %v1030_v32  ;;  %v1174_v23 = vadd.f32 %v1173_v17, %v4200_v15  ;;  %v1263_v24 = vadd.f32 %v1262_v18, %v4202_v16 }
 0x253   :  { %v2964_v26 = vmul.f32 -1.442695, %v1174_v23  ;;  %v2965_v27 = vmul.f32 -1.442695, %v1263_v24  ;;  %1212 = vmatmul.bf16.gmra.mxu0 %v1054_v22  ;;  %1301 = vmatmul.bf16.gmra.mxu1 %v1054_v22 }
 0x254   :  { %v979_v28 = vpop.f32.mrf.mxu3 }
 0x255   :  { %3130 = vpow2.f32 %v2964_v26  ;;  %v980_v37 = vadd.f32 %v4086_v19, %v979_v28 }
 0x256   :  { %3132 = vpow2.f32 %v2965_v27 }
 0x257   :  { %v1032_v58 = vmax.f32 %v980_v37, 0.0 }
 0x258   :  { %v1175_v29 = vpop.f32.mrf.mxu0  ;;  %v1264_v30 = vpop.f32.mrf.mxu1 }
 0x259   :  { %v1176_v53 = vadd.f32 %v1175_v29, %v4200_v15  ;;  %v1265_v0 = vadd.f32 %v1264_v30, %v4202_v16 }
 0x25b   :  { %v3131_v31 = vpop.eup %3130  ;;  %v2966_v33 = vmul.f32 -1.442695, %v1176_v53  ;;  %v2967_v38 = vmul.f32 -1.442695, %v1265_v0 }
 0x25c   :  { %v3133_v35 = vpop.eup %3132  ;;  %v1534_v36 = vadd.f32 1.0, %v3131_v31  ;;  %v981_v40 = vpop.f32.mrf.mxu3 }
 0x25d   :  { %v1535_v25 = vadd.f32 1.0, %v3133_v35  ;;  %3134 = vpow2.f32 %v2966_v33  ;;  %v982_v34 = vadd.f32 %v4086_v19, %v981_v40 }
 0x25e   :  { %3136 = vrcp.f32 %v1534_v36  ;;  %v1607_v57 = vand.u32 2147483647, %v1534_v36  ;;  %v1609_v21 = vand.u32 2147483648, %v1534_v36  ;;  %vm1603_vm0 = vweird.f32 %v1534_v36 }
 0x25f   :  { %3138 = vrcp.f32 %v1535_v25  ;;  %v1033_v52 = vmax.f32 %v982_v34, 0.0  ;;  %v1622_v60 = vand.u32 2147483647, %v1535_v25  ;;  %v1624_v1 = vand.u32 2147483648, %v1535_v25 }
 0x260   :  { %3140 = vpow2.f32 %v2967_v38  ;;  %v1178_v63 = vpop.f32.mrf.mxu0  ;;  %v1267_v42 = vpop.f32.mrf.mxu1  ;;  %vm1618_vm1 = vweird.f32 %v1535_v25  ;;  %vm4217_vm3 = vcmp.eq.f32.partialorder %v1607_v57, 8.507059e+37  ;;  %v1610_v48 = vor.u32 1.1754944e-38, %v1609_v21 }
 0x261   :  { %v1179_v43 = vadd.f32 %v1178_v63, %v4200_v15  ;;  %v1268_v44 = vadd.f32 %v1267_v42, %v4202_v16  ;;  %v1055_v45 = vpack.c.bf16 %v1033_v52, %v1032_v58  ;;  %vm4222_vm5 = vcmp.eq.f32.partialorder %v1622_v60, 8.507059e+37 }
 0x262   :  { %v1625_v12 = vor.u32 1.1754944e-38, %v1624_v1 }
 0x263   :  { %v3135_v46 = vpop.eup %3134  ;;  %v2968_v47 = vmul.f32 -1.442695, %v1179_v43  ;;  %v2969_v51 = vmul.f32 -1.442695, %v1268_v44  ;;  %1217 = vmatmul.bf16.gmra.mxu0 %v1055_v45  ;;  %1306 = vmatmul.bf16.gmra.mxu1 %v1055_v45 }
 0x264   :  { %v3137_v49 = vpop.eup %3136  ;;  %v4212_v50 = vadd.f32 1.0, %v3135_v46  ;;  %v984_v54 = vpop.f32.mrf.mxu3 }
 0x265   :  { %v3139_v55 = vpop.eup %3138  ;;  %v1599_v56 = vmul.f32 %v3137_v49, %v1534_v36  ;;  %3142 = vpow2.f32 %v2968_v47  ;;  %vm1604_vm2 = vweird.f32 %v3137_v49  ;;  %v4227_v11 = vadd.f32 %v4086_v19, %v984_v54 }
 0x266   :  { %v3141_v10 = vpop.eup %3140  ;;  %v1614_v59 = vmul.f32 %v3139_v55, %v1535_v25  ;;  %3144 = vrcp.f32 %v4212_v50  ;;  %vm1619_vm4 = vweird.f32 %v3139_v55  ;;  %vm1605_vm6 = vmor %vm1603_vm0, %vm1604_vm2  ;;  %v1637_v32 = vand.u32 2147483647, %v4212_v50 }
 0x267   :  { %v1600_v62 = vsub.f32 1.0, %v1599_v56  ;;  %v4215_v2 = vadd.f32 1.0, %v3141_v10  ;;  %3146 = vpow2.f32 %v2969_v51  ;;  %v1639_v41 = vand.u32 2147483648, %v4212_v50  ;;  %vm1620_vm7 = vmor %vm1618_vm1, %vm1619_vm4 }
 0x268   :  { %v1615_v61 = vsub.f32 1.0, %v1614_v59  ;;  %v1180_v6 = vpop.f32.mrf.mxu0  ;;  %v1269_v4 = vpop.f32.mrf.mxu1  ;;  %vm1633_vm8 = vweird.f32 %v4212_v50  ;;  %v1034_v33 = vmax.f32 %v4227_v11, 0.0  ;;  %vm4247_vm9 = vcmp.eq.f32.partialorder %v1637_v32, 8.507059e+37 }
 0x269   :  { %v1601_v5 = vmul.f32 %v3137_v49, %v1600_v62  ;;  %3148 = vrcp.f32 %v4215_v2  ;;  %v1181_v20 = vadd.f32 %v1180_v6, %v4200_v15  ;;  %v1270_v26 = vadd.f32 %v1269_v4, %v4202_v16 }
 0x26a   :  { %v1616_v3 = vmul.f32 %v3139_v55, %v1615_v61  ;;  %v1652_v31 = vand.u32 2147483647, %v4215_v2  ;;  %v1640_v34 = vor.u32 1.1754944e-38, %v1639_v41  ;;  %vm1648_vm11 = vweird.f32 %v4215_v2 }
 0x26b   :  { %v3143_v8 = vpop.eup %3142  ;;  %v1602_v9 = vadd.f32 %v3137_v49, %v1601_v5  ;;  %v2970_v24 = vmul.f32 -1.442695, %v1181_v20  ;;  %v2971_v58 = vmul.f32 -1.442695, %v1270_v26  ;;  %v1654_v63 = vand.u32 2147483648, %v4215_v2 }
 0x26c   :  { %v3145_v13 = vpop.eup %3144  ;;  %v1617_v14 = vadd.f32 %v3139_v55, %v1616_v3  ;;  %v4233_v17 = vadd.f32 1.0, %v3143_v8  ;;  %v986_v18 = vpop.f32.mrf.mxu3  ;;  %vm4257_vm12 = vcmp.eq.f32.partialorder %v1652_v31, 8.507059e+37 }
 0x26d   :  { %v1606_v22 = vsel %vm1605_vm6, %v3137_v49, %v1602_v9  ;;  %v1629_v23 = vmul.f32 %v3145_v13, %v4212_v50  ;;  %v3147_v27 = vpop.eup %3146  ;;  %vm1634_vm10 = vweird.f32 %v3145_v13  ;;  %v987_v44 = vadd.f32 %v4086_v19, %v986_v18 }
 0x26e   :  { %v1611_v28 = vsel %vm4217_vm3, %v1610_v48, %v1606_v22  ;;  %v1621_v29 = vsel %vm1620_vm7, %v3139_v55, %v1617_v14  ;;  %3150 = vrcp.f32 %v4233_v17  ;;  %v4252_v37 = vadd.f32 1.0, %v3147_v27  ;;  %vm1635_vm13 = vmor %vm1633_vm8, %vm1634_vm10 }
 0x26f   :  { %v3149_v30 = vpop.eup %3148  ;;  %2558 = vst [vmem:[#allocation2] sm:$0xff] %v1611_v28  ;;  %v1626_v53 = vsel %vm4222_vm5, %v1625_v12, %v1621_v29  ;;  %v1630_v0 = vsub.f32 1.0, %v1629_v23  ;;  %3152 = vpow2.f32 %v2970_v24  ;;  %v1667_v56 = vand.u32 2147483647, %v4233_v17 }
 0x270   :  { %2559 = vst [vmem:[#allocation2 + $0x8] sm:$0xff] %v1626_v53  ;;  %v1644_v36 = vmul.f32 %v3149_v30, %v4215_v2  ;;  %v1183_v38 = vpop.f32.mrf.mxu0  ;;  %v1272_v40 = vpop.f32.mrf.mxu1  ;;  %3154 = vrcp.f32 %v4252_v37  ;;  %vm1649_vm14 = vweird.f32 %v3149_v30  ;;  %v1669_v57 = vand.u32 2147483648, %v4233_v17 }
 0x271   :  { %v1631_v25 = vmul.f32 %v3145_v13, %v1630_v0  ;;  %3156 = vpow2.f32 %v2971_v58  ;;  %v1184_v47 = vadd.f32 %v1183_v38, %v4200_v15  ;;  %v1273_v49 = vadd.f32 %v1272_v40, %v4202_v16  ;;  %vm1650_vm15 = vmor %vm1648_vm11, %vm1649_vm14 }
 0x272   :  { %v1645_v52 = vsub.f32 1.0, %v1644_v36  ;;  %v1035_v59 = vmax.f32 %v987_v44, 0.0  ;;  %v1655_v62 = vor.u32 1.1754944e-38, %v1654_v63  ;;  %vm1663_vm0 = vweird.f32 %v4233_v17 }
 0x273   :  { %v1632_v42 = vadd.f32 %v3145_v13, %v1631_v25  ;;  %v2972_v60 = vmul.f32 -1.442695, %v1184_v47  ;;  %v2973_v6 = vmul.f32 -1.442695, %v1273_v49  ;;  %vm4281_vm2 = vcmp.eq.f32.partialorder %v1667_v56, 8.507059e+37 }
 0x274   :  { %v3151_v45 = vpop.eup %3150  ;;  %v1646_v46 = vmul.f32 %v3149_v30, %v1645_v52  ;;  %v4266_v51 = vpop.f32.mrf.mxu3  ;;  %v1056_v39 = vpack.c.bf16 %v1035_v59, %v1034_v33  ;;  %v1670_v11 = vor.u32 1.1754944e-38, %v1669_v57  ;;  %v1682_v20 = vand.u32 2147483647, %v4252_v37 }
 0x275   :  { %v1636_v54 = vsel %vm1635_vm13, %v3145_v13, %v1632_v42  ;;  %v1659_v55 = vmul.f32 %v3151_v45, %v4233_v17  ;;  %v3153_v10 = vpop.eup %3152  ;;  %3158 = vpow2.f32 %v2972_v60  ;;  %vm1664_vm1 = vweird.f32 %v3151_v45 }
 0x276   :  { %v1641_v50 = vsel %vm4247_vm9, %v1640_v34, %v1636_v54  ;;  %v1647_v21 = vadd.f32 %v3149_v30, %v1646_v46  ;;  %v4275_v61 = vadd.f32 1.0, %v3153_v10  ;;  %v3155_v4 = vpop.eup %3154  ;;  %1222 = vmatmul.bf16.gmra.mxu0 %v1056_v39  ;;  %1311 = vmatmul.bf16.gmra.mxu1 %v1056_v39  ;;  %vm1665_vm3 = vmor %vm1663_vm0, %vm1664_vm1  ;;  %vm1678_vm4 = vweird.f32 %v4252_v37 }
 0x277   :  { %2560 = vst [vmem:[#allocation2 + $0x10] sm:$0xff] %v1641_v50  ;;  %v1660_v1 = vsub.f32 1.0, %v1659_v55  ;;  %v3157_v7 = vpop.eup %3156  ;;  %v1674_v2 = vmul.f32 %v3155_v4, %v4252_v37  ;;  %vm1679_vm5 = vweird.f32 %v3155_v4  ;;  %v1684_v41 = vand.u32 2147483648, %v4252_v37 }
 0x278   :  { %v1651_v5 = vsel %vm1650_vm15, %v3149_v30, %v1647_v21  ;;  %v1185_v48 = vpop.f32.mrf.mxu0  ;;  %v1274_v3 = vpop.f32.mrf.mxu1  ;;  %3160 = vrcp.f32 %v4275_v61  ;;  %v4287_v32 = vadd.f32 1.0, %v3157_v7  ;;  %v1697_v26 = vand.u32 2147483647, %v4275_v61  ;;  %vm1680_vm7 = vmor %vm1678_vm4, %vm1679_vm5 }
 0x279   :  { %v1656_v8 = vsel %vm4257_vm12, %v1655_v62, %v1651_v5  ;;  %v1661_v9 = vmul.f32 %v3151_v45, %v1660_v1  ;;  %v1675_v14 = vsub.f32 1.0, %v1674_v2  ;;  %3162 = vpow2.f32 %v2973_v6 }
 0x27a   :  { %2561 = vst [vmem:[#allocation2 + $0x18] sm:$0xff] %v1656_v8  ;;  %v1186_v18 = vadd.f32 %v1185_v48, %v4200_v15  ;;  %3164 = vrcp.f32 %v4287_v32  ;;  %vm4298_vm6 = vcmp.eq.f32.partialorder %v1682_v20, 8.507059e+37  ;;  %v1699_v29 = vand.u32 2147483648, %v4275_v61 }
 0x27b   :  { %v1662_v13 = vadd.f32 %v3151_v45, %v1661_v9  ;;  %v1676_v24 = vmul.f32 %v3155_v4, %v1675_v14  ;;  %v3159_v27 = vpop.eup %3158  ;;  %v1275_v31 = vadd.f32 %v1274_v3, %v4202_v16  ;;  %v1685_v36 = vor.u32 1.1754944e-38, %v1684_v41 }
 0x27c   :  { %v991_v22 = vpop.f32.mrf.mxu3  ;;  %v2974_v30 = vmul.f32 -1.442695, %v1186_v18  ;;  %v4303_v0 = vadd.f32 1.0, %v3159_v27  ;;  %vm1693_vm8 = vweird.f32 %v4275_v61  ;;  %v990_v38 = vadd.f32 %v4086_v19, %v4266_v51 }
 0x27d   :  { %v1666_v23 = vsel %vm1665_vm3, %v3151_v45, %v1662_v13  ;;  %v1677_v53 = vadd.f32 %v3155_v4, %v1676_v24  ;;  %v992_v33 = vadd.f32 %v4086_v19, %v991_v22  ;;  %vm4314_vm9 = vcmp.eq.f32.partialorder %v1697_v26, 8.507059e+37 }
 0x27e   :  { %v1671_v28 = vsel %vm4281_vm2, %v1670_v11, %v1666_v23  ;;  %v3161_v35 = vpop.eup %3160  ;;  %3166 = vpow2.f32 %v2974_v30  ;;  %v1700_v42 = vor.u32 1.1754944e-38, %v1699_v29  ;;  %v1712_v43 = vand.u32 2147483647, %v4287_v32 }
 0x27f   :  { %2562 = vst [vmem:[#allocation2 + $0x20] sm:$0xff] %v1671_v28  ;;  %v3163_v34 = vpop.eup %3162  ;;  %v1681_v58 = vsel %vm1680_vm7, %v3155_v4, %v1677_v53  ;;  %v1689_v52 = vmul.f32 %v3161_v35, %v4275_v61  ;;  %3168 = vrcp.f32 %v4303_v0  ;;  %v1714_v44 = vand.u32 2147483648, %v4287_v32 }
 0x280   :  { %v1188_v40 = vpop.f32.mrf.mxu0  ;;  %v1277_v25 = vpop.f32.mrf.mxu1  ;;  %v1686_v37 = vsel %vm4298_vm6, %v1685_v36, %v1681_v58  ;;  %v4323_v47 = vadd.f32 1.0, %v3163_v34  ;;  %v2975_v49 = vmul.f32 -1.442695, %v1275_v31  ;;  %v1037_v51 = vmax.f32 %v992_v33, 0.0 }
 0x281   :  { %v3165_v45 = vpop.eup %3164  ;;  %2563 = vst [vmem:[#allocation2 + $0x28] sm:$0xff] %v1686_v37  ;;  %v1690_v46 = vsub.f32 1.0, %v1689_v52  ;;  %vm1694_vm10 = vweird.f32 %v3161_v35  ;;  %vm1708_vm11 = vweird.f32 %v4287_v32  ;;  %v1036_v55 = vmax.f32 %v990_v38, 0.0 }
 0x282   :  { %v1704_v54 = vmul.f32 %v3165_v45, %v4287_v32  ;;  %v1727_v10 = vand.u32 2147483647, %v4303_v0  ;;  %v1729_v50 = vand.u32 2147483648, %v4303_v0  ;;  %3170 = vrcp.f32 %v4323_v47  ;;  %vm1695_vm13 = vmor %vm1693_vm8, %vm1694_vm10 }
 0x283   :  { %v1691_v57 = vmul.f32 %v3161_v35, %v1690_v46  ;;  %vm4332_vm12 = vcmp.eq.f32.partialorder %v1712_v43, 8.507059e+37  ;;  %3172 = vpow2.f32 %v2975_v49  ;;  %v1057_v62 = vpack.c.bf16 %v1037_v51, %v1036_v55 }
 0x284   :  { %v4327_v56 = vpop.f32.mrf.mxu3  ;;  %v3167_v21 = vpop.eup %3166  ;;  %v1705_v59 = vsub.f32 1.0, %v1704_v54  ;;  %v1715_v4 = vor.u32 1.1754944e-38, %v1714_v44  ;;  %v1189_v39 = vadd.f32 %v1188_v40, %v4200_v15  ;;  %vm1709_vm14 = vweird.f32 %v3165_v45 }
 0x285   :  { %v3169_v1 = vpop.eup %3168  ;;  %v1692_v6 = vadd.f32 %v3161_v35, %v1691_v57  ;;  %v4336_v5 = vadd.f32 1.0, %v3167_v21  ;;  %vm1723_vm15 = vweird.f32 %v4303_v0  ;;  %vm4344_vm0 = vcmp.eq.f32.partialorder %v1727_v10, 8.507059e+37  ;;  %vm1710_vm1 = vmor %vm1708_vm11, %vm1709_vm14 }
 0x286   :  { %v1706_v48 = vmul.f32 %v3165_v45, %v1705_v59  ;;  %v1719_v3 = vmul.f32 %v3169_v1, %v4303_v0  ;;  %v1730_v12 = vor.u32 1.1754944e-38, %v1729_v50  ;;  %v1742_v13 = vand.u32 2147483647, %v4323_v47  ;;  %1227 = vmatmul.bf16.gmra.mxu0 %v1057_v62  ;;  %1316 = vmatmul.bf16.gmra.mxu1 %v1057_v62 }
 0x287   :  { %v1696_v9 = vsel %vm1695_vm13, %v3161_v35, %v1692_v6  ;;  %3174 = vrcp.f32 %v4336_v5  ;;  %vm1738_vm2 = vweird.f32 %v4323_v47  ;;  %v1744_v41 = vand.u32 2147483648, %v4323_v47 }
 0x288   :  { %v1190_v7 = vpop.f32.mrf.mxu0  ;;  %v1279_v8 = vpop.f32.mrf.mxu1  ;;  %v1701_v61 = vsel %vm4314_vm9, %v1700_v42, %v1696_v9  ;;  %v1707_v11 = vadd.f32 %v3165_v45, %v1706_v48  ;;  %v1720_v20 = vsub.f32 1.0, %v1719_v3  ;;  %v2976_v18 = vmul.f32 -1.442695, %v1189_v39 }
 0x289   :  { %v3171_v14 = vpop.eup %3170  ;;  %2564 = vst [vmem:[#allocation2 + $0x30] sm:$0xff] %v1701_v61  ;;  %v1278_v22 = vadd.f32 %v1277_v25, %v4202_v16  ;;  %vm1724_vm3 = vweird.f32 %v3169_v1  ;;  %v1757_v32 = vand.u32 2147483647, %v4336_v5  ;;  %vm4364_vm4 = vcmp.eq.f32.partialorder %v1742_v13, 8.507059e+37 }
 0x28a   :  { %v3173_v23 = vpop.eup %3172  ;;  %v1711_v24 = vsel %vm1710_vm1, %v3165_v45, %v1707_v11  ;;  %v1721_v26 = vmul.f32 %v3169_v1, %v1720_v20  ;;  %v1734_v27 = vmul.f32 %v3171_v14, %v4323_v47  ;;  %3176 = vpow2.f32 %v2976_v18  ;;  %vm1725_vm5 = vmor %vm1723_vm15, %vm1724_vm3 }
 0x28b   :  { %v1716_v17 = vsel %vm4332_vm12, %v1715_v4, %v1711_v24  ;;  %v4362_v29 = vadd.f32 1.0, %v3173_v23  ;;  %v2977_v33 = vmul.f32 -1.442695, %v1278_v22  ;;  %v1745_v36 = vor.u32 1.1754944e-38, %v1744_v41 }
 0x28c   :  { %v996_v28 = vpop.f32.mrf.mxu3  ;;  %2565 = vst [vmem:[#allocation2 + $0x38] sm:$0xff] %v1716_v17  ;;  %v1722_v30 = vadd.f32 %v3169_v1, %v1721_v26  ;;  %v1735_v53 = vsub.f32 1.0, %v1734_v27  ;;  %vm1753_vm6 = vweird.f32 %v4336_v5  ;;  %v1759_v38 = vand.u32 2147483648, %v4336_v5 }
 0x28d   :  { %v3175_v35 = vpop.eup %3174  ;;  %3178 = vrcp.f32 %v4362_v29  ;;  %vm1739_vm7 = vweird.f32 %v3171_v14  ;;  %vm4376_vm8 = vcmp.eq.f32.partialorder %v1757_v32, 8.507059e+37  ;;  %v995_v37 = vadd.f32 %v4086_v19, %v4327_v56 }
 0x28e   :  { %v1726_v40 = vsel %vm1725_vm5, %v3169_v1, %v1722_v30  ;;  %v1736_v25 = vmul.f32 %v3171_v14, %v1735_v53  ;;  %v1749_v34 = vmul.f32 %v3175_v35, %v4336_v5  ;;  %3180 = vpow2.f32 %v2977_v33  ;;  %vm1740_vm9 = vmor %vm1738_vm2, %vm1739_vm7 }
 0x28f   :  { %v1731_v63 = vsel %vm4344_vm0, %v1730_v12, %v1726_v40  ;;  %v1191_v44 = vadd.f32 %v1190_v7, %v4200_v15  ;;  %v1280_v45 = vadd.f32 %v1279_v8, %v4202_v16  ;;  %vm1754_vm10 = vweird.f32 %v3175_v35 }
 0x290   :  { %v1193_v58 = vpop.f32.mrf.mxu0  ;;  %v1282_v52 = vpop.f32.mrf.mxu1  ;;  %2566 = vst [vmem:[#allocation2 + $0x40] sm:$0xff] %v1731_v63  ;;  %v1737_v42 = vadd.f32 %v3171_v14, %v1736_v25  ;;  %v1750_v43 = vsub.f32 1.0, %v1749_v34  ;;  %v1760_v49 = vor.u32 1.1754944e-38, %v1759_v38  ;;  %v997_v51 = vadd.f32 %v4086_v19, %v996_v28  ;;  %vm1755_vm11 = vmor %vm1753_vm6, %vm1754_vm10 }
 0x291   :  { %v3177_v46 = vpop.eup %3176  ;;  %v1194_v54 = vadd.f32 %v1193_v58, %v4200_v15  ;;  %v2978_v10 = vmul.f32 -1.442695, %v1191_v44  ;;  %v1038_v60 = vmax.f32 %v995_v37, 0.0  ;;  %v2979_v62 = vmul.f32 -1.442695, %v1280_v45 }
 0x292   :  { %v1741_v55 = vsel %vm1740_vm9, %v3171_v14, %v1737_v42  ;;  %v1751_v57 = vmul.f32 %v3175_v35, %v1750_v43  ;;  %v4388_v56 = vadd.f32 1.0, %v3177_v46  ;;  %v1039_v47 = vmax.f32 %v997_v51, 0.0 }
 0x293   :  { %v3179_v21 = vpop.eup %3178  ;;  %v1746_v59 = vsel %vm4364_vm4, %v1745_v36, %v1741_v55  ;;  %v1772_v4 = vand.u32 2147483647, %v4362_v29  ;;  %v1774_v48 = vand.u32 2147483648, %v4362_v29  ;;  %v2980_v3 = vmul.f32 -1.442695, %v1194_v54 }
 0x294   :  { %v999_v50 = vpop.f32.mrf.mxu3  ;;  %2567 = vst [vmem:[#allocation2 + $0x48] sm:$0xff] %v1746_v59  ;;  %v1752_v1 = vadd.f32 %v3175_v35, %v1751_v57  ;;  %v1764_v6 = vmul.f32 %v3179_v21, %v4362_v29  ;;  %3182 = vrcp.f32 %v4388_v56  ;;  %v3181_v39 = vpop.eup %3180  ;;  %v1283_v7 = vadd.f32 %v1282_v52, %v4202_v16 }
 0x295   :  { %3184 = vpow2.f32 %v2978_v10  ;;  %v4400_v2 = vadd.f32 1.0, %v3181_v39  ;;  %v1058_v20 = vpack.c.bf16 %v1039_v47, %v1038_v60  ;;  %vm1768_vm12 = vweird.f32 %v4362_v29 }
 0x296   :  { %v1756_v8 = vsel %vm1755_vm11, %v3175_v35, %v1752_v1  ;;  %v1765_v9 = vsub.f32 1.0, %v1764_v6  ;;  %3186 = vpow2.f32 %v2979_v62  ;;  %vm1769_vm13 = vweird.f32 %v3179_v21 }
 0x297   :  { %v1761_v11 = vsel %vm4376_vm8, %v1760_v49, %v1756_v8  ;;  %3188 = vrcp.f32 %v4400_v2  ;;  %vm4406_vm14 = vcmp.eq.f32.partialorder %v1772_v4, 8.507059e+37  ;;  %v1787_v14 = vand.u32 2147483647, %v4388_v56  ;;  %1232 = vmatmul.bf16.gmra.mxu0 %v1058_v20  ;;  %1321 = vmatmul.bf16.gmra.mxu1 %v1058_v20  ;;  %vm1770_vm15 = vmor %vm1768_vm12, %vm1769_vm13 }
 0x298   :  { %v1195_v12 = vpop.f32.mrf.mxu0  ;;  %v1284_v61 = vpop.f32.mrf.mxu1  ;;  %2568 = vst [vmem:[#allocation2 + $0x50] sm:$0xff] %v1761_v11  ;;  %v1766_v5 = vmul.f32 %v3179_v21, %v1765_v9  ;;  %3190 = vpow2.f32 %v2980_v3  ;;  %v2981_v41 = vmul.f32 -1.442695, %v1283_v7  ;;  %v1775_v23 = vor.u32 1.1754944e-38, %v1774_v48  ;;  %v4472_v7 = vld [vmem:[%s5234_s6] ss:$0 sm:$0xff] }
 0x299   :  { %v1789_v24 = vand.u32 2147483648, %v4388_v56  ;;  %v1196_v26 = vadd.f32 %v1195_v12, %v4200_v15  ;;  %vm1783_vm0 = vweird.f32 %v4388_v56  ;;  %v1802_v32 = vand.u32 2147483647, %v4400_v2  ;;  %s3413_s6 = smov [#allocation2]  }
 0x29a   :  { %v3183_v18 = vpop.eup %3182  ;;  %v1767_v22 = vadd.f32 %v3179_v21, %v1766_v5  ;;  %3192 = vpow2.f32 %v2981_v41  ;;  %v1804_v31 = vand.u32 2147483648, %v4400_v2  ;;  %v4423_v35 = vadd.f32 %v4086_v19, %v999_v50  ;;  %s2626_s23 = sshll.u32 %s3413_s6, 4  ;;  %s2627_s23 = int_to_ptr.vmem [resolvable:$true] %s2626_s23 }
 0x29b   :  { %v3185_v28 = vpop.eup %3184  ;;  %v1779_v17 = vmul.f32 %v3183_v18, %v4388_v56  ;;  %vm4427_vm1 = vcmp.eq.f32.partialorder %v1787_v14, 8.507059e+37  ;;  %v1790_v34 = vor.u32 1.1754944e-38, %v1789_v24  ;;  %vm1798_vm2 = vweird.f32 %v4400_v2 }
 0x29c   :  { %v1001_v27 = vpop.f32.mrf.mxu3  ;;  %v3187_v30 = vpop.eup %3186  ;;  %v1771_v53 = vsel %vm1770_vm15, %v3179_v21, %v1767_v22  ;;  %v4420_v33 = vadd.f32 1.0, %v3185_v28  ;;  %v2982_v58 = vmul.f32 -1.442695, %v1196_v26  ;;  %vm1784_vm3 = vweird.f32 %v3183_v18 }
 0x29d   :  { %v1776_v29 = vsel %vm4406_vm14, %v1775_v23, %v1771_v53  ;;  %v1780_v36 = vsub.f32 1.0, %v1779_v17  ;;  %v4431_v40 = vadd.f32 1.0, %v3187_v30  ;;  %v3189_v25 = vpop.eup %3188  ;;  %vm4440_vm4 = vcmp.eq.f32.partialorder %v1802_v32, 8.507059e+37  ;;  %vm1785_vm5 = vmor %vm1783_vm0, %vm1784_vm3 }
 0x29e   :  { %2569 = vst [vmem:[#allocation2 + $0x58] sm:$0xff] %v1776_v29  ;;  %3194 = vrcp.f32 %v4420_v33  ;;  %v3191_v63 = vpop.eup %3190  ;;  %v1794_v37 = vmul.f32 %v3189_v25, %v4400_v2  ;;  %v1805_v43 = vor.u32 1.1754944e-38, %v1804_v31  ;;  %v1819_v44 = vand.u32 2147483648, %v4420_v33 }
 0x29f   :  { %v1781_v0 = vmul.f32 %v3183_v18, %v1780_v36  ;;  %3196 = vrcp.f32 %v4431_v40  ;;  %v1040_v45 = vmax.f32 %v4423_v35, 0.0  ;;  %v1285_v46 = vadd.f32 %v1284_v61, %v4202_v16 }
 0x2a0   :  { %v4435_v19 = vpop.f32.mrf.mxu0  ;;  %v4437_v52 = vpop.f32.mrf.mxu1  ;;  %v1795_v54 = vsub.f32 1.0, %v1794_v37  ;;  %v1817_v55 = vand.u32 2147483647, %v4420_v33  ;;  %v4449_v57 = vadd.f32 1.0, %v3191_v63  ;;  %vm1799_vm6 = vweird.f32 %v3189_v25 }
 0x2a1   :  { %v3193_v49 = vpop.eup %3192  ;;  %v1782_v51 = vadd.f32 %v3183_v18, %v1781_v0  ;;  %v1832_v10 = vand.u32 2147483647, %v4431_v40  ;;  %3198 = vpow2.f32 %v2982_v58  ;;  %v1834_v62 = vand.u32 2147483648, %v4431_v40  ;;  %vm1800_vm9 = vmor %vm1798_vm2, %vm1799_vm6 }
 0x2a2   :  { %v4454_v50 = vadd.f32 1.0, %v3193_v49  ;;  %v1796_v60 = vmul.f32 %v3189_v25, %v1795_v54  ;;  %3200 = vrcp.f32 %v4449_v57  ;;  %vm1813_vm7 = vweird.f32 %v4420_v33 }
 0x2a3   :  { %v1786_v59 = vsel %vm1785_vm5, %v3183_v18, %v1782_v51  ;;  %v1820_v56 = vor.u32 1.1754944e-38, %v1819_v44  ;;  %v2983_v6 = vmul.f32 -1.442695, %v1285_v46  ;;  %vm4464_vm8 = vcmp.eq.f32.partialorder %v1817_v55, 8.507059e+37 }
 0x2a4   :  { %v4456_v21 = vpop.f32.mrf.mxu3  ;;  %v3195_v47 = vpop.eup %3194  ;;  %v1791_v1 = vsel %vm4427_vm1, %v1790_v34, %v1786_v59  ;;  %v1797_v39 = vadd.f32 %v3189_v25, %v1796_v60  ;;  %3202 = vrcp.f32 %v4454_v50  ;;  %v1002_v8 = vadd.f32 %v4472_v7, %v1001_v27 }
 0x2a5   :  { %v3197_v4 = vpop.eup %3196  ;;  %2570 = vst [vmem:[#allocation2 + $0x60] sm:$0xff] %v1791_v1  ;;  %v1809_v48 = vmul.f32 %v3195_v47, %v4420_v33  ;;  %vm1828_vm10 = vweird.f32 %v4431_v40  ;;  %vm4480_vm11 = vcmp.eq.f32.partialorder %v1832_v10, 8.507059e+37  ;;  %v1847_v61 = vand.u32 2147483647, %v4449_v57 }
 0x2a6   :  { %v1824_v9 = vmul.f32 %v3197_v4, %v4431_v40  ;;  %v1801_v5 = vsel %vm1800_vm9, %v3189_v25, %v1797_v39  ;;  %v1835_v14 = vor.u32 1.1754944e-38, %v1834_v62  ;;  %v1849_v2 = vand.u32 2147483648, %v4449_v57 }
 0x2a7   :  { %v1810_v13 = vsub.f32 1.0, %v1809_v48  ;;  %v3199_v41 = vpop.eup %3198  ;;  %v1806_v18 = vsel %vm4440_vm4, %v1805_v43, %v1801_v5  ;;  %vm1843_vm12 = vweird.f32 %v4449_v57  ;;  %3204 = vpow2.f32 %v2983_v6 }
 0x2a8   :  { %v4485_v11 = vpop.f32.mrf.mxu0  ;;  %v4487_v20 = vpop.f32.mrf.mxu1  ;;  %v1825_v22 = vsub.f32 1.0, %v1824_v9  ;;  %2571 = vst [vmem:[#allocation2 + $0x68] sm:$0xff] %v1806_v18  ;;  %vm1814_vm13 = vweird.f32 %v3195_v47  ;;  %v4493_v26 = vadd.f32 1.0, %v3199_v41  ;;  %v1041_v27 = vmax.f32 %v1002_v8, 0.0 }
 0x2a9   :  { %v3201_v23 = vpop.eup %3200  ;;  %v1811_v24 = vmul.f32 %v3195_v47, %v1810_v13  ;;  %vm1829_vm14 = vweird.f32 %v3197_v4  ;;  %vm4496_vm15 = vcmp.eq.f32.partialorder %v1847_v61, 8.507059e+37  ;;  %v1850_v31 = vor.u32 1.1754944e-38, %v1849_v2  ;;  %vm1815_vm0 = vmor %vm1813_vm7, %vm1814_vm13 }
 0x2aa   :  { %v1826_v28 = vmul.f32 %v3197_v4, %v1825_v22  ;;  %v1839_v17 = vmul.f32 %v3201_v23, %v4449_v57  ;;  %v3203_v30 = vpop.eup %3202  ;;  %v1862_v29 = vand.u32 2147483647, %v4454_v50  ;;  %3206 = vrcp.f32 %v4493_v26  ;;  %vm1830_vm1 = vmor %vm1828_vm10, %vm1829_vm14 }
 0x2ab   :  { %v1812_v53 = vadd.f32 %v3195_v47, %v1811_v24  ;;  %v1854_v34 = vmul.f32 %v3203_v30, %v4454_v50  ;;  %v1864_v58 = vand.u32 2147483648, %v4454_v50  ;;  %vm1844_vm2 = vweird.f32 %v3201_v23 }
 0x2ac   :  { %v1006_v36 = vpop.f32.mrf.mxu3  ;;  %v1827_v38 = vadd.f32 %v3197_v4, %v1826_v28  ;;  %v1840_v25 = vsub.f32 1.0, %v1839_v17  ;;  %v1877_v0 = vand.u32 2147483647, %v4493_v26  ;;  %v1059_v37 = vpack.c.bf16 %v1041_v27, %v1040_v45  ;;  %vm1845_vm5 = vmor %vm1843_vm12, %vm1844_vm2 }
 0x2ad   :  { %v1816_v63 = vsel %vm1815_vm0, %v3195_v47, %v1812_v53  ;;  %v3205_v42 = vpop.eup %3204  ;;  %v1855_v46 = vsub.f32 1.0, %v1854_v34  ;;  %vm1858_vm3 = vweird.f32 %v4454_v50  ;;  %v1199_v35 = vadd.f32 %v4435_v19, %v4200_v15 }
 0x2ae   :  { %v1821_v33 = vsel %vm4464_vm8, %v1820_v56, %v1816_v63  ;;  %v1831_v43 = vsel %vm1830_vm1, %v3197_v4, %v1827_v38  ;;  %v1841_v44 = vmul.f32 %v3201_v23, %v1840_v25  ;;  %v4517_v54 = vadd.f32 1.0, %v3205_v42  ;;  %1237 = vmatmul.bf16.gmra.mxu0 %v1059_v37  ;;  %1326 = vmatmul.bf16.gmra.mxu1 %v1059_v37 }
 0x2af   :  { %2572 = vst [vmem:[#allocation2 + $0x70] sm:$0xff] %v1821_v33  ;;  %v1836_v40 = vsel %vm4480_vm11, %v1835_v14, %v1831_v43  ;;  %v1856_v55 = vmul.f32 %v3203_v30, %v1855_v46  ;;  %vm1859_vm4 = vweird.f32 %v3203_v30  ;;  %v1288_v10 = vadd.f32 %v4437_v52, %v4202_v16 }
 0x2b0   :  { %v1203_v49 = vpop.f32.mrf.mxu0  ;;  %v1292_v51 = vpop.f32.mrf.mxu1  ;;  %2573 = vst [vmem:[#allocation2 + $0x78] sm:$0xff] %v1836_v40  ;;  %v1842_v45 = vadd.f32 %v3201_v23, %v1841_v44  ;;  %vm4526_vm6 = vcmp.eq.f32.partialorder %v1862_v29, 8.507059e+37  ;;  %v1865_v62 = vor.u32 1.1754944e-38, %v1864_v58  ;;  %vm1873_vm7 = vweird.f32 %v4493_v26  ;;  %vm1860_vm9 = vmor %vm1858_vm3, %vm1859_vm4 }
 0x2b1   :  { %v3207_v59 = vpop.eup %3206  ;;  %3208 = vrcp.f32 %v4517_v54  ;;  %v1857_v47 = vadd.f32 %v3203_v30, %v1856_v55  ;;  %vm4533_vm8 = vcmp.eq.f32.partialorder %v1877_v0, 8.507059e+37  ;;  %v1879_v56 = vand.u32 2147483648, %v4493_v26 }
 0x2b2   :  { %v1846_v19 = vsel %vm1845_vm5, %v3201_v23, %v1842_v45  ;;  %v1869_v1 = vmul.f32 %v3207_v59, %v4493_v26  ;;  %v2984_v6 = vmul.f32 -1.442695, %v1199_v35  ;;  %v1005_v4 = vadd.f32 %v4472_v7, %v4456_v21 }
 0x2b3   :  { %v1851_v57 = vsel %vm4496_vm15, %v1850_v31, %v1846_v19  ;;  %v1861_v39 = vsel %vm1860_vm9, %v3203_v30, %v1857_v47  ;;  %vm1874_vm10 = vweird.f32 %v3207_v59  ;;  %v2985_v3 = vmul.f32 -1.442695, %v1288_v10 }
 0x2b4   :  { %2574 = vst [vmem:[#allocation2 + $0x80] sm:$0xff] %v1851_v57  ;;  %v1870_v48 = vsub.f32 1.0, %v1869_v1  ;;  %v1866_v8 = vsel %vm4526_vm6, %v1865_v62, %v1861_v39  ;;  %3210 = vpow2.f32 %v2984_v6  ;;  %v1201_v9 = vadd.f32 %v4485_v11, %v4200_v15  ;;  %v1009_v12 = vpop.f32.mrf.mxu3  ;;  %vm1875_vm11 = vmor %vm1873_vm7, %vm1874_vm10 }
 0x2b5   :  { %v1290_v50 = vadd.f32 %v4487_v20, %v4202_v16  ;;  %2575 = vst [vmem:[#allocation2 + $0x88] sm:$0xff] %v1866_v8  ;;  %3212 = vpow2.f32 %v2985_v3  ;;  %v1007_v21 = vadd.f32 %v4472_v7, %v1006_v36  ;;  %v1204_v5 = vadd.f32 %v1203_v49, %v4200_v15 }
 0x2b6   :  { %v1871_v61 = vmul.f32 %v3207_v59, %v1870_v48  ;;  %v1880_v41 = vor.u32 1.1754944e-38, %v1879_v56  ;;  %v2986_v18 = vmul.f32 -1.442695, %v1201_v9  ;;  %v1293_v23 = vadd.f32 %v1292_v51, %v4202_v16 }
 0x2b7   :  { %v3209_v2 = vpop.eup %3208  ;;  %v2987_v22 = vmul.f32 -1.442695, %v1290_v50  ;;  %v1892_v20 = vand.u32 2147483647, %v4517_v54  ;;  %v1043_v27 = vmax.f32 %v1007_v21, 0.0  ;;  %v1042_v28 = vmax.f32 %v1005_v4, 0.0 }
 0x2b8   :  { %v1205_v13 = vpop.f32.mrf.mxu0  ;;  %v1294_v14 = vpop.f32.mrf.mxu1  ;;  %v1872_v11 = vadd.f32 %v3207_v59, %v1871_v61  ;;  %v1884_v24 = vmul.f32 %v3209_v2, %v4517_v54  ;;  %3214 = vpow2.f32 %v2986_v18  ;;  %v2988_v17 = vmul.f32 -1.442695, %v1204_v5 }
 0x2b9   :  { %v2989_v32 = vmul.f32 -1.442695, %v1293_v23  ;;  %v1894_v31 = vand.u32 2147483648, %v4517_v54  ;;  %3216 = vpow2.f32 %v2987_v22  ;;  %v1060_v38 = vpack.c.bf16 %v1043_v27, %v1042_v28 }
 0x2ba   :  { %v1876_v30 = vsel %vm1875_vm11, %v3207_v59, %v1872_v11  ;;  %v1885_v53 = vsub.f32 1.0, %v1884_v24  ;;  %v3211_v29 = vpop.eup %3210  ;;  %3218 = vpow2.f32 %v2988_v17  ;;  %v4562_v25 = vadd.f32 %v4472_v7, %v1009_v12 }
 0x2bb   :  { %v1881_v36 = vsel %vm4533_vm8, %v1880_v41, %v1876_v30  ;;  %v3213_v26 = vpop.eup %3212  ;;  %vm1889_vm12 = vweird.f32 %v3209_v2  ;;  %v4564_v58 = vadd.f32 1.0, %v3211_v29  ;;  %3220 = vpow2.f32 %v2989_v32 }
 0x2bc   :  { %2576 = vst [vmem:[#allocation2 + $0x90] sm:$0xff] %v1881_v36  ;;  %v1886_v34 = vmul.f32 %v3209_v2, %v1885_v53  ;;  %v4566_v63 = vadd.f32 1.0, %v3213_v26  ;;  %vm1888_vm13 = vweird.f32 %v4517_v54  ;;  %v1206_v37 = vadd.f32 %v1205_v13, %v4200_v15  ;;  %v1011_v49 = vpop.f32.mrf.mxu3 }
 0x2bd   :  { %3222 = vrcp.f32 %v4564_v58  ;;  %vm1890_vm14 = vmor %vm1888_vm13, %vm1889_vm12  ;;  %v1895_v44 = vor.u32 1.1754944e-38, %v1894_v31  ;;  %v1295_v46 = vadd.f32 %v1294_v14, %v4202_v16  ;;  %vm1893_vm15 = vcmp.eq.f32.partialorder %v1892_v20, 8.507059e+37 }
 0x2be   :  { %v1887_v0 = vadd.f32 %v3209_v2, %v1886_v34  ;;  %v3215_v43 = vpop.eup %3214  ;;  %3224 = vrcp.f32 %v4566_v63  ;;  %1242 = vmatmul.bf16.gmra.mxu0 %v1060_v38  ;;  %1331 = vmatmul.bf16.gmra.mxu1 %v1060_v38  ;;  %v1044_v35 = vmax.f32 %v4562_v25, 0.0  ;;  %v1907_v10 = vand.u32 2147483647, %v4564_v58 }
 0x2bf   :  { %v3217_v51 = vpop.eup %3216  ;;  %v4577_v54 = vadd.f32 1.0, %v3215_v43  ;;  %v1909_v59 = vand.u32 2147483648, %v4564_v58  ;;  %v1922_v19 = vand.u32 2147483647, %v4566_v63  ;;  %v2990_v47 = vmul.f32 -1.442695, %v1206_v37 }
 0x2c0   :  { %v4571_v42 = vpop.f32.mrf.mxu0  ;;  %v4573_v33 = vpop.f32.mrf.mxu1  ;;  %v1891_v40 = vsel %vm1890_vm14, %v3209_v2, %v1887_v0  ;;  %v4582_v60 = vadd.f32 1.0, %v3217_v51  ;;  %v4587_v1 = vadd.f32 %v4472_v7, %v1011_v49  ;;  %vm1903_vm0 = vweird.f32 %v4564_v58 }
 0x2c1   :  { %v3219_v45 = vpop.eup %3218  ;;  %v1896_v55 = vsel %vm1893_vm15, %v1895_v44, %v1891_v40  ;;  %3226 = vrcp.f32 %v4577_v54  ;;  %v1924_v52 = vand.u32 2147483648, %v4566_v63  ;;  %v4592_v57 = vmul.f32 -1.442695, %v1295_v46 }
 0x2c2   :  { %v3221_v62 = vpop.eup %3220  ;;  %2577 = vst [vmem:[#allocation2 + $0x98] sm:$0xff] %v1896_v55  ;;  %3228 = vrcp.f32 %v4582_v60  ;;  %vm1918_vm1 = vweird.f32 %v4566_v63  ;;  %v1939_v6 = vand.u32 2147483648, %v4577_v54  ;;  %v4596_v4 = vadd.f32 1.0, %v3219_v45 }
 0x2c3   :  { %v3223_v56 = vpop.eup %3222  ;;  %v4598_v39 = vadd.f32 1.0, %v3221_v62  ;;  %vm4601_vm2 = vcmp.eq.f32.partialorder %v1907_v10, 8.507059e+37  ;;  %v1910_v8 = vor.u32 1.1754944e-38, %v1909_v59  ;;  %v1937_v9 = vand.u32 2147483647, %v4577_v54 }
 0x2c4   :  { %v3225_v48 = vpop.eup %3224  ;;  %v1899_v7 = vmul.f32 %v3223_v56, %v4564_v58  ;;  %v1954_v50 = vand.u32 2147483648, %v4582_v60  ;;  %vm4608_vm3 = vcmp.eq.f32.partialorder %v1922_v19, 8.507059e+37  ;;  %v1952_v21 = vand.u32 2147483647, %v4582_v60 }
 0x2c5   :  { %v1914_v12 = vmul.f32 %v3225_v48, %v4566_v63  ;;  %3230 = vrcp.f32 %v4596_v4  ;;  %vm1904_vm4 = vweird.f32 %v3223_v56  ;;  %v1925_v2 = vor.u32 1.1754944e-38, %v1924_v52 }
 0x2c6   :  { %v1900_v14 = vsub.f32 1.0, %v1899_v7  ;;  %vm1933_vm5 = vweird.f32 %v4577_v54  ;;  %vm1919_vm6 = vweird.f32 %v3225_v48  ;;  %v1940_v22 = vor.u32 1.1754944e-38, %v1939_v6  ;;  %vm1905_vm13 = vmor %vm1903_vm0, %vm1904_vm4 }
 0x2c7   :  { %v3227_v41 = vpop.eup %3226  ;;  %v1915_v18 = vsub.f32 1.0, %v1914_v12  ;;  %vm1948_vm7 = vweird.f32 %v4582_v60  ;;  %3232 = vrcp.f32 %v4598_v39  ;;  %vm4622_vm8 = vcmp.eq.f32.partialorder %v1937_v9, 8.507059e+37  ;;  %vm1920_vm14 = vmor %vm1918_vm1, %vm1919_vm6 }
 0x2c8   :  { %v4614_v5 = vpop.f32.mrf.mxu0  ;;  %v4616_v13 = vpop.f32.mrf.mxu1  ;;  %v1901_v11 = vmul.f32 %v3223_v56, %v1900_v14  ;;  %v1929_v24 = vmul.f32 %v3227_v41, %v4577_v54  ;;  %v1955_v27 = vor.u32 1.1754944e-38, %v1954_v50  ;;  %v1969_v28 = vand.u32 2147483648, %v4596_v4 }
 0x2c9   :  { %v3229_v23 = vpop.eup %3228  ;;  %v1916_v17 = vmul.f32 %v3225_v48, %v1915_v18  ;;  %vm4628_vm9 = vcmp.eq.f32.partialorder %v1952_v21, 8.507059e+37  ;;  %v1967_v53 = vand.u32 2147483647, %v4596_v4  ;;  %v1982_v31 = vand.u32 2147483647, %v4598_v39 }
 0x2ca   :  { %v1944_v32 = vmul.f32 %v3229_v23, %v4582_v60  ;;  %v1902_v29 = vadd.f32 %v3223_v56, %v1901_v11  ;;  %v1930_v36 = vsub.f32 1.0, %v1929_v24  ;;  %vm1934_vm10 = vweird.f32 %v3227_v41 }
 0x2cb   :  { %vm1949_vm11 = vweird.f32 %v3229_v23  ;;  %vm1963_vm12 = vweird.f32 %v4596_v4  ;;  %v3231_v38 = vpop.eup %3230  ;;  %v1917_v26 = vadd.f32 %v3225_v48, %v1916_v17  ;;  %3234 = vpow2.f32 %v2990_v47  ;;  %vm1935_vm0 = vmor %vm1933_vm5, %vm1934_vm10 }
 0x2cc   :  { %v1945_v34 = vsub.f32 1.0, %v1944_v32  ;;  %v1045_v0 = vmax.f32 %v4587_v1, 0.0  ;;  %v1906_v37 = vsel %vm1905_vm13, %v3223_v56, %v1902_v29  ;;  %v1931_v43 = vmul.f32 %v3227_v41, %v1930_v36 }
 0x2cd   :  { %v1959_v44 = vmul.f32 %v3231_v38, %v4596_v4  ;;  %v1970_v46 = vor.u32 1.1754944e-38, %v1969_v28  ;;  %vm1978_vm15 = vweird.f32 %v4598_v39  ;;  %v3233_v49 = vpop.eup %3232  ;;  %v1911_v58 = vsel %vm4601_vm2, %v1910_v8, %v1906_v37  ;;  %vm1950_vm2 = vmor %vm1948_vm7, %vm1949_vm11 }
 0x2ce   :  { %v1921_v51 = vsel %vm1920_vm14, %v3225_v48, %v1917_v26  ;;  %v1946_v40 = vmul.f32 %v3229_v23, %v1945_v34  ;;  %v1984_v45 = vand.u32 2147483648, %v4598_v39  ;;  %2578 = vst [vmem:[#allocation2 + $0xa0] sm:$0xff] %v1911_v58  ;;  %v1932_v59 = vadd.f32 %v3227_v41, %v1931_v43 }
 0x2cf   :  { %v1926_v63 = vsel %vm4608_vm3, %v1925_v2, %v1921_v51  ;;  %v1960_v62 = vsub.f32 1.0, %v1959_v44  ;;  %v1974_v19 = vmul.f32 %v3233_v49, %v4598_v39  ;;  %vm1964_vm1 = vweird.f32 %v3231_v38 }
 0x2d0   :  { %v1213_v55 = vpop.f32.mrf.mxu0  ;;  %v1302_v10 = vpop.f32.mrf.mxu1  ;;  %2579 = vst [vmem:[#allocation2 + $0xa8] sm:$0xff] %v1926_v63  ;;  %v1947_v47 = vadd.f32 %v3229_v23, %v1946_v40  ;;  %3236 = vpow2.f32 %v4592_v57  ;;  %v1061_v1 = vpack.c.bf16 %v1045_v0, %v1044_v35  ;;  %v1936_v52 = vsel %vm1935_vm0, %v3227_v41, %v1932_v59  ;;  %vm1965_vm4 = vmor %vm1963_vm12, %vm1964_vm1 }
 0x2d1   :  { %v1961_v56 = vmul.f32 %v3231_v38, %v1960_v62  ;;  %v1975_v6 = vsub.f32 1.0, %v1974_v19  ;;  %v1209_v48 = vadd.f32 %v4571_v42, %v4200_v15  ;;  %v3235_v7 = vpop.eup %3234  ;;  %v1941_v54 = vsel %vm4622_vm8, %v1940_v22, %v1936_v52 }
 0x2d2   :  { %v1951_v3 = vsel %vm1950_vm2, %v3229_v23, %v1947_v47  ;;  %vm1979_vm3 = vweird.f32 %v3233_v49  ;;  %v1298_v25 = vadd.f32 %v4573_v33, %v4202_v16  ;;  %1247 = vmatmul.bf16.gmra.mxu0 %v1061_v1  ;;  %1336 = vmatmul.bf16.gmra.mxu1 %v1061_v1  ;;  %2580 = vst [vmem:[#allocation2 + $0xb0] sm:$0xff] %v1941_v54  ;;  %v4667_v8 = vadd.f32 1.0, %v3235_v7 }
 0x2d3   :  { %v1956_v35 = vsel %vm4628_vm9, %v1955_v27, %v1951_v3  ;;  %v1962_v60 = vadd.f32 %v3231_v38, %v1961_v56  ;;  %v1976_v57 = vmul.f32 %v3233_v49, %v1975_v6  ;;  %v2992_v42 = vmul.f32 -1.442695, %v1209_v48  ;;  %vm1980_vm6 = vmor %vm1978_vm15, %vm1979_vm3 }
 0x2d4   :  { %2581 = vst [vmem:[#allocation2 + $0xb8] sm:$0xff] %v1956_v35  ;;  %v2993_v9 = vmul.f32 -1.442695, %v1298_v25  ;;  %v1211_v33 = vadd.f32 %v4614_v5, %v4200_v15  ;;  %v1300_v50 = vadd.f32 %v4616_v13, %v4202_v16  ;;  %vm1968_vm5 = vcmp.eq.f32.partialorder %v1967_v53, 8.507059e+37 }
 0x2d5   :  { %v1966_v12 = vsel %vm1965_vm4, %v3231_v38, %v1962_v60  ;;  %v1977_v61 = vadd.f32 %v3233_v49, %v1976_v57  ;;  %3238 = vrcp.f32 %v4667_v8  ;;  %vm1983_vm7 = vcmp.eq.f32.partialorder %v1982_v31, 8.507059e+37 }
 0x2d6   :  { %v3237_v21 = vpop.eup %3236  ;;  %v1971_v14 = vsel %vm1968_vm5, %v1970_v46, %v1966_v12  ;;  %v1985_v4 = vor.u32 1.1754944e-38, %v1984_v45  ;;  %3240 = vpow2.f32 %v2992_v42  ;;  %v2994_v13 = vmul.f32 -1.442695, %v1211_v33 }
 0x2d7   :  { %2582 = vst [vmem:[#allocation2 + $0xc0] sm:$0xff] %v1971_v14  ;;  %v1981_v5 = vsel %vm1980_vm6, %v3233_v49, %v1977_v61  ;;  %v4682_v2 = vadd.f32 1.0, %v3237_v21  ;;  %3242 = vpow2.f32 %v2993_v9  ;;  %v2995_v23 = vmul.f32 -1.442695, %v1300_v50 }
 0x2d8   :  { %v1215_v41 = vpop.f32.mrf.mxu0  ;;  %v1304_v18 = vpop.f32.mrf.mxu1  ;;  %v1986_v22 = vsel %vm1983_vm7, %v1985_v4, %v1981_v5  ;;  %v1997_v11 = vand.u32 2147483647, %v4667_v8  ;;  %v1999_v39 = vand.u32 2147483648, %v4667_v8  ;;  %v1214_v24 = vadd.f32 %v1213_v55, %v4200_v15 }
 0x2d9   :  { %2583 = vst [vmem:[#allocation2 + $0xc8] sm:$0xff] %v1986_v22  ;;  %3244 = vrcp.f32 %v4682_v2  ;;  %v1303_v27 = vadd.f32 %v1302_v10, %v4202_v16  ;;  %vm1993_vm8 = vweird.f32 %v4667_v8  ;;  %v2012_v31 = vand.u32 2147483647, %v4682_v2 }
 0x2da   :  { %3246 = vpow2.f32 %v2994_v13  ;;  %v2996_v32 = vmul.f32 -1.442695, %v1214_v24  ;;  %vm4691_vm9 = vcmp.eq.f32.partialorder %v1997_v11, 8.507059e+37  ;;  %v2014_v29 = vand.u32 2147483648, %v4682_v2 }
 0x2db   :  { %v3239_v20 = vpop.eup %3238  ;;  %3248 = vpow2.f32 %v2995_v23  ;;  %v2000_v26 = vor.u32 1.1754944e-38, %v1999_v39  ;;  %vm2008_vm10 = vweird.f32 %v4682_v2  ;;  %v2997_v37 = vmul.f32 -1.442695, %v1303_v27 }
 0x2dc   :  { %v3241_v28 = vpop.eup %3240  ;;  %v1989_v17 = vmul.f32 %v3239_v20, %v4667_v8  ;;  %3250 = vpow2.f32 %v2996_v32  ;;  %v1216_v43 = vadd.f32 %v1215_v41, %v4200_v15  ;;  %vm1994_vm11 = vweird.f32 %v3239_v20 }
 0x2dd   :  { %v3243_v30 = vpop.eup %3242  ;;  %v4697_v36 = vadd.f32 1.0, %v3241_v28  ;;  %vm4706_vm12 = vcmp.eq.f32.partialorder %v2012_v31, 8.507059e+37  ;;  %v2015_v40 = vor.u32 1.1754944e-38, %v2014_v29  ;;  %v1305_v55 = vadd.f32 %v1304_v18, %v4202_v16  ;;  %vm1995_vm13 = vmor %vm1993_vm8, %vm1994_vm11 }
 0x2de   :  { %v1990_v38 = vsub.f32 1.0, %v1989_v17  ;;  %v4699_v34 = vadd.f32 1.0, %v3243_v30  ;;  %v2998_v25 = vmul.f32 -1.442695, %v1216_v43 }
 0x2df   :  { %v3245_v0 = vpop.eup %3244  ;;  %3252 = vrcp.f32 %v4697_v36  ;;  %v2027_v45 = vand.u32 2147483647, %v4697_v36  ;;  %v2029_v19 = vand.u32 2147483648, %v4697_v36  ;;  %vm2023_vm15 = vweird.f32 %v4697_v36 }
 0x2e0   :  { %v3247_v44 = vpop.eup %3246  ;;  %v1991_v46 = vmul.f32 %v3239_v20, %v1990_v38  ;;  %v2004_v49 = vmul.f32 %v3245_v0, %v4682_v2  ;;  %3254 = vrcp.f32 %v4699_v34  ;;  %v1218_v10 = vpop.f32.mrf.mxu0  ;;  %vm2009_vm14 = vweird.f32 %v3245_v0 }
 0x2e1   :  { %v3249_v58 = vpop.eup %3248  ;;  %v4712_v63 = vpop.f32.mrf.mxu1  ;;  %v4715_v47 = vadd.f32 1.0, %v3247_v44  ;;  %v2042_v1 = vand.u32 2147483647, %v4699_v34  ;;  %3256 = vpow2.f32 %v2997_v37  ;;  %v2044_v7 = vand.u32 2147483648, %v4699_v34  ;;  %vm2010_vm1 = vmor %vm2008_vm10, %vm2009_vm14 }
 0x2e2   :  { %v1992_v59 = vadd.f32 %v3239_v20, %v1991_v46  ;;  %v2005_v62 = vsub.f32 1.0, %v2004_v49  ;;  %v4720_v52 = vadd.f32 1.0, %v3249_v58  ;;  %v3251_v56 = vpop.eup %3250  ;;  %v4727_v35 = vmul.f32 -1.442695, %v1305_v55 }
 0x2e3   :  { %3258 = vrcp.f32 %v4715_v47  ;;  %vm4730_vm0 = vcmp.eq.f32.partialorder %v2027_v45, 8.507059e+37  ;;  %v2030_v9 = vor.u32 1.1754944e-38, %v2029_v19  ;;  %vm2038_vm2 = vweird.f32 %v4699_v34 }
 0x2e4   :  { %v1996_v6 = vsel %vm1995_vm13, %v3239_v20, %v1992_v59  ;;  %v2006_v48 = vmul.f32 %v3245_v0, %v2005_v62  ;;  %3260 = vrcp.f32 %v4720_v52  ;;  %vm4740_vm3 = vcmp.eq.f32.partialorder %v2042_v1, 8.507059e+37 }
 0x2e5   :  { %v3253_v54 = vpop.eup %3252  ;;  %v2001_v3 = vsel %vm4691_vm9, %v2000_v26, %v1996_v6  ;;  %v2045_v21 = vor.u32 1.1754944e-38, %v2044_v7  ;;  %v1219_v14 = vadd.f32 %v1218_v10, %v4200_v15  ;;  %v2057_v13 = vand.u32 2147483647, %v4715_v47 }
 0x2e6   :  { %v3255_v60 = vpop.eup %3254  ;;  %2584 = vst [vmem:[#allocation2 + $0xd0] sm:$0xff] %v2001_v3  ;;  %v2007_v57 = vadd.f32 %v3245_v0, %v2006_v48  ;;  %v2019_v8 = vmul.f32 %v3253_v54, %v4697_v36  ;;  %v4748_v41 = vadd.f32 1.0, %v3251_v56  ;;  %vm2024_vm4 = vweird.f32 %v3253_v54 }
 0x2e7   :  { %v2034_v33 = vmul.f32 %v3255_v60, %v4699_v34  ;;  %v3257_v4 = vpop.eup %3256  ;;  %3262 = vpow2.f32 %v2998_v25  ;;  %vm2039_vm5 = vweird.f32 %v3255_v60  ;;  %vm2053_vm6 = vweird.f32 %v4715_v47  ;;  %vm2025_vm7 = vmor %vm2023_vm15, %vm2024_vm4 }
 0x2e8   :  { %v2011_v12 = vsel %vm2010_vm1, %v3245_v0, %v2007_v57  ;;  %v2020_v61 = vsub.f32 1.0, %v2019_v8  ;;  %v4750_v23 = vadd.f32 1.0, %v3257_v4  ;;  %v4754_v24 = vpop.f32.mrf.mxu0  ;;  %v2059_v17 = vand.u32 2147483648, %v4715_v47  ;;  %vm2040_vm9 = vmor %vm2038_vm2, %vm2039_vm5 }
 0x2e9   :  { %v2016_v5 = vsel %vm4706_vm12, %v2015_v40, %v2011_v12  ;;  %v2035_v2 = vsub.f32 1.0, %v2034_v33  ;;  %v3259_v18 = vpop.eup %3258  ;;  %v4756_v20 = vpop.f32.mrf.mxu1  ;;  %v2072_v32 = vand.u32 2147483647, %v4720_v52  ;;  %3264 = vrcp.f32 %v4748_v41 }
 0x2ea   :  { %2585 = vst [vmem:[#allocation2 + $0xd8] sm:$0xff] %v2016_v5  ;;  %v2021_v22 = vmul.f32 %v3253_v54, %v2020_v61  ;;  %v2049_v39 = vmul.f32 %v3259_v18, %v4715_v47  ;;  %v3261_v27 = vpop.eup %3260  ;;  %vm4763_vm8 = vcmp.eq.f32.partialorder %v2057_v13, 8.507059e+37  ;;  %vm2054_vm10 = vweird.f32 %v3259_v18 }
 0x2eb   :  { %v2036_v11 = vmul.f32 %v3255_v60, %v2035_v2  ;;  %v2064_v29 = vmul.f32 %v3261_v27, %v4720_v52  ;;  %v2074_v26 = vand.u32 2147483648, %v4720_v52  ;;  %3266 = vrcp.f32 %v4750_v23  ;;  %vm2055_vm14 = vmor %vm2053_vm6, %vm2054_vm10 }
 0x2ec   :  { %v2022_v28 = vadd.f32 %v3253_v54, %v2021_v22  ;;  %v2050_v53 = vsub.f32 1.0, %v2049_v39  ;;  %v2060_v49 = vor.u32 1.1754944e-38, %v2059_v17  ;;  %vm2068_vm11 = vweird.f32 %v4720_v52 }
 0x2ed   :  { %v2037_v30 = vadd.f32 %v3255_v60, %v2036_v11  ;;  %v2065_v43 = vsub.f32 1.0, %v2064_v29  ;;  %v3263_v44 = vpop.eup %3262  ;;  %vm4778_vm12 = vcmp.eq.f32.partialorder %v2072_v32, 8.507059e+37  ;;  %vm2069_vm13 = vweird.f32 %v3261_v27 }
 0x2ee   :  { %v2026_v38 = vsel %vm2025_vm7, %v3253_v54, %v2022_v28  ;;  %v2051_v37 = vmul.f32 %v3259_v18, %v2050_v53  ;;  %v4782_v40 = vadd.f32 1.0, %v3263_v44  ;;  %v2075_v55 = vor.u32 1.1754944e-38, %v2074_v26 }
 0x2ef   :  { %v2031_v36 = vsel %vm4730_vm0, %v2030_v9, %v2026_v38  ;;  %v2041_v0 = vsel %vm2040_vm9, %v3255_v60, %v2037_v30  ;;  %v2066_v51 = vmul.f32 %v3261_v27, %v2065_v43  ;;  %v3265_v45 = vpop.eup %3264  ;;  %vm2083_vm15 = vweird.f32 %v4748_v41  ;;  %vm2070_vm0 = vmor %vm2068_vm11, %vm2069_vm13 }
 0x2f0   :  { %2586 = vst [vmem:[#allocation2 + $0xe0] sm:$0xff] %v2031_v36  ;;  %v2046_v46 = vsel %vm4740_vm3, %v2045_v21, %v2041_v0  ;;  %v2052_v58 = vadd.f32 %v3259_v18, %v2051_v37  ;;  %3268 = vpow2.f32 %v4727_v35  ;;  %v3000_v10 = vmul.f32 -1.442695, %v1219_v14 }
 0x2f1   :  { %2587 = vst [vmem:[#allocation2 + $0xe8] sm:$0xff] %v2046_v46  ;;  %v2067_v62 = vadd.f32 %v3261_v27, %v2066_v51  ;;  %v2079_v19 = vmul.f32 %v3265_v45, %v4748_v41  ;;  %v1308_v1 = vadd.f32 %v4712_v63, %v4202_v16  ;;  %v3267_v56 = vpop.eup %3266  ;;  %v2087_v47 = vand.u32 2147483647, %v4748_v41 }
 0x2f2   :  { %v2056_v59 = vsel %vm2055_vm14, %v3259_v18, %v2052_v58  ;;  %v2089_v48 = vand.u32 2147483648, %v4748_v41  ;;  %3270 = vrcp.f32 %v4782_v40  ;;  %v2094_v3 = vmul.f32 %v3267_v56, %v4750_v23 }
 0x2f3   :  { %v2061_v6 = vsel %vm4763_vm8, %v2060_v49, %v2056_v59  ;;  %v2071_v7 = vsel %vm2070_vm0, %v3261_v27, %v2067_v62  ;;  %v2080_v54 = vsub.f32 1.0, %v2079_v19  ;;  %v2102_v63 = vand.u32 2147483647, %v4750_v23  ;;  %v1223_v25 = vpop.f32.mrf.mxu0  ;;  %v1312_v35 = vpop.f32.mrf.mxu1 }
 0x2f4   :  { %2588 = vst [vmem:[#allocation2 + $0xf0] sm:$0xff] %v2061_v6  ;;  %v2076_v60 = vsel %vm4778_vm12, %v2075_v55, %v2071_v7  ;;  %vm2084_vm1 = vweird.f32 %v3265_v45  ;;  %v2104_v52 = vand.u32 2147483648, %v4750_v23  ;;  %3272 = vpow2.f32 %v3000_v10 }
 0x2f5   :  { %2589 = vst [vmem:[#allocation2 + $0xf8] sm:$0xff] %v2076_v60  ;;  %v2081_v57 = vmul.f32 %v3265_v45, %v2080_v54  ;;  %v2095_v8 = vsub.f32 1.0, %v2094_v3  ;;  %v3001_v42 = vmul.f32 -1.442695, %v1308_v1  ;;  %v1221_v9 = vadd.f32 %v4754_v24, %v4200_v15  ;;  %vm2085_vm4 = vmor %vm2083_vm15, %vm2084_vm1 }
 0x2f6   :  { %v3269_v33 = vpop.eup %3268  ;;  %vm4806_vm2 = vcmp.eq.f32.partialorder %v2087_v47, 8.507059e+37  ;;  %vm2099_vm3 = vweird.f32 %v3267_v56  ;;  %v1310_v12 = vadd.f32 %v4756_v20, %v4202_v16  ;;  %v1224_v61 = vadd.f32 %v1223_v25, %v4200_v15 }
 0x2f7   :  { %v2082_v21 = vadd.f32 %v3265_v45, %v2081_v57  ;;  %v2096_v14 = vmul.f32 %v3267_v56, %v2095_v8  ;;  %v4813_v4 = vadd.f32 1.0, %v3269_v33  ;;  %3274 = vpow2.f32 %v3001_v42 }
 0x2f8   :  { %v3271_v5 = vpop.eup %3270  ;;  %v2090_v2 = vor.u32 1.1754944e-38, %v2089_v48  ;;  %vm2098_vm5 = vweird.f32 %v4750_v23  ;;  %vm4819_vm6 = vcmp.eq.f32.partialorder %v2102_v63, 8.507059e+37  ;;  %v3002_v18 = vmul.f32 -1.442695, %v1221_v9 }
 0x2f9   :  { %v2086_v22 = vsel %vm2085_vm4, %v3265_v45, %v2082_v21  ;;  %v2097_v11 = vadd.f32 %v3267_v56, %v2096_v14  ;;  %v2105_v39 = vor.u32 1.1754944e-38, %v2104_v52  ;;  %v2109_v24 = vmul.f32 %v3271_v5, %v4782_v40  ;;  %vm2100_vm7 = vmor %vm2098_vm5, %vm2099_vm3 }
 0x2fa   :  { %v3273_v20 = vpop.eup %3272  ;;  %v2091_v27 = vsel %vm4806_vm2, %v2090_v2, %v2086_v22  ;;  %3276 = vrcp.f32 %v4813_v4  ;;  %v3003_v41 = vmul.f32 -1.442695, %v1310_v12  ;;  %v3004_v23 = vmul.f32 -1.442695, %v1224_v61 }
 0x2fb   :  { %2590 = vst [vmem:[#allocation2 + $0x100] sm:$0xff] %v2091_v27  ;;  %v2101_v28 = vsel %vm2100_vm7, %v3267_v56, %v2097_v11  ;;  %v2110_v17 = vsub.f32 1.0, %v2109_v24  ;;  %v4828_v32 = vadd.f32 1.0, %v3273_v20  ;;  %v1313_v30 = vadd.f32 %v1312_v35, %v4202_v16  ;;  %v1225_v53 = vpop.f32.mrf.mxu0  ;;  %v1314_v31 = vpop.f32.mrf.mxu1 }
 0x2fc   :  { %v2106_v29 = vsel %vm4819_vm6, %v2105_v39, %v2101_v28  ;;  %v2117_v38 = vand.u32 2147483647, %v4782_v40  ;;  %v2119_v26 = vand.u32 2147483648, %v4782_v40  ;;  %3278 = vpow2.f32 %v3002_v18 }
 0x2fd   :  { %v3275_v36 = vpop.eup %3274  ;;  %2591 = vst [vmem:[#allocation2 + $0x108] sm:$0xff] %v2106_v29  ;;  %v2111_v0 = vmul.f32 %v3271_v5, %v2110_v17  ;;  %vm2114_vm8 = vweird.f32 %v3271_v5  ;;  %v2132_v37 = vand.u32 2147483647, %v4813_v4  ;;  %3280 = vrcp.f32 %v4828_v32 }
 0x2fe   :  { %vm2113_vm9 = vweird.f32 %v4782_v40  ;;  %v2134_v43 = vand.u32 2147483648, %v4813_v4  ;;  %v4839_v44 = vadd.f32 1.0, %v3275_v36  ;;  %3282 = vpow2.f32 %v3003_v41 }
 0x2ff   :  { %v2112_v46 = vadd.f32 %v3271_v5, %v2111_v0  ;;  %3284 = vpow2.f32 %v3004_v23  ;;  %v3005_v49 = vmul.f32 -1.442695, %v1313_v30  ;;  %v1226_v34 = vadd.f32 %v1225_v53, %v4200_v15  ;;  %vm2115_vm10 = vmor %vm2113_vm9, %vm2114_vm8 }
 0x300   :  { %v3277_v58 = vpop.eup %3276  ;;  %vm2118_vm11 = vcmp.eq.f32.partialorder %v2117_v38, 8.507059e+37  ;;  %v2120_v51 = vor.u32 1.1754944e-38, %v2119_v26  ;;  %v2147_v45 = vand.u32 2147483647, %v4828_v32  ;;  %3286 = vrcp.f32 %v4839_v44 }
 0x301   :  { %v2116_v55 = vsel %vm2115_vm10, %v3271_v5, %v2112_v46  ;;  %v2124_v40 = vmul.f32 %v3277_v58, %v4813_v4  ;;  %vm2128_vm12 = vweird.f32 %v4813_v4  ;;  %vm4846_vm13 = vcmp.eq.f32.partialorder %v2132_v37, 8.507059e+37 }
 0x302   :  { %v3279_v59 = vpop.eup %3278  ;;  %v2121_v62 = vsel %vm2118_vm11, %v2120_v51, %v2116_v55  ;;  %v2135_v19 = vor.u32 1.1754944e-38, %v2134_v43  ;;  %v2149_v1 = vand.u32 2147483648, %v4828_v32  ;;  %v3006_v56 = vmul.f32 -1.442695, %v1226_v34 }
 0x303   :  { %v3281_v6 = vpop.eup %3280  ;;  %2592 = vst [vmem:[#allocation2 + $0x110] sm:$0xff] %v2121_v62  ;;  %v2125_v47 = vsub.f32 1.0, %v2124_v40  ;;  %vm2143_vm14 = vweird.f32 %v4828_v32  ;;  %v4852_v48 = vadd.f32 1.0, %v3279_v59  ;;  %3288 = vpow2.f32 %v3005_v49  ;;  %v4854_v7 = vpop.f32.mrf.mxu0 }
 0x304   :  { %v4856_v54 = vpop.f32.mrf.mxu1  ;;  %v3283_v3 = vpop.eup %3282  ;;  %v2139_v63 = vmul.f32 %v3281_v6, %v4828_v32  ;;  %vm4859_vm15 = vcmp.eq.f32.partialorder %v2147_v45, 8.507059e+37  ;;  %3290 = vpow2.f32 %v3006_v56  ;;  %v1315_v35 = vadd.f32 %v1314_v31, %v4202_v16 }
 0x305   :  { %v3285_v60 = vpop.eup %3284  ;;  %v2126_v52 = vmul.f32 %v3277_v58, %v2125_v47  ;;  %vm2129_vm0 = vweird.f32 %v3277_v58  ;;  %v2162_v57 = vand.u32 2147483647, %v4839_v44  ;;  %3292 = vrcp.f32 %v4852_v48 }
 0x306   :  { %v3287_v8 = vpop.eup %3286  ;;  %v2140_v42 = vsub.f32 1.0, %v2139_v63  ;;  %v2150_v9 = vor.u32 1.1754944e-38, %v2149_v1  ;;  %v4866_v33 = vadd.f32 1.0, %v3283_v3  ;;  %v4868_v50 = vadd.f32 1.0, %v3285_v60  ;;  %vm2130_vm2 = vmor %vm2128_vm12, %vm2129_vm0 }
 0x307   :  { %v2127_v12 = vadd.f32 %v3277_v58, %v2126_v52  ;;  %vm2144_vm1 = vweird.f32 %v3281_v6  ;;  %v2154_v61 = vmul.f32 %v3287_v8, %v4839_v44  ;;  %v2164_v21 = vand.u32 2147483648, %v4839_v44 }
 0x308   :  { %v2141_v14 = vmul.f32 %v3281_v6, %v2140_v42  ;;  %v2177_v5 = vand.u32 2147483647, %v4852_v48  ;;  %v2179_v2 = vand.u32 2147483648, %v4852_v48  ;;  %3294 = vrcp.f32 %v4866_v33  ;;  %vm2145_vm5 = vmor %vm2143_vm14, %vm2144_vm1 }
 0x309   :  { %v3289_v13 = vpop.eup %3288  ;;  %v2131_v18 = vsel %vm2130_vm2, %v3277_v58, %v2127_v12  ;;  %v2155_v22 = vsub.f32 1.0, %v2154_v61  ;;  %vm2158_vm3 = vweird.f32 %v4839_v44  ;;  %vm4878_vm4 = vcmp.eq.f32.partialorder %v2162_v57, 8.507059e+37 }
 0x30a   :  { %v3291_v39 = vpop.eup %3290  ;;  %v2136_v4 = vsel %vm4846_vm13, %v2135_v19, %v2131_v18  ;;  %v2142_v24 = vadd.f32 %v3281_v6, %v2141_v14  ;;  %3296 = vrcp.f32 %v4868_v50  ;;  %v3007_v20 = vmul.f32 -1.442695, %v1315_v35 }
 0x30b   :  { %v3293_v27 = vpop.eup %3292  ;;  %2593 = vst [vmem:[#allocation2 + $0x118] sm:$0xff] %v2136_v4  ;;  %v2156_v41 = vmul.f32 %v3287_v8, %v2155_v22  ;;  %vm2159_vm6 = vweird.f32 %v3287_v8  ;;  %v2165_v23 = vor.u32 1.1754944e-38, %v2164_v21  ;;  %vm2173_vm7 = vweird.f32 %v4852_v48  ;;  %v4889_v28 = vpop.f32.mrf.mxu0 }
 0x30c   :  { %v2146_v17 = vsel %vm2145_vm5, %v3281_v6, %v2142_v24  ;;  %v2169_v30 = vmul.f32 %v3293_v27, %v4852_v48  ;;  %vm4892_vm8 = vcmp.eq.f32.partialorder %v2177_v5, 8.507059e+37  ;;  %v2180_v31 = vor.u32 1.1754944e-38, %v2179_v2  ;;  %v4897_v38 = vpop.f32.mrf.mxu1  ;;  %vm2160_vm9 = vmor %vm2158_vm3, %vm2159_vm6 }
 0x30d   :  { %v2192_v29 = vand.u32 2147483647, %v4866_v33  ;;  %v2151_v32 = vsel %vm4859_vm15, %v2150_v9, %v2146_v17  ;;  %v2157_v26 = vadd.f32 %v3287_v8, %v2156_v41  ;;  %v2194_v36 = vand.u32 2147483648, %v4866_v33 }
 0x30e   :  { %v4902_v0 = vadd.f32 1.0, %v3289_v13  ;;  %v3295_v37 = vpop.eup %3294  ;;  %2594 = vst [vmem:[#allocation2 + $0x120] sm:$0xff] %v2151_v32  ;;  %v2170_v43 = vsub.f32 1.0, %v2169_v30  ;;  %v2207_v46 = vand.u32 2147483647, %v4868_v50  ;;  %v4908_v49 = vadd.f32 1.0, %v3291_v39 }
 0x30f   :  { %3298 = vpow2.f32 %v3007_v20  ;;  %v2161_v34 = vsel %vm2160_vm9, %v3287_v8, %v2157_v26  ;;  %v2184_v58 = vmul.f32 %v3295_v37, %v4866_v33  ;;  %v2209_v51 = vand.u32 2147483648, %v4868_v50 }
 0x310   :  { %3300 = vrcp.f32 %v4902_v0  ;;  %v3297_v45 = vpop.eup %3296  ;;  %v2166_v55 = vsel %vm4878_vm4, %v2165_v23, %v2161_v34  ;;  %v2171_v40 = vmul.f32 %v3293_v27, %v2170_v43  ;;  %vm2174_vm10 = vweird.f32 %v3293_v27 }
 0x311   :  { %vm2188_vm11 = vweird.f32 %v4866_v33  ;;  %2595 = vst [vmem:[#allocation2 + $0x128] sm:$0xff] %v2166_v55  ;;  %v2185_v44 = vsub.f32 1.0, %v2184_v58  ;;  %vm4916_vm12 = vcmp.eq.f32.partialorder %v2192_v29, 8.507059e+37  ;;  %v2199_v59 = vmul.f32 %v3297_v45, %v4868_v50  ;;  %vm2175_vm15 = vmor %vm2173_vm7, %vm2174_vm10 }
 0x312   :  { %vm2203_vm13 = vweird.f32 %v4868_v50  ;;  %v2172_v62 = vadd.f32 %v3293_v27, %v2171_v40  ;;  %v2195_v19 = vor.u32 1.1754944e-38, %v2194_v36  ;;  %vm4922_vm14 = vcmp.eq.f32.partialorder %v2207_v46, 8.507059e+37 }
 0x313   :  { %3302 = vrcp.f32 %v4908_v49  ;;  %v2186_v56 = vmul.f32 %v3295_v37, %v2185_v44  ;;  %vm2189_vm0 = vweird.f32 %v3295_v37  ;;  %v2200_v6 = vsub.f32 1.0, %v2199_v59 }
 0x314   :  { %v2210_v47 = vor.u32 1.1754944e-38, %v2209_v51  ;;  %v2176_v63 = vsel %vm2175_vm15, %v3293_v27, %v2172_v62  ;;  %v2222_v25 = vand.u32 2147483647, %v4902_v0  ;;  %v1229_v35 = vadd.f32 %v4854_v7, %v4200_v15  ;;  %v1233_v52 = vpop.f32.mrf.mxu0  ;;  %vm2190_vm2 = vmor %vm2188_vm11, %vm2189_vm0  ;;  %v1322_v12 = vpop.f32.mrf.mxu1 }
 0x315   :  { %v3299_v3 = vpop.eup %3298  ;;  %v1318_v60 = vadd.f32 %v4856_v54, %v4202_v16  ;;  %v2181_v48 = vsel %vm4892_vm8, %v2180_v31, %v2176_v63  ;;  %v2187_v8 = vadd.f32 %v3295_v37, %v2186_v56  ;;  %v2201_v42 = vmul.f32 %v3297_v45, %v2200_v6 }
 0x316   :  { %v3301_v57 = vpop.eup %3300  ;;  %vm2204_vm1 = vweird.f32 %v3297_v45  ;;  %2596 = vst [vmem:[#allocation2 + $0x130] sm:$0xff] %v2181_v48  ;;  %vm2218_vm3 = vweird.f32 %v4902_v0  ;;  %v2224_v7 = vand.u32 2147483648, %v4902_v0  ;;  %v4942_v54 = vadd.f32 1.0, %v3299_v3 }
 0x317   :  { %v2214_v9 = vmul.f32 %v3301_v57, %v4902_v0  ;;  %v2191_v61 = vsel %vm2190_vm2, %v3295_v37, %v2187_v8  ;;  %v2202_v21 = vadd.f32 %v3297_v45, %v2201_v42  ;;  %v3008_v14 = vmul.f32 -1.442695, %v1229_v35  ;;  %vm2205_vm4 = vmor %vm2203_vm13, %vm2204_vm1 }
 0x318   :  { %v3009_v5 = vmul.f32 -1.442695, %v1318_v60  ;;  %v2196_v13 = vsel %vm4916_vm12, %v2195_v19, %v2191_v61  ;;  %vm4948_vm5 = vcmp.eq.f32.partialorder %v2222_v25, 8.507059e+37  ;;  %3304 = vrcp.f32 %v4942_v54 }
 0x319   :  { %v3303_v2 = vpop.eup %3302  ;;  %v2215_v33 = vsub.f32 1.0, %v2214_v9  ;;  %2597 = vst [vmem:[#allocation2 + $0x138] sm:$0xff] %v2196_v13  ;;  %v2206_v22 = vsel %vm2205_vm4, %v3297_v45, %v2202_v21  ;;  %vm2233_vm6 = vweird.f32 %v4908_v49  ;;  %v2237_v39 = vand.u32 2147483647, %v4908_v49 }
 0x31a   :  { %v2229_v11 = vmul.f32 %v3303_v2, %v4908_v49  ;;  %v2211_v4 = vsel %vm4922_vm14, %v2210_v47, %v2206_v22  ;;  %vm2219_vm7 = vweird.f32 %v3301_v57  ;;  %3306 = vpow2.f32 %v3008_v14 }
 0x31b   :  { %v2216_v50 = vmul.f32 %v3301_v57, %v2215_v33  ;;  %2598 = vst [vmem:[#allocation2 + $0x140] sm:$0xff] %v2211_v4  ;;  %v2225_v24 = vor.u32 1.1754944e-38, %v2224_v7  ;;  %3308 = vpow2.f32 %v3009_v5  ;;  %v1231_v27 = vadd.f32 %v4889_v28, %v4200_v15  ;;  %vm2220_vm8 = vmor %vm2218_vm3, %vm2219_vm7 }
 0x31c   :  { %v2230_v20 = vsub.f32 1.0, %v2229_v11  ;;  %v2239_v23 = vand.u32 2147483648, %v4908_v49  ;;  %v1320_v17 = vadd.f32 %v4897_v38, %v4202_v16  ;;  %v1234_v30 = vadd.f32 %v1233_v52, %v4200_v15  ;;  %v1235_v53 = vpop.f32.mrf.mxu0  ;;  %v1324_v40 = vpop.f32.mrf.mxu1 }
 0x31d   :  { %v2217_v41 = vadd.f32 %v3301_v57, %v2216_v50  ;;  %vm2234_vm9 = vweird.f32 %v3303_v2  ;;  %v3010_v29 = vmul.f32 -1.442695, %v1231_v27  ;;  %v1323_v32 = vadd.f32 %v1322_v12, %v4202_v16 }
 0x31e   :  { %v2231_v31 = vmul.f32 %v3303_v2, %v2230_v20  ;;  %v3305_v26 = vpop.eup %3304  ;;  %vm4967_vm10 = vcmp.eq.f32.partialorder %v2237_v39, 8.507059e+37  ;;  %v3011_v37 = vmul.f32 -1.442695, %v1320_v17  ;;  %v3012_v43 = vmul.f32 -1.442695, %v1234_v30  ;;  %vm2235_vm11 = vmor %vm2233_vm6, %vm2234_vm9 }
 0x31f   :  { %v2221_v36 = vsel %vm2220_vm8, %v3301_v57, %v2217_v41  ;;  %v2244_v0 = vmul.f32 %v3305_v26, %v4942_v54  ;;  %v1236_v34 = vadd.f32 %v1235_v53, %v4200_v15  ;;  %v2240_v51 = vor.u32 1.1754944e-38, %v2239_v23 }
 0x320   :  { %v2226_v38 = vsel %vm4948_vm5, %v2225_v24, %v2221_v36  ;;  %v2232_v46 = vadd.f32 %v3303_v2, %v2231_v31  ;;  %v3307_v58 = vpop.eup %3306  ;;  %v2252_v45 = vand.u32 2147483647, %v4942_v54  ;;  %3310 = vpow2.f32 %v3010_v29 }
 0x321   :  { %2599 = vst [vmem:[#allocation2 + $0x148] sm:$0xff] %v2226_v38  ;;  %v3013_v55 = vmul.f32 -1.442695, %v1323_v32  ;;  %v3309_v44 = vpop.eup %3308  ;;  %v2245_v59 = vsub.f32 1.0, %v2244_v0  ;;  %v4978_v62 = vadd.f32 1.0, %v3307_v58  ;;  %3312 = vpow2.f32 %v3011_v37 }
 0x322   :  { %v2236_v10 = vsel %vm2235_vm11, %v3303_v2, %v2232_v46  ;;  %v2254_v1 = vand.u32 2147483648, %v4942_v54  ;;  %v4983_v56 = vadd.f32 1.0, %v3309_v44  ;;  %3314 = vpow2.f32 %v3012_v43 }
 0x323   :  { %v2241_v19 = vsel %vm4967_vm10, %v2240_v51, %v2236_v10  ;;  %v2246_v49 = vmul.f32 %v3305_v26, %v2245_v59  ;;  %vm2249_vm12 = vweird.f32 %v3305_v26  ;;  %3316 = vrcp.f32 %v4978_v62 }
 0x324   :  { %2600 = vst [vmem:[#allocation2 + $0x150] sm:$0xff] %v2241_v19  ;;  %v3014_v6 = vmul.f32 -1.442695, %v1236_v34  ;;  %3318 = vrcp.f32 %v4983_v56  ;;  %vm2248_vm13 = vweird.f32 %v4942_v54  ;;  %v1325_v3 = vadd.f32 %v1324_v40, %v4202_v16 }
 0x325   :  { %v2247_v47 = vadd.f32 %v3305_v26, %v2246_v49  ;;  %3320 = vpow2.f32 %v3013_v55  ;;  %vm2250_vm14 = vmor %vm2248_vm13, %vm2249_vm12  ;;  %vm2253_vm15 = vcmp.eq.f32.partialorder %v2252_v45, 8.507059e+37  ;;  %v2255_v25 = vor.u32 1.1754944e-38, %v2254_v1 }
 0x326   :  { %v3311_v63 = vpop.eup %3310  ;;  %v2267_v35 = vand.u32 2147483647, %v4978_v62  ;;  %v2269_v60 = vand.u32 2147483648, %v4978_v62  ;;  %v2282_v48 = vand.u32 2147483647, %v4983_v56  ;;  %3322 = vpow2.f32 %v3014_v6 }
 0x327   :  { %v3313_v52 = vpop.eup %3312  ;;  %v2251_v57 = vsel %vm2250_vm14, %v3305_v26, %v2247_v47  ;;  %v4992_v8 = vadd.f32 1.0, %v3311_v63  ;;  %v2284_v7 = vand.u32 2147483648, %v4983_v56  ;;  %vm2263_vm0 = vweird.f32 %v4978_v62 }
 0x328   :  { %v3315_v42 = vpop.eup %3314  ;;  %v2256_v9 = vsel %vm2253_vm15, %v2255_v25, %v2251_v57  ;;  %v4995_v54 = vadd.f32 1.0, %v3313_v52  ;;  %v3015_v61 = vmul.f32 -1.442695, %v1325_v3  ;;  %vm5000_vm1 = vcmp.eq.f32.partialorder %v2267_v35, 8.507059e+37 }
 0x329   :  { %v3317_v12 = vpop.eup %3316  ;;  %2601 = vst [vmem:[#allocation2 + $0x158] sm:$0xff] %v2256_v9  ;;  %3324 = vrcp.f32 %v4992_v8  ;;  %vm2278_vm2 = vweird.f32 %v4983_v56  ;;  %v2270_v18 = vor.u32 1.1754944e-38, %v2269_v60  ;;  %vm5009_vm3 = vcmp.eq.f32.partialorder %v2282_v48, 8.507059e+37 }
 0x32a   :  { %v3319_v21 = vpop.eup %3318  ;;  %v2259_v14 = vmul.f32 %v3317_v12, %v4978_v62  ;;  %3326 = vrcp.f32 %v4995_v54  ;;  %v2299_v39 = vand.u32 2147483648, %v4992_v8  ;;  %v2285_v50 = vor.u32 1.1754944e-38, %v2284_v7 }
 0x32b   :  { %v1238_v2 = vpop.f32.mrf.mxu0  ;;  %v5006_v13 = vpop.f32.mrf.mxu1  ;;  %v2274_v22 = vmul.f32 %v3319_v21, %v4983_v56  ;;  %v2297_v24 = vand.u32 2147483647, %v4992_v8  ;;  %v5015_v20 = vadd.f32 1.0, %v3315_v42  ;;  %v2312_v23 = vand.u32 2147483647, %v4995_v54 }
 0x32c   :  { %v3321_v33 = vpop.eup %3320  ;;  %v2260_v4 = vsub.f32 1.0, %v2259_v14  ;;  %3328 = vpow2.f32 %v3015_v61  ;;  %vm2264_vm4 = vweird.f32 %v3317_v12  ;;  %vm2293_vm5 = vweird.f32 %v4992_v8 }
 0x32d   :  { %v3323_v27 = vpop.eup %3322  ;;  %v2275_v41 = vsub.f32 1.0, %v2274_v22  ;;  %v5018_v17 = vadd.f32 1.0, %v3321_v33  ;;  %v2314_v53 = vand.u32 2147483648, %v4995_v54  ;;  %3330 = vrcp.f32 %v5015_v20  ;;  %vm2265_vm9 = vmor %vm2263_vm0, %vm2264_vm4 }
 0x32e   :  { %v2261_v30 = vmul.f32 %v3317_v12, %v2260_v4  ;;  %vm2279_vm6 = vweird.f32 %v3319_v21  ;;  %v2300_v32 = vor.u32 1.1754944e-38, %v2299_v39  ;;  %vm2308_vm7 = vweird.f32 %v4995_v54 }
 0x32f   :  { %v3325_v31 = vpop.eup %3324  ;;  %v2276_v29 = vmul.f32 %v3319_v21, %v2275_v41  ;;  %vm5025_vm8 = vcmp.eq.f32.partialorder %v2297_v24, 8.507059e+37  ;;  %3332 = vrcp.f32 %v5018_v17  ;;  %v5030_v43 = vadd.f32 1.0, %v3323_v27  ;;  %vm2280_vm11 = vmor %vm2278_vm2, %vm2279_vm6 }
 0x330   :  { %v3327_v26 = vpop.eup %3326  ;;  %v2262_v36 = vadd.f32 %v3317_v12, %v2261_v30  ;;  %v2289_v28 = vmul.f32 %v3325_v31, %v4992_v8  ;;  %vm5036_vm10 = vcmp.eq.f32.partialorder %v2312_v23, 8.507059e+37  ;;  %v1239_v34 = vadd.f32 %v1238_v2, %v4200_v15 }
 0x331   :  { %v2277_v38 = vadd.f32 %v3319_v21, %v2276_v29  ;;  %v2304_v46 = vmul.f32 %v3327_v26, %v4995_v54  ;;  %v2315_v45 = vor.u32 1.1754944e-38, %v2314_v53  ;;  %v2327_v55 = vand.u32 2147483647, %v5015_v20 }
 0x332   :  { %v2266_v58 = vsel %vm2265_vm9, %v3317_v12, %v2262_v36  ;;  %v2290_v51 = vsub.f32 1.0, %v2289_v28  ;;  %v3329_v10 = vpop.eup %3328  ;;  %v2329_v1 = vand.u32 2147483648, %v5015_v20  ;;  %vm2294_vm12 = vweird.f32 %v3325_v31 }
 0x333   :  { %v1240_v40 = vpop.f32.mrf.mxu0  ;;  %v5045_v44 = vpop.f32.mrf.mxu1  ;;  %v2271_v59 = vsel %vm5000_vm1, %v2270_v18, %v2266_v58  ;;  %v2281_v62 = vsel %vm2280_vm11, %v3319_v21, %v2277_v38  ;;  %v2305_v19 = vsub.f32 1.0, %v2304_v46  ;;  %3334 = vrcp.f32 %v5030_v43  ;;  %vm2295_vm0 = vmor %vm2293_vm5, %vm2294_vm12 }
 0x334   :  { %v3331_v49 = vpop.eup %3330  ;;  %2602 = vst [vmem:[#allocation2 + $0x160] sm:$0xff] %v2271_v59  ;;  %v2286_v56 = vsel %vm5009_vm3, %v2285_v50, %v2281_v62  ;;  %v2291_v6 = vmul.f32 %v3325_v31, %v2290_v51  ;;  %vm2309_vm13 = vweird.f32 %v3327_v26  ;;  %vm2323_vm14 = vweird.f32 %v5015_v20 }
 0x335   :  { %2603 = vst [vmem:[#allocation2 + $0x168] sm:$0xff] %v2286_v56  ;;  %v2306_v47 = vmul.f32 %v3327_v26, %v2305_v19  ;;  %v2319_v3 = vmul.f32 %v3331_v49, %v5015_v20  ;;  %v3333_v63 = vpop.eup %3332  ;;  %vm5055_vm15 = vcmp.eq.f32.partialorder %v2327_v55, 8.507059e+37  ;;  %v2342_v60 = vand.u32 2147483647, %v5018_v17  ;;  %vm2310_vm1 = vmor %vm2308_vm7, %vm2309_vm13 }
 0x336   :  { %v2292_v25 = vadd.f32 %v3325_v31, %v2291_v6  ;;  %v2344_v52 = vand.u32 2147483648, %v5018_v17  ;;  %v2330_v42 = vor.u32 1.1754944e-38, %v2329_v1  ;;  %v2334_v9 = vmul.f32 %v3333_v63, %v5018_v17 }
 0x337   :  { %v2307_v57 = vadd.f32 %v3327_v26, %v2306_v47  ;;  %v2320_v48 = vsub.f32 1.0, %v2319_v3  ;;  %vm2324_vm2 = vweird.f32 %v3331_v49  ;;  %vm2338_vm3 = vweird.f32 %v5018_v17 }
 0x338   :  { %v2296_v7 = vsel %vm2295_vm0, %v3325_v31, %v2292_v25  ;;  %v5067_v12 = vadd.f32 1.0, %v3329_v10  ;;  %v2335_v14 = vsub.f32 1.0, %v2334_v9  ;;  %vm5073_vm4 = vcmp.eq.f32.partialorder %v2342_v60, 8.507059e+37  ;;  %vm2325_vm6 = vmor %vm2323_vm14, %vm2324_vm2 }
 0x339   :  { %v2301_v61 = vsel %vm5025_vm8, %v2300_v32, %v2296_v7  ;;  %v2311_v21 = vsel %vm2310_vm1, %v3327_v26, %v2307_v57  ;;  %v2321_v8 = vmul.f32 %v3331_v49, %v2320_v48  ;;  %v3335_v5 = vpop.eup %3334  ;;  %v2345_v54 = vor.u32 1.1754944e-38, %v2344_v52 }
 0x33a   :  { %2604 = vst [vmem:[#allocation2 + $0x170] sm:$0xff] %v2301_v61  ;;  %v2316_v2 = vsel %vm5036_vm10, %v2315_v45, %v2311_v21  ;;  %3336 = vrcp.f32 %v5067_v12  ;;  %v2336_v39 = vmul.f32 %v3333_v63, %v2335_v14  ;;  %vm2339_vm5 = vweird.f32 %v3333_v63 }
 0x33b   :  { %v1243_v18 = vpop.f32.mrf.mxu0  ;;  %v1332_v22 = vpop.f32.mrf.mxu1  ;;  %2605 = vst [vmem:[#allocation2 + $0x178] sm:$0xff] %v2316_v2  ;;  %v2322_v11 = vadd.f32 %v3331_v49, %v2321_v8  ;;  %v2349_v4 = vmul.f32 %v3335_v5, %v5030_v43  ;;  %vm2353_vm7 = vweird.f32 %v5030_v43  ;;  %v2359_v50 = vand.u32 2147483648, %v5030_v43  ;;  %vm2340_vm8 = vmor %vm2338_vm3, %vm2339_vm5 }
 0x33c   :  { %v3016_v24 = vmul.f32 -1.442695, %v1239_v34  ;;  %v1328_v27 = vadd.f32 %v5006_v13, %v4202_v16  ;;  %v2337_v23 = vadd.f32 %v3333_v63, %v2336_v39  ;;  %v1241_v53 = vadd.f32 %v1240_v40, %v4200_v15 }
 0x33d   :  { %v2326_v41 = vsel %vm2325_vm6, %v3331_v49, %v2322_v11  ;;  %v2350_v30 = vsub.f32 1.0, %v2349_v4  ;;  %vm2354_vm9 = vweird.f32 %v3335_v5  ;;  %v2357_v20 = vand.u32 2147483647, %v5030_v43 }
 0x33e   :  { %v2331_v31 = vsel %vm5055_vm15, %v2330_v42, %v2326_v41  ;;  %3338 = vpow2.f32 %v3016_v24  ;;  %v2341_v29 = vsel %vm2340_vm8, %v3333_v63, %v2337_v23  ;;  %v3017_v26 = vmul.f32 -1.442695, %v1328_v27  ;;  %vm2355_vm10 = vmor %vm2353_vm7, %vm2354_vm9 }
 0x33f   :  { %2606 = vst [vmem:[#allocation2 + $0x180] sm:$0xff] %v2331_v31  ;;  %v2351_v32 = vmul.f32 %v3335_v5, %v2350_v30  ;;  %v3018_v13 = vmul.f32 -1.442695, %v1241_v53  ;;  %v2346_v28 = vsel %vm5073_vm4, %v2345_v54, %v2341_v29  ;;  %v1330_v37 = vadd.f32 %v5045_v44, %v4202_v16 }
 0x340   :  { %v3337_v36 = vpop.eup %3336  ;;  %v1244_v38 = vadd.f32 %v1243_v18, %v4200_v15  ;;  %v1333_v17 = vadd.f32 %v1332_v22, %v4202_v16  ;;  %2607 = vst [vmem:[#allocation2 + $0x188] sm:$0xff] %v2346_v28  ;;  %v2360_v0 = vor.u32 1.1754944e-38, %v2359_v50  ;;  %3340 = vpow2.f32 %v3017_v26 }
 0x341   :  { %v2352_v46 = vadd.f32 %v3335_v5, %v2351_v32  ;;  %v2364_v34 = vmul.f32 %v3337_v36, %v5067_v12  ;;  %3342 = vpow2.f32 %v3018_v13  ;;  %v3019_v58 = vmul.f32 -1.442695, %v1330_v37 }
 0x342   :  { %v3020_v51 = vmul.f32 -1.442695, %v1244_v38  ;;  %v3021_v45 = vmul.f32 -1.442695, %v1333_v17  ;;  %vm2358_vm11 = vcmp.eq.f32.partialorder %v2357_v20, 8.507059e+37  ;;  %v2374_v1 = vand.u32 2147483648, %v5067_v12 }
 0x343   :  { %v1245_v55 = vpop.f32.mrf.mxu0  ;;  %v2356_v40 = vsel %vm2355_vm10, %v3335_v5, %v2352_v46  ;;  %v2365_v44 = vsub.f32 1.0, %v2364_v34  ;;  %v2372_v10 = vand.u32 2147483647, %v5067_v12  ;;  %v1334_v59 = vpop.f32.mrf.mxu1  ;;  %3344 = vpow2.f32 %v3019_v58 }
 0x344   :  { %v3339_v62 = vpop.eup %3338  ;;  %v2361_v19 = vsel %vm2358_vm11, %v2360_v0, %v2356_v40  ;;  %v1246_v49 = vadd.f32 %v1245_v55, %v4200_v15  ;;  %vm2369_vm12 = vweird.f32 %v3337_v36  ;;  %3346 = vpow2.f32 %v3020_v51 }
 0x345   :  { %2608 = vst [vmem:[#allocation2 + $0x190] sm:$0xff] %v2361_v19  ;;  %v2366_v43 = vmul.f32 %v3337_v36, %v2365_v44  ;;  %v5105_v56 = vadd.f32 1.0, %v3339_v62  ;;  %3348 = vpow2.f32 %v3021_v45  ;;  %v1335_v6 = vadd.f32 %v1334_v59, %v4202_v16 }
 0x346   :  { %v3341_v47 = vpop.eup %3340  ;;  %vm2368_vm13 = vweird.f32 %v5067_v12  ;;  %v2375_v25 = vor.u32 1.1754944e-38, %v2374_v1  ;;  %v3022_v60 = vmul.f32 -1.442695, %v1246_v49  ;;  %vm2373_vm15 = vcmp.eq.f32.partialorder %v2372_v10, 8.507059e+37 }
 0x347   :  { %v2367_v3 = vadd.f32 %v3337_v36, %v2366_v43  ;;  %3350 = vrcp.f32 %v5105_v56  ;;  %v3343_v63 = vpop.eup %3342  ;;  %vm2370_vm14 = vmor %vm2368_vm13, %vm2369_vm12  ;;  %v5110_v35 = vadd.f32 1.0, %v3341_v47  ;;  %v3023_v9 = vmul.f32 -1.442695, %v1335_v6 }
 0x348   :  { %v5112_v57 = vadd.f32 1.0, %v3343_v63  ;;  %v2387_v12 = vand.u32 2147483647, %v5105_v56  ;;  %v2389_v21 = vand.u32 2147483648, %v5105_v56  ;;  %vm2383_vm0 = vweird.f32 %v5105_v56 }
 0x349   :  { %v2371_v52 = vsel %vm2370_vm14, %v3337_v36, %v2367_v3  ;;  %v3345_v48 = vpop.eup %3344  ;;  %3352 = vrcp.f32 %v5110_v35  ;;  %v2402_v2 = vand.u32 2147483647, %v5110_v35  ;;  %v2404_v54 = vand.u32 2147483648, %v5110_v35 }
 0x34a   :  { %v2376_v42 = vsel %vm2373_vm15, %v2375_v25, %v2371_v52  ;;  %v3347_v7 = vpop.eup %3346  ;;  %3354 = vrcp.f32 %v5112_v57  ;;  %v5118_v8 = vadd.f32 1.0, %v3345_v48  ;;  %v2417_v18 = vand.u32 2147483647, %v5112_v57 }
 0x34b   :  { %2609 = vst [vmem:[#allocation2 + $0x198] sm:$0xff] %v2376_v42  ;;  %v3349_v61 = vpop.eup %3348  ;;  %v5120_v14 = vadd.f32 1.0, %v3347_v7  ;;  %3356 = vpow2.f32 %v3022_v60  ;;  %v2419_v22 = vand.u32 2147483648, %v5112_v57  ;;  %vm5131_vm1 = vcmp.eq.f32.partialorder %v2387_v12, 8.507059e+37 }
 0x34c   :  { %3358 = vpow2.f32 %v3023_v9  ;;  %v5129_v11 = vadd.f32 1.0, %v3349_v61  ;;  %v2390_v24 = vor.u32 1.1754944e-38, %v2389_v21  ;;  %vm2398_vm2 = vweird.f32 %v5110_v35 }
 0x34d   :  { %v3351_v5 = vpop.eup %3350  ;;  %3360 = vrcp.f32 %v5118_v8  ;;  %vm5138_vm3 = vcmp.eq.f32.partialorder %v2402_v2, 8.507059e+37  ;;  %vm2413_vm4 = vweird.f32 %v5112_v57  ;;  %v2405_v31 = vor.u32 1.1754944e-38, %v2404_v54 }
 0x34e   :  { %v2379_v33 = vmul.f32 %v3351_v5, %v5105_v56  ;;  %3362 = vrcp.f32 %v5120_v14  ;;  %vm2384_vm5 = vweird.f32 %v3351_v5  ;;  %vm5144_vm6 = vcmp.eq.f32.partialorder %v2417_v18, 8.507059e+37 }
 0x34f   :  { %v3353_v39 = vpop.eup %3352  ;;  %v2420_v26 = vor.u32 1.1754944e-38, %v2419_v22  ;;  %3364 = vrcp.f32 %v5129_v11  ;;  %vm2428_vm7 = vweird.f32 %v5118_v8  ;;  %v2432_v37 = vand.u32 2147483647, %v5118_v8  ;;  %v1248_v17 = vpop.f32.mrf.mxu0  ;;  %vm2385_vm8 = vmor %vm2383_vm0, %vm2384_vm5 }
 0x350   :  { %v2380_v4 = vsub.f32 1.0, %v2379_v33  ;;  %v3355_v27 = vpop.eup %3354  ;;  %v2394_v41 = vmul.f32 %v3353_v39, %v5110_v35  ;;  %v2434_v38 = vand.u32 2147483648, %v5118_v8  ;;  %vm2399_vm9 = vweird.f32 %v3353_v39  ;;  %v1337_v58 = vpop.f32.mrf.mxu1 }
 0x351   :  { %v3357_v30 = vpop.eup %3356  ;;  %v2409_v20 = vmul.f32 %v3355_v27, %v5112_v57  ;;  %vm2443_vm10 = vweird.f32 %v5120_v14  ;;  %vm2414_vm11 = vweird.f32 %v3355_v27  ;;  %v2447_v62 = vand.u32 2147483647, %v5120_v14  ;;  %vm2400_vm12 = vmor %vm2398_vm2, %vm2399_vm9 }
 0x352   :  { %v2381_v53 = vmul.f32 %v3351_v5, %v2380_v4  ;;  %v2395_v29 = vsub.f32 1.0, %v2394_v41  ;;  %v3359_v13 = vpop.eup %3358  ;;  %v5156_v34 = vadd.f32 1.0, %v3357_v30  ;;  %v2449_v49 = vand.u32 2147483648, %v5120_v14  ;;  %vm2415_vm13 = vmor %vm2413_vm4, %vm2414_vm11 }
 0x353   :  { %v2410_v28 = vsub.f32 1.0, %v2409_v20  ;;  %v3361_v46 = vpop.eup %3360  ;;  %v5166_v43 = vadd.f32 1.0, %v3359_v13  ;;  %vm5176_vm15 = vcmp.eq.f32.partialorder %v2432_v37, 8.507059e+37  ;;  %v2462_v9 = vand.u32 2147483647, %v5129_v11 }
 0x354   :  { %v2382_v36 = vadd.f32 %v3351_v5, %v2381_v53  ;;  %v2396_v0 = vmul.f32 %v3353_v39, %v2395_v29  ;;  %v3363_v51 = vpop.eup %3362  ;;  %v2424_v40 = vmul.f32 %v3361_v46, %v5118_v8  ;;  %vm2429_vm14 = vweird.f32 %v3361_v46 }
 0x355   :  { %v2411_v55 = vmul.f32 %v3355_v27, %v2410_v28  ;;  %v2439_v59 = vmul.f32 %v3363_v51, %v5120_v14  ;;  %v3365_v56 = vpop.eup %3364  ;;  %3366 = vrcp.f32 %v5156_v34  ;;  %vm2444_vm0 = vweird.f32 %v3363_v51 }
 0x356   :  { %v2386_v45 = vsel %vm2385_vm8, %v3351_v5, %v2382_v36  ;;  %v2397_v10 = vadd.f32 %v3353_v39, %v2396_v0  ;;  %v2425_v1 = vsub.f32 1.0, %v2424_v40  ;;  %v2454_v35 = vmul.f32 %v3365_v56, %v5129_v11 }
 0x357   :  { %v2391_v44 = vsel %vm5131_vm1, %v2390_v24, %v2386_v45  ;;  %v2412_v19 = vadd.f32 %v3355_v27, %v2411_v55  ;;  %v2440_v47 = vsub.f32 1.0, %v2439_v59  ;;  %3368 = vrcp.f32 %v5166_v43  ;;  %vm2430_vm1 = vmor %vm2428_vm7, %vm2429_vm14  ;;  %v1250_v33 = vpop.f32.mrf.mxu0 }
 0x358   :  { %2610 = vst [vmem:[#allocation2 + $0x1a0] sm:$0xff] %v2391_v44  ;;  %v2401_v6 = vsel %vm2400_vm12, %v3353_v39, %v2397_v10  ;;  %v2426_v25 = vmul.f32 %v3361_v46, %v2425_v1  ;;  %v2455_v42 = vsub.f32 1.0, %v2454_v35  ;;  %v2435_v7 = vor.u32 1.1754944e-38, %v2434_v38  ;;  %v1339_v39 = vpop.f32.mrf.mxu1 }
 0x359   :  { %v2406_v3 = vsel %vm5138_vm3, %v2405_v31, %v2401_v6  ;;  %v2416_v63 = vsel %vm2415_vm13, %v3355_v27, %v2412_v19  ;;  %v2441_v57 = vmul.f32 %v3363_v51, %v2440_v47  ;;  %vm2448_vm2 = vcmp.eq.f32.partialorder %v2447_v62, 8.507059e+37  ;;  %vm2445_vm3 = vmor %vm2443_vm10, %vm2444_vm0 }
 0x35a   :  { %2611 = vst [vmem:[#allocation2 + $0x1a8] sm:$0xff] %v2406_v3  ;;  %v2421_v60 = vsel %vm5144_vm6, %v2420_v26, %v2416_v63  ;;  %v2427_v48 = vadd.f32 %v3361_v46, %v2426_v25  ;;  %v2464_v61 = vand.u32 2147483648, %v5129_v11  ;;  %v2450_v5 = vor.u32 1.1754944e-38, %v2449_v49 }
 0x35b   :  { %2612 = vst [vmem:[#allocation2 + $0x1b0] sm:$0xff] %v2421_v60  ;;  %v2442_v12 = vadd.f32 %v3363_v51, %v2441_v57  ;;  %v2456_v2 = vmul.f32 %v3365_v56, %v2455_v42  ;;  %vm2459_vm4 = vweird.f32 %v3365_v56  ;;  %v3367_v54 = vpop.eup %3366  ;;  %vm2458_vm5 = vweird.f32 %v5129_v11 }
 0x35c   :  { %v2431_v21 = vsel %vm2430_vm1, %v3361_v46, %v2427_v48  ;;  %v1249_v8 = vadd.f32 %v1248_v17, %v4200_v15  ;;  %vm2463_vm6 = vcmp.eq.f32.partialorder %v2462_v9, 8.507059e+37  ;;  %v2469_v14 = vmul.f32 %v3367_v54, %v5156_v34  ;;  %vm2460_vm7 = vmor %vm2458_vm5, %vm2459_vm4 }
 0x35d   :  { %v2436_v18 = vsel %vm5176_vm15, %v2435_v7, %v2431_v21  ;;  %v2446_v22 = vsel %vm2445_vm3, %v3363_v51, %v2442_v12  ;;  %v2457_v50 = vadd.f32 %v3365_v56, %v2456_v2  ;;  %v2465_v24 = vor.u32 1.1754944e-38, %v2464_v61  ;;  %v3369_v30 = vpop.eup %3368 }
 0x35e   :  { %2613 = vst [vmem:[#allocation2 + $0x1b8] sm:$0xff] %v2436_v18  ;;  %v2451_v4 = vsel %vm2448_vm2, %v2450_v5, %v2446_v22  ;;  %v3024_v27 = vmul.f32 -1.442695, %v1249_v8  ;;  %v1338_v41 = vadd.f32 %v1337_v58, %v4202_v16  ;;  %v1251_v23 = vadd.f32 %v1250_v33, %v4200_v15 }
 0x35f   :  { %2614 = vst [vmem:[#allocation2 + $0x1c0] sm:$0xff] %v2451_v4  ;;  %v2461_v53 = vsel %vm2460_vm7, %v3365_v56, %v2457_v50  ;;  %v2470_v11 = vsub.f32 1.0, %v2469_v14  ;;  %v2477_v31 = vand.u32 2147483647, %v5156_v34  ;;  %v1340_v20 = vadd.f32 %v1339_v39, %v4202_v16 }
 0x360   :  { %v2466_v29 = vsel %vm2463_vm6, %v2465_v24, %v2461_v53  ;;  %v2479_v32 = vand.u32 2147483648, %v5156_v34  ;;  %v2484_v26 = vmul.f32 %v3369_v30, %v5166_v43  ;;  %3370 = vpow2.f32 %v3024_v27 }
 0x361   :  { %2615 = vst [vmem:[#allocation2 + $0x1c8] sm:$0xff] %v2466_v29  ;;  %v2471_v13 = vmul.f32 %v3367_v54, %v2470_v11  ;;  %vm2474_vm8 = vweird.f32 %v3367_v54  ;;  %v3025_v36 = vmul.f32 -1.442695, %v1338_v41  ;;  %v3026_v28 = vmul.f32 -1.442695, %v1251_v23 }
 0x362   :  { %vm2473_vm9 = vweird.f32 %v5156_v34  ;;  %v2485_v15 = vsub.f32 1.0, %v2484_v26  ;;  %v3027_v37 = vmul.f32 -1.442695, %v1340_v20  ;;  %v2492_v17 = vand.u32 2147483647, %v5166_v43 }
 0x363   :  { %v2472_v38 = vadd.f32 %v3367_v54, %v2471_v13  ;;  %v2494_v16 = vand.u32 2147483648, %v5166_v43  ;;  %3372 = vpow2.f32 %v3025_v36  ;;  %vm2475_vm10 = vmor %vm2473_vm9, %vm2474_vm8  ;;  %v2480_v46 = vor.u32 1.1754944e-38, %v2479_v32 }
 0x364   :  { %v2486_v0 = vmul.f32 %v3369_v30, %v2485_v15  ;;  %vm2489_vm11 = vweird.f32 %v3369_v30  ;;  %3374 = vpow2.f32 %v3026_v28  ;;  %vm2478_vm12 = vcmp.eq.f32.partialorder %v2477_v31, 8.507059e+37 }
 0x365   :  { %v2476_v58 = vsel %vm2475_vm10, %v3367_v54, %v2472_v38  ;;  %3376 = vpow2.f32 %v3027_v37  ;;  %vm2488_vm13 = vweird.f32 %v5166_v43  ;;  %v2495_v34 = vor.u32 1.1754944e-38, %v2494_v16 }
 0x366   :  { %v3371_v51 = vpop.eup %3370  ;;  %v2481_v45 = vsel %vm2478_vm12, %v2480_v46, %v2476_v58  ;;  %v2487_v55 = vadd.f32 %v3369_v30, %v2486_v0  ;;  %vm2490_vm14 = vmor %vm2488_vm13, %vm2489_vm11  ;;  %vm2493_vm15 = vcmp.eq.f32.partialorder %v2492_v17, 8.507059e+37 }
 0x367   :  { %2616 = vst [vmem:[#allocation2 + $0x1d0] sm:$0xff] %v2481_v45  ;;  %v1594_v40 = vadd.f32 1.0, %v3371_v51 }
 0x368   :  { %v2491_v44 = vsel %vm2490_vm14, %v3369_v30, %v2487_v55 }
 0x369   :  { %v3373_v10 = vpop.eup %3372  ;;  %v2496_v59 = vsel %vm2493_vm15, %v2495_v34, %v2491_v44  ;;  %3378 = vrcp.f32 %v1594_v40  ;;  %v2507_v47 = vand.u32 2147483647, %v1594_v40  ;;  %v2509_v3 = vand.u32 2147483648, %v1594_v40 }
 0x36a   :  { %v3375_v62 = vpop.eup %3374  ;;  %2617 = vst [vmem:[#allocation2 + $0x1d8] sm:$0xff] %v2496_v59  ;;  %v1595_v19 = vadd.f32 1.0, %v3373_v10  ;;  %vm2503_vm0 = vweird.f32 %v1594_v40 }
 0x36b   :  { %v3377_v1 = vpop.eup %3376  ;;  %v1596_v49 = vadd.f32 1.0, %v3375_v62  ;;  %vm5206_vm2 = vcmp.eq.f32.partialorder %v2507_v47, 8.507059e+37  ;;  %v2510_v42 = vor.u32 1.1754944e-38, %v2509_v3 }
 0x36c   :  { %3380 = vrcp.f32 %v1595_v19  ;;  %v5203_v56 = vadd.f32 1.0, %v3377_v1  ;;  %vm2518_vm3 = vweird.f32 %v1595_v19  ;;  %v2522_v7 = vand.u32 2147483647, %v1595_v19 }
 0x36d   :  { %3382 = vrcp.f32 %v1596_v49  ;;  %v2524_v21 = vand.u32 2147483648, %v1595_v19  ;;  %v2539_v2 = vand.u32 2147483648, %v1596_v49  ;;  %vm2533_vm6 = vweird.f32 %v1596_v49 }
 0x36e   :  { %3384 = vrcp.f32 %v5203_v56  ;;  %v2537_v8 = vand.u32 2147483647, %v1596_v49  ;;  %vm5214_vm8 = vcmp.eq.f32.partialorder %v2522_v7, 8.507059e+37  ;;  %v2554_v23 = vand.u32 2147483648, %v5203_v56 }
 0x36f   :  { %v3379_v6 = vpop.eup %3378  ;;  %v2525_v24 = vor.u32 1.1754944e-38, %v2524_v21  ;;  %v2540_v41 = vor.u32 1.1754944e-38, %v2539_v2  ;;  %v2552_v11 = vand.u32 2147483647, %v5203_v56  ;;  %vm2548_vm13 = vweird.f32 %v5203_v56 }
 0x370   :  { %v2499_v43 = vmul.f32 %v3379_v6, %v1594_v40  ;;  %vm2504_vm1 = vweird.f32 %v3379_v6  ;;  %vm2538_vm12 = vcmp.eq.f32.partialorder %v2537_v8, 8.507059e+37  ;;  %v2555_v26 = vor.u32 1.1754944e-38, %v2554_v23 }
 0x371   :  { %vm2505_vm4 = vmor %vm2503_vm0, %vm2504_vm1  ;;  %vm2553_vm15 = vcmp.eq.f32.partialorder %v2552_v11, 8.507059e+37 }
 0x372   :  { %v3381_v63 = vpop.eup %3380  ;;  %v2500_v25 = vsub.f32 1.0, %v2499_v43 }
 0x373   :  { %v3383_v35 = vpop.eup %3382  ;;  %v2514_v60 = vmul.f32 %v3381_v63, %v1595_v19  ;;  %vm2519_vm5 = vweird.f32 %v3381_v63 }
 0x374   :  { %v2501_v52 = vmul.f32 %v3379_v6, %v2500_v25  ;;  %v2529_v48 = vmul.f32 %v3383_v35, %v1596_v49  ;;  %v3385_v12 = vpop.eup %3384  ;;  %vm2534_vm7 = vweird.f32 %v3383_v35  ;;  %vm2520_vm9 = vmor %vm2518_vm3, %vm2519_vm5 }
 0x375   :  { %v2515_v9 = vsub.f32 1.0, %v2514_v60  ;;  %v2544_v54 = vmul.f32 %v3385_v12, %v5203_v56  ;;  %vm2535_vm10 = vmor %vm2533_vm6, %vm2534_vm7  ;;  %vm2549_vm11 = vweird.f32 %v3385_v12 }
 0x376   :  { %v2502_v61 = vadd.f32 %v3379_v6, %v2501_v52  ;;  %v2530_v5 = vsub.f32 1.0, %v2529_v48  ;;  %vm2550_vm14 = vmor %vm2548_vm13, %vm2549_vm11 }
 0x377   :  { %v2516_v33 = vmul.f32 %v3381_v63, %v2515_v9  ;;  %v2545_v14 = vsub.f32 1.0, %v2544_v54 }
 0x378   :  { %v2506_v18 = vsel %vm2505_vm4, %v3379_v6, %v2502_v61  ;;  %v2531_v22 = vmul.f32 %v3383_v35, %v2530_v5 }
 0x379   :  { %v2511_v39 = vsel %vm5206_vm2, %v2510_v42, %v2506_v18  ;;  %v2517_v4 = vadd.f32 %v3381_v63, %v2516_v33  ;;  %v2546_v53 = vmul.f32 %v3385_v12, %v2545_v14 }
 0x37a   :  { %2618 = vst [vmem:[#allocation2 + $0x1e0] sm:$0xff] %v2511_v39  ;;  %v2532_v27 = vadd.f32 %v3383_v35, %v2531_v22 }
 0x37b   :  { %v2521_v30 = vsel %vm2520_vm9, %v3381_v63, %v2517_v4  ;;  %v2547_v32 = vadd.f32 %v3385_v12, %v2546_v53 }
 0x37c   :  { %v2526_v31 = vsel %vm5214_vm8, %v2525_v24, %v2521_v30  ;;  %v2536_v20 = vsel %vm2535_vm10, %v3383_v35, %v2532_v27 }
 0x37d   :  { %2619 = vst [vmem:[#allocation2 + $0x1e8] sm:$0xff] %v2526_v31  ;;  %v2541_v29 = vsel %vm2538_vm12, %v2540_v41, %v2536_v20  ;;  %v2551_v13 = vsel %vm2550_vm14, %v3385_v12, %v2547_v32 }
 0x37e   :  { %2620 = vst [vmem:[#allocation2 + $0x1f0] sm:$0xff] %v2541_v29  ;;  %v2556_v36 = vsel %vm2553_vm15, %v2555_v26, %v2551_v13 }
 0x37f   :  { %2621 = vst [vmem:[#allocation2 + $0x1f8] sm:$0xff] %v2556_v36 }
 0x380   :  { %2634 = dma.vmem_to_hbm [thread:$0]  %s2627_s23, 8192, %s2629_s26, [#allocation3], %s3414_s10, %s3414_s10, %s3415_s27  }
 0x381   :  { %3411 = dma.done.wait [#allocation3], 8192  }
 0x382   :  { %3412 = vsyncadd [#allocation3], 4294959104 }
 0x383   :  { %2643 = vsyncpa [#allocation3], 1 }

</bundles_post_ra>
